<compile_context>
chip_gen: v5e
topology: v5e:2x2
jax: 0.10.0
libtpu: 0.0.40
codegen_flags: <defaults>
</compile_context>

<pallas_src>
import jax
import jax.numpy as jnp
from jax.experimental import pallas as pl
from jax.experimental.pallas import tpu as pltpu


DIM_INPUTS = 4 * 96 * 96  # 36864, hardcoded by the module


# ---------------------------------------------------------------------------
# Kernel 1: dense linear  y = x @ W + b
#   grid = (N // tn  [parallel, megacore on v7x],  K // tk  [arbitrary, reduction])
#   f32 VMEM accumulator initialized with the bias at k == 0.
# ---------------------------------------------------------------------------
def _linear_kernel(x_ref, w_ref, b_ref, o_ref, acc_ref):
    k = pl.program_id(1)

    @pl.when(k == 0)
    def _():
        acc_ref[...] = jnp.broadcast_to(b_ref[...], acc_ref.shape).astype(jnp.float32)

    acc_ref[...] += jnp.dot(x_ref[...], w_ref[...],
                            preferred_element_type=jnp.float32)

    @pl.when(k == pl.num_programs(1) - 1)
    def _():
        o_ref[...] = acc_ref[...].astype(o_ref.dtype)


def pallas_linear(x, w, b, *, tk=9216, tn=128):
    B, K = x.shape
    K2, N = w.shape
    assert K == K2 and K % tk == 0 and N % tn == 0
    return pl.pallas_call(
        _linear_kernel,
        out_shape=jax.ShapeDtypeStruct((B, N), jnp.float32),
        grid_spec=pltpu.PrefetchScalarGridSpec(
            num_scalar_prefetch=0,
            grid=(N // tn, K // tk),
            in_specs=[
                pl.BlockSpec((B, tk), lambda j, k: (0, k)),
                pl.BlockSpec((tk, tn), lambda j, k: (k, j)),
                pl.BlockSpec((1, tn), lambda j, k: (0, j)),
            ],
            out_specs=pl.BlockSpec((B, tn), lambda j, k: (0, j)),
            scratch_shapes=[pltpu.VMEM((B, tn), jnp.float32)],
        ),
        compiler_params=pltpu.CompilerParams(
            dimension_semantics=("parallel", "arbitrary"),
            vmem_limit_bytes=32 * 1024 * 1024),
    )(x, w, b.reshape(1, N))


# ---------------------------------------------------------------------------
# Kernel 2: ALL EncoderRegions fused into a single lane-dense kernel step.
# Per region r (weights pre-fused in the wrapper, all resident in VMEM):
#     h = x @ W1cat[r] + b1[r]        (B, U*H)   lane-dense
#     h = LeakyReLU(h, 0.01)
#     y = h @ W2blockdiag[r] + b2[r]  (B, U*Dout) flat slab, written directly
#     x = y                           (feeds the next region; .detach() is a no-op)
# ---------------------------------------------------------------------------
def make_regions_kernel(n_regions):
    def kernel(*refs):
        x_ref = refs[0]
        w_refs = refs[1:1 + 4 * n_regions]
        out_refs = refs[1 + 4 * n_regions:]
        x = x_ref[...]
        for r in range(n_regions):
            w1, b1, w2bd, b2 = w_refs[4 * r: 4 * r + 4]
            h = jnp.dot(x, w1[...], preferred_element_type=jnp.float32) + b1[...]
            h = jnp.where(h >= 0, h, 0.01 * h)           # nn.LeakyReLU default slope
            y = jnp.dot(h, w2bd[...], preferred_element_type=jnp.float32) + b2[...]
            out_refs[r][...] = y.astype(out_refs[r].dtype)
            x = y
    return kernel


def pallas_encoder_regions(x, fused_regions):
    B = x.shape[0]
    n = len(fused_regions)

    in_arrays = [x]
    in_specs = [pl.BlockSpec(x.shape, lambda i: (0, 0))]
    out_shapes = []
    out_specs = []
    for (w1f, b1f, w2bd, b2f) in fused_regions:
        for a in (w1f, b1f, w2bd, b2f):
            in_arrays.append(a)
            in_specs.append(pl.BlockSpec(a.shape, lambda i: (0, 0)))
        out_dim = w2bd.shape[1]
        out_shapes.append(jax.ShapeDtypeStruct((B, out_dim), jnp.float32))
        out_specs.append(pl.BlockSpec((B, out_dim), lambda i: (0, 0)))

    outs = pl.pallas_call(
        make_regions_kernel(n),
        out_shape=tuple(out_shapes),
        grid_spec=pltpu.PrefetchScalarGridSpec(
            num_scalar_prefetch=0,
            grid=(1,),
            in_specs=in_specs,
            out_specs=out_specs,
        ),
        compiler_params=pltpu.CompilerParams(
            dimension_semantics=("arbitrary",)),
    )(*in_arrays)
    if not isinstance(outs, (tuple, list)):
        outs = (outs,)
    return outs


# ---------------------------------------------------------------------------
# Parameter init (matches module structure), weight pre-fusion, forward glue.
# ---------------------------------------------------------------------------
def init_encoder_params(key, num_units_regions, dim_unit, dim_hidden):
    n_keys = 2 + 4 * len(num_units_regions)
    keys = jax.random.split(key, n_keys)
    params = {
        "linear_w": jax.random.normal(keys[0], (DIM_INPUTS, 256), jnp.float32) * 0.01,
        "linear_b": jax.random.normal(keys[1], (256,), jnp.float32) * 0.01,
        "regions": [],
    }
    din = 256
    ki = 2
    for U in num_units_regions:
        w1 = jax.random.normal(keys[ki + 0], (U, din, dim_hidden), jnp.float32) / jnp.sqrt(din)
        b1 = jax.random.normal(keys[ki + 1], (U, dim_hidden), jnp.float32) * 0.01
        w2 = jax.random.normal(keys[ki + 2], (U, dim_hidden, dim_unit), jnp.float32) / jnp.sqrt(dim_hidden)
        b2 = jax.random.normal(keys[ki + 3], (U, dim_unit), jnp.float32) * 0.01
        params["regions"].append((w1, b1, w2, b2))
        din = U * dim_unit
        ki += 4
    return params


def prepare_fused_params(params):
    """One-time weight prep: concat W1 over units, block-diagonalize W2."""
    fused_regions = []
    region_dims = []
    for (w1, b1, w2, b2) in params["regions"]:
        U, Din, H = w1.shape
        Dout = w2.shape[-1]
        w1f = jnp.transpose(w1, (1, 0, 2)).reshape(Din, U * H)      # (Din, U*H)
        b1f = b1.reshape(1, U * H)
        eye = jnp.eye(U, dtype=w2.dtype)
        w2bd = jnp.einsum("uhd,uv->uhvd", w2, eye).reshape(U * H, U * Dout)
        b2f = b2.reshape(1, U * Dout)
        fused_regions.append((w1f, b1f, w2bd, b2f))
        region_dims.append((U, Dout))
    return {
        "linear_w": params["linear_w"],
        "linear_b": params["linear_b"],
        "fused_regions": fused_regions,
        "region_dims": region_dims,
    }


def encoder_forward(fused_params, inputs):
    # inputs.detach() has no effect in a forward-only computation.
    x = pallas_linear(inputs, fused_params["linear_w"], fused_params["linear_b"])  # (B, 256)
    flats = pallas_encoder_regions(x, fused_params["fused_regions"])               # (B, U*Dout) per region
    results = []
    for flat, (U, Dout) in zip(flats, fused_params["region_dims"]):
        results.append(flat.reshape(flat.shape[0], U, Dout))  # free row-major reshape, no transpose
    return results


# Pure-JAX reference for verification (uses the original per-unit weights).
def encoder_reference(params, inputs):
    x = inputs @ params["linear_w"] + params["linear_b"]
    outs = []
    for (w1, b1, w2, b2) in params["regions"]:
        B = x.shape[0]
        U = w1.shape[0]
        xf = jnp.broadcast_to(x.reshape(B, 1, -1), (B, U, w1.shape[1]))
        h = jnp.einsum("bud,udh->buh", xf, w1) + b1
        h = jnp.where(h >= 0, h, 0.01 * h)
        y = jnp.einsum("buh,uho->buo", h, w2) + b2
        outs.append(y)
        x = y.reshape(B, -1)
    return outs


if __name__ == "__main__":
    num_units_regions = (4, 8)
    dim_unit = 8
    dim_hidden = 32
    batch = 2

    key = jax.random.PRNGKey(0)
    k_params, k_in = jax.random.split(key)
    params = init_encoder_params(k_params, num_units_regions, dim_unit, dim_hidden)
    fused = prepare_fused_params(params)
    inputs = jax.random.normal(k_in, (batch, DIM_INPUTS), jnp.float32)

    outs = encoder_forward(fused, inputs)
    outs = [jax.block_until_ready(o) for o in outs]

    refs = encoder_reference(params, inputs)
    for o, r, U in zip(outs, refs, num_units_regions):
        assert o.shape == (batch, U, dim_unit), o.shape
        assert jnp.allclose(o, r, rtol=1e-3, atol=1e-3), "mismatch vs reference"

    print("KERNEL_OK")
</pallas_src>

<mosaic_0001>
module attributes {stable_mosaic.version = 11 : i64} {
  func.func @_linear_kernel(%arg0: i32, %arg1: i32, %arg2: memref<2x9216xf32, #tpu.memory_space<vmem>>, %arg3: memref<9216x128xf32, #tpu.memory_space<vmem>>, %arg4: memref<1x128xf32, #tpu.memory_space<vmem>>, %arg5: memref<2x128xf32, #tpu.memory_space<vmem>>, %arg6: memref<2x128xf32, #tpu.memory_space<vmem>>) attributes {dimension_semantics = [#tpu.dimension_semantics<parallel>, #tpu.dimension_semantics<arbitrary>], iteration_bounds = array<i64: 2, 4>, scalar_prefetch = 0 : i64, scratch_operands = 1 : i64, tpu.core_type = #tpu.core_type<tc>, window_params = [{transform_indices = @transform_0, window_bounds = array<i64: 2, 9216>}, {transform_indices = @transform_1, window_bounds = array<i64: 9216, 128>}, {transform_indices = @transform_2, window_bounds = array<i64: 1, 128>}, {transform_indices = @transform_3, window_bounds = array<i64: 2, 128>}]} {
    %c0_i32 = arith.constant 0 : i32
    %0 = arith.cmpi eq, %arg1, %c0_i32 : i32
    %1 = arith.extui %0 : i1 to i32
    %c0_i32_0 = arith.constant 0 : i32
    %2 = arith.cmpi ne, %1, %c0_i32_0 : i32
    scf.if %2 {
      %c0_9 = arith.constant 0 : index
      %c0_10 = arith.constant 0 : index
      %12 = vector.load %arg4[%c0_9, %c0_10] : memref<1x128xf32, #tpu.memory_space<vmem>>, vector<1x128xf32>
      %13 = vector.shape_cast %12 : vector<1x128xf32> to vector<1x128xf32>
      %14 = vector.broadcast %13 : vector<1x128xf32> to vector<2x128xf32>
      %c0_11 = arith.constant 0 : index
      %c0_12 = arith.constant 0 : index
      %15 = vector.load %arg6[%c0_11, %c0_12] : memref<2x128xf32, #tpu.memory_space<vmem>>, vector<2x128xf32>
      tpu.vector_store %arg6[%c0_11, %c0_12], %14 {strides = array<i32>} : memref<2x128xf32, #tpu.memory_space<vmem>>, vector<2x128xf32>,
    } else {
    }
    %c0 = arith.constant 0 : index
    %c0_1 = arith.constant 0 : index
    %3 = vector.load %arg6[%c0, %c0_1] : memref<2x128xf32, #tpu.memory_space<vmem>>, vector<2x128xf32>
    %c0_2 = arith.constant 0 : index
    %c0_3 = arith.constant 0 : index
    %4 = vector.load %arg2[%c0_2, %c0_3] : memref<2x9216xf32, #tpu.memory_space<vmem>>, vector<2x9216xf32>
    %c0_4 = arith.constant 0 : index
    %c0_5 = arith.constant 0 : index
    %5 = vector.load %arg3[%c0_4, %c0_5] : memref<9216x128xf32, #tpu.memory_space<vmem>>, vector<9216x128xf32>
    %cst = arith.constant dense<0.000000e+00> : vector<2x128xf32>
    %6 = tpu.matmul %4, %5, %cst {dimension_numbers = #tpu.dot_dimension_numbers<[1], [0], [0], [1], [0, 0, 1, 1], [], []>} : vector<2x9216xf32>, vector<9216x128xf32>, vector<2x128xf32> -> vector<2x128xf32>
    %7 = arith.addf %3, %6 : vector<2x128xf32>
    %c0_6 = arith.constant 0 : index
    %c0_7 = arith.constant 0 : index
    %8 = vector.load %arg6[%c0_6, %c0_7] : memref<2x128xf32, #tpu.memory_space<vmem>>, vector<2x128xf32>
    tpu.vector_store %arg6[%c0_6, %c0_7], %7 {strides = array<i32>} : memref<2x128xf32, #tpu.memory_space<vmem>>, vector<2x128xf32>,
    %c3_i32 = arith.constant 3 : i32
    %9 = arith.cmpi eq, %arg1, %c3_i32 : i32
    %10 = arith.extui %9 : i1 to i32
    %c0_i32_8 = arith.constant 0 : i32
    %11 = arith.cmpi ne, %10, %c0_i32_8 : i32
    scf.if %11 {
      %c0_9 = arith.constant 0 : index
      %c0_10 = arith.constant 0 : index
      %12 = vector.load %arg6[%c0_9, %c0_10] : memref<2x128xf32, #tpu.memory_space<vmem>>, vector<2x128xf32>
      %c0_11 = arith.constant 0 : index
      %c0_12 = arith.constant 0 : index
      %13 = vector.load %arg5[%c0_11, %c0_12] : memref<2x128xf32, #tpu.memory_space<vmem>>, vector<2x128xf32>
      tpu.vector_store %arg5[%c0_11, %c0_12], %12 {strides = array<i32>} : memref<2x128xf32, #tpu.memory_space<vmem>>, vector<2x128xf32>,
    } else {
    }
    return
  }
  func.func @transform_0(%arg0: i32, %arg1: i32) -> (i32, i32) {
    %c0_i32 = arith.constant 0 : i32
    %c0_i32_0 = arith.constant 0 : i32
    return %c0_i32, %arg1 : i32, i32
  }
  func.func @transform_1(%arg0: i32, %arg1: i32) -> (i32, i32) {
    %c0_i32 = arith.constant 0 : i32
    return %arg1, %arg0 : i32, i32
  }
  func.func @transform_2(%arg0: i32, %arg1: i32) -> (i32, i32) {
    %c0_i32 = arith.constant 0 : i32
    %c0_i32_0 = arith.constant 0 : i32
    return %c0_i32, %arg0 : i32, i32
  }
  func.func @transform_3(%arg0: i32, %arg1: i32) -> (i32, i32) {
    %c0_i32 = arith.constant 0 : i32
    %c0_i32_0 = arith.constant 0 : i32
    return %c0_i32, %arg0 : i32, i32
  }
}

</mosaic_0001>

<bundles_post_ra>
// kernel: tpu_custom_call.1
= control target key start
LH: loop header
LB: loop body
LE: loop exit
PB: predicated region body
PF: predicated region fallthrough
CT: control target
= control target key end

     0   :  { %s5169_s0 = inlined_call_operand.hbm [shape: f32[2,36864], index: 0, kind: input, shape index: {}]   ;;  %s5170_s1 = inlined_call_operand.hbm [shape: f32[36864,256], index: 1, kind: input, shape index: {}]   ;;  %s5171_s2 = inlined_call_operand.hbm [shape: f32[1,256], index: 2, kind: input, shape index: {}]   ;;  %s5172_s3 = inlined_call_operand.hbm [shape: f32[2,256], index: 3, kind: output, shape index: {}]  }
   0x1   :  { %5178 = sst [smem:[#allocation20_spill]] %s5170_s1 }
   0x2   :  { %5179 = sst [smem:[#allocation21_spill]] %s5172_s3 }
   0x3   :  { %8 = vsyncpa [#allocation4], 0 }
   0x4   :  { %10 = vsyncpa [#allocation4 + $0x1], 0 }
   0x5   :  { %11 = vsyncpa [#allocation7], 0 }
   0x6   :  { %13 = vsyncpa [#allocation7 + $0x1], 0 }
   0x7   :  { %14 = vsyncpa [#allocation5], 0 }
   0x8   :  { %16 = vsyncpa [#allocation5 + $0x1], 0  ;;  %s3658_s12 = smov 0   ;;  %s3660_s13 = smov 0  }
   0x9   :  { %s3662_s14 = smov 0   ;;  %s3664_s15 = smov 0  }
   0xa   :  { %s3666_s16 = smov 0   ;;  %s3668_s17 = smov 0  }
   0xb   :  { %s3670_s18 = smov 0   ;;  %s3672_s19 = smov 0  }
   0xc   :  { %s3674_s20 = smov 0   ;;  %s3676_s21 = smov 0  }
   0xd   :  { %s3678_s22 = smov 0   ;;  %s3680_s23 = smov 0  }
   0xe   :  { %s3682_s24 = smov 0   ;;  %s3684_s25 = smov 0  }
   0xf LB: > { %5180 = sst [smem:[#allocation14_spill]] %s3613_s20  ;;  %s34_s26 = sadd.s32 1, %s3629_s24  ;;  %s3633_s25 = sphi %s3684_s25, %s22_s25   ;;  %s3629_s24 = sphi %s3682_s24, %s5213_s24   ;;  %s3625_s23 = sphi %s3680_s23, %s5202_s23   ;;  %s3621_s22 = sphi %s3678_s22, %s5212_s22   ;;  %s3617_s21 = sphi %s3676_s21, %s5201_s21   ;;  %s3613_s20 = sphi %s3674_s20, %s5200_s20   ;;  %s3609_s19 = sphi %s3672_s19, %s5211_s19   ;;  %s3605_s18 = sphi %s3670_s18, %s5210_s18   ;;  %s3601_s17 = sphi %s3668_s17, %s5209_s17   ;;  %s3597_s16 = sphi %s3666_s16, %s5208_s16   ;;  %s3593_s15 = sphi %s3664_s15, %s5207_s15   ;;  %s3589_s14 = sphi %s3662_s14, %s5206_s14   ;;  %s3585_s13 = sphi %s3660_s13, %s5205_s13   ;;  %s3581_s12 = sphi %s3658_s12, %s5204_s12  }
  0x10   : > { %5181 = sst [smem:[#allocation15_spill]] %s3621_s22  ;;  %p49_p0 = scmp.eq.s32.totalorder %s3633_s25, 0 }
  0x11   : > { %5182 = sst [smem:[#allocation16_spill]] %s3625_s23  ;;  %p76_p1 = scmp.ne.s32.totalorder %s3601_s17, %s3597_s16 }
  0x12   : > { %p82_p2 = scmp.ne.s32.totalorder %s3597_s16, %s3593_s15  ;;  %p3271_p4 = scmp.lt.s32.totalorder %s3633_s25, 8 }
  0x13   : > { %p78_p3 = por %p76_p1, %p49_p0  ;;  %s178_s28 = sand.u32 1, %s3633_s25  }
  0x14   : > { %s180_s29 = sand.u32 1, %s3601_s17   ;;  %s3244_s4 = smul.u32 2304, %s3625_s23 }
  0x15   : > { %s3246_s30 = smul.u32 9216, %s180_s29  ;;  %p3261_p5 = pnand %p3271_p4, %p78_p3 }
  0x16   : > { %s187_s5 = sadd.s32 %s3629_s24, %s3244_s4  ;;  %s5183_s1 = sld [smem:[#allocation20_spill]] }
  0x17   : > { %s182_s6 = scalar_lea.vmem [#allocation6], %s3246_s30  ;;  %s3234_s8 = sshll.u32 %s187_s5, 3 }
  0x18   : > { %s192_s7 = sshll.u32 %s182_s6, 4  ;;  %s3747_s27 = scalar_lea.sflag [#allocation7], %s178_s28  ;;  %s193_s7 = int_to_ptr.vmem [resolvable:$true] %s192_s7 }
  0x19   : > { %s3635_s30 = smov 256   ;;  %s3636_s4 = smov 128  }
  0x1a   : > { %s3637_s5 = smov 8   ;;  %p3235_p6 = scmp.ge.s32.totalorder %s3633_s25, 1 }
  0x1b   : > { %p217_p7 = scmp.lt.s32.totalorder %s3633_s25, 9  ;;  %s31_s28 = sadd.s32 1, %s3625_s23 }
  0x1c   : > { %s189_s11 = scalar_lea.hbm %s5183_s1, %s3234_s8  ;;  %s3757_s8 = sadd.s32 4294967295, %s3633_s25  }
  0x1d   : > { %s190_s29 = sshll.u32 %s189_s11, 4  ;;  %p3752_p8 = pnand %p3235_p6, %p217_p7  ;;  %s191_s29 = int_to_ptr.hbm [resolvable:$true] %s190_s29 }
  0x1e   : > { %3263 = dma.hbm_to_vmem [thread:$0]  (!%p3261_p5), %s191_s29, 147456, %s193_s7, %s3747_s27, %s3635_s30, %s3636_s4, %s3637_s5  }
  0x1f   : > { %s41_s9 = sadd.s32 1, %s3613_s20  ;;  %p32_p9 = scmp.ge.s32.totalorder %s31_s28, 4 }
  0x20   : > { %p48_p10 = scmp.ne.s32.totalorder %s3613_s20, %s3609_s19  ;;  %p54_p11 = scmp.ne.s32.totalorder %s3609_s19, %s3605_s18 }
  0x21   : > { %p55_p12 = scmp.eq.s32.totalorder %s3757_s8, 0  ;;  %s5215_s28 = smov (%p32_p9, %s31_s28), 0 }
  0x22   : > { %5185 = sst [smem:[#allocation17_spill]] %s5215_s28  ;;  %s5217_s26 = smov (!%p32_p9, %s34_s26), %s3629_s24 }
  0x23   : > { %s38_s7 = ssub.s32 %s3625_s23, %s5215_s28  ;;  %p3775_p13 = por %p49_p0, %p48_p10 }
  0x24   : > { %p36_p1 = scmp.ge.s32.totalorder %s5217_s26, 2  ;;  %p39_p3 = scmp.eq.s32.totalorder %s38_s7, 0 }
  0x25   : > { %p3781_p5 = por %p55_p12, %p54_p11  ;;  %p3790_p6 = por %p82_p2, %p55_p12 }
  0x26   : > { %s5219_s26 = smov (%p36_p1, %s5217_s26), 0  ;;  %s158_s4 = sand.u32 1, %s3613_s20  }
  0x27   : > { %5189 = sst [smem:[#allocation18_spill]] %s5219_s26  ;;  %s65_s30 = ssub.s32 %s3629_s24, %s5219_s26 }
  0x28   : > { %s3797_s29 = scalar_select %p39_p3, %s3613_s20, %s41_s9  }
  0x29   : > { %s66_s5 = sor.u32 %s65_s30, %s38_s7  ;;  %s3245_s1 = smul.u32 144, %s158_s4 }
  0x2a   : > { %5190 = sst [smem:[#allocation19_spill]] %s3797_s29  ;;  %p67_p7 = scmp.eq.s32.totalorder %s66_s5, 0 }
  0x2b   : > { %s3243_s15 = smul.u32 144, %s3625_s23  ;;  %p3258_p2 = pnand %p3271_p4, %p3775_p13 }
  0x2c   : > { %s5191_s28 = sadd.s32 1, %s3601_s17  ;;  %s162_s20 = scalar_lea.vmem [#allocation3], %s3245_s1 }
  0x2d   : > { %s3810_s9 = scalar_select %p67_p7, %s3601_s17, %s5191_s28  }
  0x2e   : > { %s167_s7 = scalar_lea.hbm %s5169_s0, %s3243_s15  ;;  %s171_s3 = sshll.u32 %s162_s20, 4  ;;  %s172_s3 = int_to_ptr.vmem [resolvable:$true] %s171_s3 }
  0x2f   : > { %s169_s5 = sshll.u32 %s167_s7, 4  ;;  %s159_s10 = scalar_lea.sflag [#allocation4], %s158_s4  ;;  %s170_s5 = int_to_ptr.hbm [resolvable:$true] %s169_s5 }
  0x30   : > { %3260 = dma.hbm_to_vmem [thread:$0]  (!%p3258_p2), %s170_s5, 2304, %s172_s3, %s159_s10  }
  0x31   : > { %s3229_s23 = sadd.s32 4294967294, %s3633_s25   ;;  %p93_p9 = scmp.eq.s32.totalorder %s65_s30, 0 }
  0x32   : > { %s95_s22 = sadd.s32 1, %s3589_s14  ;;  %p102_p10 = scmp.ne.s32.totalorder %s3589_s14, %s3585_s13 }
  0x33   : > { %p108_p11 = scmp.ne.s32.totalorder %s3585_s13, %s3581_s12  ;;  %p132_p3 = scmp.eq.s32.totalorder %s3757_s8, 7 }
  0x34   : > { %s3822_s26 = scalar_select %p93_p9, %s3589_s14, %s95_s22  }
  0x35   : > { %p3826_p13 = por %p102_p10, %p49_p0  ;;  %p3832_p1 = por %p108_p11, %p55_p12 }
  0x36   : > { %p138_p7 = scmp.eq.s32.totalorder %s3229_s23, 7  ;;  %s204_s3 = sand.u32 1, %s3589_s14  }
  0x37   : > { %s208_s30 = scalar_lea.hbm %s5171_s2, %s3629_s24  ;;  %p3842_p2 = por %p132_p3, %p102_p10 }
  0x38   : > { %p3846_p0 = por %p138_p7, %p108_p11  ;;  %s210_s15 = sshll.u32 %s208_s30, 4  ;;  %s211_s15 = int_to_ptr.hbm [resolvable:$true] %s210_s15 }
  0x39   : > { %s205_s7 = scalar_lea.vmem [#allocation8], %s204_s3  ;;  %p3264_p12 = pnand %p3271_p4, %p3826_p13 }
  0x3a   : > { %s212_s5 = sshll.u32 %s205_s7, 4  ;;  %221 = sbr.rel (%p3752_p8) target bundleno = 861 (0x35d), region = 32  ;;  %s213_s5 = int_to_ptr.vmem [resolvable:$true] %s212_s5 }
  0x3b   : > { %3266 = dma.hbm_to_vmem [thread:$0]  (!%p3264_p12), %s211_s15, 16, %s213_s5, %s3747_s27  }
  0x3c   : > { %s223_s23 = sand.u32 (!%p3752_p8), 1, %s3609_s19  }
  0x3d   : > { %s3247_s10 = smul.u32 (!%p3752_p8), 144, %s223_s23  ;;  %s224_s20 = scalar_lea.sflag (!%p3752_p8), [#allocation4], %s223_s23 }
  0x3f   : > { %s3858_s29 = scalar_lea.vmem [#allocation3], %s3247_s10 }
  0x40   : > { %3564 = dma.done.wait (%p3781_p5), %s224_s20, 2304  }
  0x41   : > { %3566 = vsyncadd (%p3781_p5), %s224_s20, 4294964992  ;;  %s233_s28 = sand.u32 1, %s3757_s8   ;;  %s235_s27 = sand.u32 1, %s3597_s16  }
  0x42   : > { %s3248_s3 = smul.u32 9216, %s235_s27  ;;  %s234_s6 = scalar_lea.sflag [#allocation7], %s233_s28 }
  0x44   : > { %s3866_s30 = scalar_lea.vmem [#allocation6], %s3248_s3 }
  0x45   : > { %3568 = dma.done.wait (%p3790_p6), %s234_s6, 147456  }
  0x46   : > { %3570 = vsyncadd (%p3790_p6), %s234_s6, 4294819840  ;;  %s3873_s15 = sand.u32 1, %s3585_s13  }
  0x47   : > { %s246_s18 = scalar_lea.vmem [#allocation8], %s3873_s15 }
  0x48   : > { %3572 = dma.done.wait (%p3832_p1), %s234_s6, 16  }
  0x49   : > { %3574 = vsyncadd (%p3832_p1), %s234_s6, 4294967280  ;;  %s3236_s8 = sshll.u32 %s3873_s15, 1  ;;  %p3237_p4 = scmp.ne.s32.totalorder %s3617_s21, 0 }
  0x4a   : > { %s3881_s7 = scalar_lea.vmem [#allocation9], %s3236_s8 }
  0x4b   : > { %284 = sbr.rel (%p3237_p4) target bundleno = 82 (0x52), region = 48 }
  0x50   : > { %v3388_v0 = vld [vmem:[%s246_s18] ss:$0 sm:$0xff] }
  0x51   : > { %289 = vst [vmem:[#allocation2] sm:$0x3] %v3388_v0 }
  0x52 PF: > { %v324_v1 = vld [vmem:[%s3866_s30 + $0x78] sm:$0xff]  ;;  %v323_v3 = vld [vmem:[%s3866_s30 + $0x70] sm:$0xff]  ;;  %v322_v7 = vld [vmem:[%s3866_s30 + $0x68] sm:$0xff]  ;;  %p3238_p8 = scmp.ne.s32.totalorder %s3617_s21, 3 }
  0x53   : > { %v356_v2 = vld [vmem:[%s3866_s30 + $0x178] sm:$0xff]  ;;  %1642 = vmatpush.msra.mxu0 %v324_v1  ;;  %v355_v5 = vld [vmem:[%s3866_s30 + $0x170] sm:$0xff]  ;;  %v354_v9 = vld [vmem:[%s3866_s30 + $0x168] sm:$0xff] }
  0x54   : > { %1682 = vmatpush.msra.mxu2 %v356_v2  ;;  %v340_v4 = vld [vmem:[%s3866_s30 + $0xf8] sm:$0xff]  ;;  %v339_v8 = vld [vmem:[%s3866_s30 + $0xf0] sm:$0xff]  ;;  %v338_v11 = vld [vmem:[%s3866_s30 + $0xe8] sm:$0xff] }
  0x55   : > { %v372_v6 = vld [vmem:[%s3866_s30 + $0x1f8] sm:$0xff]  ;;  %1662 = vmatpush.msra.mxu1 %v340_v4  ;;  %1643 = vmatpush.msra.mxu0 %v323_v3  ;;  %v371_v10 = vld [vmem:[%s3866_s30 + $0x1f0] sm:$0xff]  ;;  %v321_v12 = vld [vmem:[%s3866_s30 + $0x60] sm:$0xff] }
  0x56   : > { %1702 = vmatpush.msra.mxu3 %v372_v6  ;;  %1683 = vmatpush.msra.mxu2 %v355_v5  ;;  %v353_v13 = vld [vmem:[%s3866_s30 + $0x160] sm:$0xff]  ;;  %v370_v14 = vld [vmem:[%s3866_s30 + $0x1e8] sm:$0xff]  ;;  %v320_v17 = vld [vmem:[%s3866_s30 + $0x58] sm:$0xff] }
  0x57   : > { %1663 = vmatpush.msra.mxu1 %v339_v8  ;;  %1644 = vmatpush.msra.mxu0 %v322_v7  ;;  %v337_v15 = vld [vmem:[%s3866_s30 + $0xe0] sm:$0xff]  ;;  %v352_v18 = vld [vmem:[%s3866_s30 + $0x158] sm:$0xff]  ;;  %v319_v21 = vld [vmem:[%s3866_s30 + $0x50] sm:$0xff] }
  0x58   : > { %1703 = vmatpush.msra.mxu3 %v371_v10  ;;  %1684 = vmatpush.msra.mxu2 %v354_v9  ;;  %v369_v16 = vld [vmem:[%s3866_s30 + $0x1e0] sm:$0xff]  ;;  %v336_v19 = vld [vmem:[%s3866_s30 + $0xd8] sm:$0xff]  ;;  %v351_v22 = vld [vmem:[%s3866_s30 + $0x150] sm:$0xff] }
  0x59   : > { %1664 = vmatpush.msra.mxu1 %v338_v11  ;;  %1645 = vmatpush.msra.mxu0 %v321_v12  ;;  %v368_v20 = vld [vmem:[%s3866_s30 + $0x1d8] sm:$0xff]  ;;  %v335_v23 = vld [vmem:[%s3866_s30 + $0xd0] sm:$0xff]  ;;  %v318_v25 = vld [vmem:[%s3866_s30 + $0x48] sm:$0xff] }
  0x5a   : > { %1704 = vmatpush.msra.mxu3 %v370_v14  ;;  %1685 = vmatpush.msra.mxu2 %v353_v13  ;;  %v367_v24 = vld [vmem:[%s3866_s30 + $0x1d0] sm:$0xff]  ;;  %v350_v26 = vld [vmem:[%s3866_s30 + $0x148] sm:$0xff]  ;;  %v317_v29 = vld [vmem:[%s3866_s30 + $0x40] sm:$0xff] }
  0x5b   : > { %1665 = vmatpush.msra.mxu1 %v337_v15  ;;  %1646 = vmatpush.msra.mxu0 %v320_v17  ;;  %v334_v27 = vld [vmem:[%s3866_s30 + $0xc8] sm:$0xff]  ;;  %v349_v30 = vld [vmem:[%s3866_s30 + $0x140] sm:$0xff]  ;;  %v316_v33 = vld [vmem:[%s3866_s30 + $0x38] sm:$0xff] }
  0x5c   : > { %1705 = vmatpush.msra.mxu3 %v369_v16  ;;  %1686 = vmatpush.msra.mxu2 %v352_v18  ;;  %v366_v28 = vld [vmem:[%s3866_s30 + $0x1c8] sm:$0xff]  ;;  %v333_v31 = vld [vmem:[%s3866_s30 + $0xc0] sm:$0xff]  ;;  %v348_v34 = vld [vmem:[%s3866_s30 + $0x138] sm:$0xff] }
  0x5d   : > { %1666 = vmatpush.msra.mxu1 %v336_v19  ;;  %1647 = vmatpush.msra.mxu0 %v319_v21  ;;  %v365_v32 = vld [vmem:[%s3866_s30 + $0x1c0] sm:$0xff]  ;;  %v332_v35 = vld [vmem:[%s3866_s30 + $0xb8] sm:$0xff]  ;;  %v315_v37 = vld [vmem:[%s3866_s30 + $0x30] sm:$0xff] }
  0x5e   : > { %1706 = vmatpush.msra.mxu3 %v368_v20  ;;  %1687 = vmatpush.msra.mxu2 %v351_v22  ;;  %v364_v36 = vld [vmem:[%s3866_s30 + $0x1b8] sm:$0xff]  ;;  %v347_v38 = vld [vmem:[%s3866_s30 + $0x130] sm:$0xff]  ;;  %v314_v41 = vld [vmem:[%s3866_s30 + $0x28] sm:$0xff] }
  0x5f   : > { %1667 = vmatpush.msra.mxu1 %v335_v23  ;;  %1648 = vmatpush.msra.mxu0 %v318_v25  ;;  %v331_v39 = vld [vmem:[%s3866_s30 + $0xb0] sm:$0xff]  ;;  %v346_v42 = vld [vmem:[%s3866_s30 + $0x128] sm:$0xff]  ;;  %v313_v45 = vld [vmem:[%s3866_s30 + $0x20] sm:$0xff] }
  0x60   : > { %1707 = vmatpush.msra.mxu3 %v367_v24  ;;  %1688 = vmatpush.msra.mxu2 %v350_v26  ;;  %v363_v40 = vld [vmem:[%s3866_s30 + $0x1b0] sm:$0xff]  ;;  %v330_v43 = vld [vmem:[%s3866_s30 + $0xa8] sm:$0xff]  ;;  %v345_v46 = vld [vmem:[%s3866_s30 + $0x120] sm:$0xff] }
  0x61   : > { %1668 = vmatpush.msra.mxu1 %v334_v27  ;;  %1649 = vmatpush.msra.mxu0 %v317_v29  ;;  %v362_v44 = vld [vmem:[%s3866_s30 + $0x1a8] sm:$0xff]  ;;  %v329_v47 = vld [vmem:[%s3866_s30 + $0xa0] sm:$0xff]  ;;  %v312_v49 = vld [vmem:[%s3866_s30 + $0x18] sm:$0xff] }
  0x62   : > { %1708 = vmatpush.msra.mxu3 %v366_v28  ;;  %1689 = vmatpush.msra.mxu2 %v349_v30  ;;  %v361_v48 = vld [vmem:[%s3866_s30 + $0x1a0] sm:$0xff]  ;;  %v344_v50 = vld [vmem:[%s3866_s30 + $0x118] sm:$0xff]  ;;  %v311_v53 = vld [vmem:[%s3866_s30 + $0x10] sm:$0xff] }
  0x63   : > { %1669 = vmatpush.msra.mxu1 %v333_v31  ;;  %1650 = vmatpush.msra.mxu0 %v316_v33  ;;  %v328_v51 = vld [vmem:[%s3866_s30 + $0x98] sm:$0xff]  ;;  %v343_v54 = vld [vmem:[%s3866_s30 + $0x110] sm:$0xff]  ;;  %v310_v57 = vld [vmem:[%s3866_s30 + $0x8] sm:$0xff] }
  0x64   : > { %1709 = vmatpush.msra.mxu3 %v365_v32  ;;  %1690 = vmatpush.msra.mxu2 %v348_v34  ;;  %v360_v52 = vld [vmem:[%s3866_s30 + $0x198] sm:$0xff]  ;;  %v327_v55 = vld [vmem:[%s3866_s30 + $0x90] sm:$0xff]  ;;  %v342_v58 = vld [vmem:[%s3866_s30 + $0x108] sm:$0xff] }
  0x65   : > { %1670 = vmatpush.msra.mxu1 %v332_v35  ;;  %1651 = vmatpush.msra.mxu0 %v315_v37  ;;  %v359_v56 = vld [vmem:[%s3866_s30 + $0x190] sm:$0xff]  ;;  %v326_v59 = vld [vmem:[%s3866_s30 + $0x88] sm:$0xff]  ;;  %v309_v61 = vld [vmem:[%s3866_s30] sm:$0xff] }
  0x66   : > { %1710 = vmatpush.msra.mxu3 %v364_v36  ;;  %1691 = vmatpush.msra.mxu2 %v347_v38  ;;  %v358_v60 = vld [vmem:[%s3866_s30 + $0x188] sm:$0xff]  ;;  %v341_v62 = vld [vmem:[%s3866_s30 + $0x100] sm:$0xff]  ;;  %v388_v63 = vld [vmem:[%s3866_s30 + $0x278] sm:$0xff] }
  0x67   : > { %1671 = vmatpush.msra.mxu1 %v331_v39  ;;  %1652 = vmatpush.msra.mxu0 %v314_v41  ;;  %v420_v0 = vld [vmem:[%s3866_s30 + $0x378] sm:$0xff]  ;;  %v325_v1 = vld [vmem:[%s3866_s30 + $0x80] sm:$0xff]  ;;  %v387_v3 = vld [vmem:[%s3866_s30 + $0x270] sm:$0xff] }
  0x68   : > { %1711 = vmatpush.msra.mxu3 %v363_v40  ;;  %1692 = vmatpush.msra.mxu2 %v346_v42  ;;  %v357_v2 = vld [vmem:[%s3866_s30 + $0x180] sm:$0xff]  ;;  %v404_v4 = vld [vmem:[%s3866_s30 + $0x2f8] sm:$0xff]  ;;  %v419_v5 = vld [vmem:[%s3866_s30 + $0x370] sm:$0xff] }
  0x69   : > { %1672 = vmatpush.msra.mxu1 %v330_v43  ;;  %1653 = vmatpush.msra.mxu0 %v313_v45  ;;  %v436_v6 = vld [vmem:[%s3866_s30 + $0x3f8] sm:$0xff]  ;;  %v386_v7 = vld [vmem:[%s3866_s30 + $0x268] sm:$0xff]  ;;  %v403_v8 = vld [vmem:[%s3866_s30 + $0x2f0] sm:$0xff] }
  0x6a   : > { %1712 = vmatpush.msra.mxu3 %v362_v44  ;;  %1693 = vmatpush.msra.mxu2 %v345_v46  ;;  %v418_v9 = vld [vmem:[%s3866_s30 + $0x368] sm:$0xff]  ;;  %v435_v10 = vld [vmem:[%s3866_s30 + $0x3f0] sm:$0xff]  ;;  %v385_v11 = vld [vmem:[%s3866_s30 + $0x260] sm:$0xff] }
  0x6b   : > { %1673 = vmatpush.msra.mxu1 %v329_v47  ;;  %1654 = vmatpush.msra.mxu0 %v312_v49  ;;  %v402_v12 = vld [vmem:[%s3866_s30 + $0x2e8] sm:$0xff]  ;;  %v417_v13 = vld [vmem:[%s3866_s30 + $0x360] sm:$0xff]  ;;  %v384_v15 = vld [vmem:[%s3866_s30 + $0x258] sm:$0xff] }
  0x6c   : > { %1713 = vmatpush.msra.mxu3 %v361_v48  ;;  %1694 = vmatpush.msra.mxu2 %v344_v50  ;;  %v434_v14 = vld [vmem:[%s3866_s30 + $0x3e8] sm:$0xff]  ;;  %v401_v16 = vld [vmem:[%s3866_s30 + $0x2e0] sm:$0xff]  ;;  %v416_v17 = vld [vmem:[%s3866_s30 + $0x358] sm:$0xff] }
  0x6d   : > { %1674 = vmatpush.msra.mxu1 %v328_v51  ;;  %1655 = vmatpush.msra.mxu0 %v311_v53  ;;  %v433_v18 = vld [vmem:[%s3866_s30 + $0x3e0] sm:$0xff]  ;;  %v383_v19 = vld [vmem:[%s3866_s30 + $0x250] sm:$0xff]  ;;  %v400_v20 = vld [vmem:[%s3866_s30 + $0x2d8] sm:$0xff] }
  0x6e   : > { %1714 = vmatpush.msra.mxu3 %v360_v52  ;;  %1695 = vmatpush.msra.mxu2 %v343_v54  ;;  %v415_v21 = vld [vmem:[%s3866_s30 + $0x350] sm:$0xff]  ;;  %v432_v22 = vld [vmem:[%s3866_s30 + $0x3d8] sm:$0xff]  ;;  %v382_v24 = vld [vmem:[%s3866_s30 + $0x248] sm:$0xff] }
  0x6f   : > { %1675 = vmatpush.msra.mxu1 %v327_v55  ;;  %1656 = vmatpush.msra.mxu0 %v310_v57  ;;  %v291_v23 = vld [vmem:[%s3858_s29] sm:$0xff]  ;;  %v414_v26 = vld [vmem:[%s3866_s30 + $0x348] sm:$0xff]  ;;  %v380_v32 = vld [vmem:[%s3866_s30 + $0x238] sm:$0xff] }
  0x70   : > { %1715 = vmatpush.msra.mxu3 %v359_v56  ;;  %1696 = vmatpush.msra.mxu2 %v342_v58  ;;  %v399_v25 = vld [vmem:[%s3866_s30 + $0x2d0] sm:$0xff]  ;;  %1479 = vst [vmem:[#allocation1] ss:$4 sm:$0xff] %v291_v23  ;;  %v381_v28 = vld [vmem:[%s3866_s30 + $0x240] sm:$0xff]  ;;  %v398_v29 = vld [vmem:[%s3866_s30 + $0x2c8] sm:$0xff] }
  0x71   : > { %1676 = vmatpush.msra.mxu1 %v326_v59  ;;  %1657 = vmatpush.msra.mxu0 %v309_v61  ;;  %v431_v27 = vld [vmem:[%s3866_s30 + $0x3d0] sm:$0xff]  ;;  %v413_v30 = vld [vmem:[%s3866_s30 + $0x340] sm:$0xff]  ;;  %v430_v31 = vld [vmem:[%s3866_s30 + $0x3c8] sm:$0xff] }
  0x72   : > { %1716 = vmatpush.msra.mxu3 %v358_v60  ;;  %1697 = vmatpush.msra.mxu2 %v341_v62  ;;  %v397_v33 = vld [vmem:[%s3866_s30 + $0x2c0] sm:$0xff]  ;;  %v412_v34 = vld [vmem:[%s3866_s30 + $0x338] sm:$0xff]  ;;  %v379_v36 = vld [vmem:[%s3866_s30 + $0x230] sm:$0xff] }
  0x73   : > { %1722 = vmatpush.msrb.mxu0 %v388_v63  ;;  %1677 = vmatpush.msra.mxu1 %v325_v1  ;;  %v429_v35 = vld [vmem:[%s3866_s30 + $0x3c0] sm:$0xff]  ;;  %v396_v37 = vld [vmem:[%s3866_s30 + $0x2b8] sm:$0xff]  ;;  %v411_v38 = vld [vmem:[%s3866_s30 + $0x330] sm:$0xff] }
  0x74   : > { %1762 = vmatpush.msrb.mxu2 %v420_v0  ;;  %1717 = vmatpush.msra.mxu3 %v357_v2  ;;  %v428_v39 = vld [vmem:[%s3866_s30 + $0x3b8] sm:$0xff]  ;;  %v378_v41 = vld [vmem:[%s3866_s30 + $0x228] sm:$0xff]  ;;  %v395_v42 = vld [vmem:[%s3866_s30 + $0x2b0] sm:$0xff] }
  0x75   : > { %1723 = vmatpush.msrb.mxu0 %v387_v3  ;;  %1742 = vmatpush.msrb.mxu1 %v404_v4  ;;  %v292_v40 = vld [vmem:[%s3858_s29 + $0x8] sm:$0xff]  ;;  %v293_v43 = vld [vmem:[%s3858_s29 + $0x10] sm:$0xff]  ;;  %v294_v60 = vld [vmem:[%s3858_s29 + $0x18] sm:$0xff] }
  0x76   : > { %1763 = vmatpush.msrb.mxu2 %v419_v5  ;;  %1782 = vmatpush.msrb.mxu3 %v436_v6  ;;  %1481 = vst [vmem:[#allocation1 + $0x20] ss:$4 sm:$0xff] %v292_v40  ;;  %v410_v44 = vld [vmem:[%s3866_s30 + $0x328] sm:$0xff]  ;;  %v427_v49 = vld [vmem:[%s3866_s30 + $0x3b0] sm:$0xff]  ;;  %v377_v50 = vld [vmem:[%s3866_s30 + $0x220] sm:$0xff] }
  0x77   : > { %1724 = vmatpush.msrb.mxu0 %v386_v7  ;;  %1743 = vmatpush.msrb.mxu1 %v403_v8  ;;  %v1484_v45 = vld.sshfl [vmem:[#allocation1 + $0x10] sm:$0xff pattern:$0x73625140]  ;;  %v3992_v46 = vld.sshfl [vmem:[#allocation1] sm:$0xff pattern:$0x73625140] }
  0x78   : > { %1764 = vmatpush.msrb.mxu2 %v418_v9  ;;  %1783 = vmatpush.msrb.mxu3 %v435_v10  ;;  %v3994_v47 = vld.sshfl [vmem:[#allocation1 + $0x18] sm:$0xff pattern:$0x73625140]  ;;  %v3996_v48 = vld.sshfl [vmem:[#allocation1 + $0x8] sm:$0xff pattern:$0x73625140] }
  0x79   : > { %1725 = vmatpush.msrb.mxu0 %v385_v11  ;;  %1744 = vmatpush.msrb.mxu1 %v402_v12  ;;  %v394_v51 = vld [vmem:[%s3866_s30 + $0x2a8] sm:$0xff]  ;;  %1490 = vst [vmem:[#allocation1] ss:$4 sm:$0xff] %v293_v43  ;;  %v409_v52 = vld [vmem:[%s3866_s30 + $0x320] sm:$0xff]  ;;  %v376_v54 = vld [vmem:[%s3866_s30 + $0x218] sm:$0xff] }
  0x7a   : > { %1765 = vmatpush.msrb.mxu2 %v417_v13  ;;  %1784 = vmatpush.msrb.mxu3 %v434_v14  ;;  %v426_v53 = vld [vmem:[%s3866_s30 + $0x3a8] sm:$0xff]  ;;  %v393_v55 = vld [vmem:[%s3866_s30 + $0x2a0] sm:$0xff]  ;;  %v408_v56 = vld [vmem:[%s3866_s30 + $0x318] sm:$0xff] }
  0x7b   : > { %1726 = vmatpush.msrb.mxu0 %v384_v15  ;;  %1745 = vmatpush.msrb.mxu1 %v401_v16  ;;  %v425_v57 = vld [vmem:[%s3866_s30 + $0x3a0] sm:$0xff]  ;;  %v375_v58 = vld [vmem:[%s3866_s30 + $0x210] sm:$0xff]  ;;  %v392_v59 = vld [vmem:[%s3866_s30 + $0x298] sm:$0xff] }
  0x7c   : > { %1766 = vmatpush.msrb.mxu2 %v416_v17  ;;  %1785 = vmatpush.msrb.mxu3 %v433_v18  ;;  %v407_v1 = vld [vmem:[%s3866_s30 + $0x310] sm:$0xff]  ;;  %v424_v2 = vld [vmem:[%s3866_s30 + $0x398] sm:$0xff]  ;;  %v374_v3 = vld [vmem:[%s3866_s30 + $0x208] sm:$0xff] }
  0x7d   : > { %1727 = vmatpush.msrb.mxu0 %v383_v19  ;;  %1746 = vmatpush.msrb.mxu1 %v400_v20  ;;  %v4010_v61 = vld.sshfl [vmem:[#allocation1 + $0x30] sm:$0xff pattern:$0x73625140]  ;;  %v4012_v62 = vld.sshfl [vmem:[#allocation1 + $0x20] sm:$0xff pattern:$0x73625140] }
  0x7e   : > { %1767 = vmatpush.msrb.mxu2 %v415_v21  ;;  %1786 = vmatpush.msrb.mxu3 %v432_v22  ;;  %v4014_v63 = vld.sshfl [vmem:[#allocation1 + $0x38] sm:$0xff pattern:$0x73625140]  ;;  %v4016_v0 = vld.sshfl [vmem:[#allocation1 + $0x28] sm:$0xff pattern:$0x73625140] }
  0x7f   : > { %1728 = vmatpush.msrb.mxu0 %v382_v24  ;;  %1747 = vmatpush.msrb.mxu1 %v399_v25  ;;  %1491 = vst [vmem:[#allocation1 + $0x20] ss:$4 sm:$0xff] %v294_v60  ;;  %v391_v4 = vld [vmem:[%s3866_s30 + $0x290] sm:$0xff]  ;;  %v406_v5 = vld [vmem:[%s3866_s30 + $0x308] sm:$0xff]  ;;  %v373_v7 = vld [vmem:[%s3866_s30 + $0x200] sm:$0xff] }
  0x80   : > { %1768 = vmatpush.msrb.mxu2 %v414_v26  ;;  %1787 = vmatpush.msrb.mxu3 %v431_v27  ;;  %v423_v6 = vld [vmem:[%s3866_s30 + $0x390] sm:$0xff]  ;;  %v390_v8 = vld [vmem:[%s3866_s30 + $0x288] sm:$0xff]  ;;  %v405_v9 = vld [vmem:[%s3866_s30 + $0x300] sm:$0xff] }
  0x81   : > { %1729 = vmatpush.msrb.mxu0 %v381_v28  ;;  %1748 = vmatpush.msrb.mxu1 %v398_v29  ;;  %v422_v10 = vld [vmem:[%s3866_s30 + $0x388] sm:$0xff]  ;;  %v452_v11 = vld [vmem:[%s3866_s30 + $0x478] sm:$0xff]  ;;  %v389_v13 = vld [vmem:[%s3866_s30 + $0x280] sm:$0xff] }
  0x82   : > { %1769 = vmatpush.msrb.mxu2 %v413_v30  ;;  %1788 = vmatpush.msrb.mxu3 %v430_v31  ;;  %v484_v12 = vld [vmem:[%s3866_s30 + $0x578] sm:$0xff]  ;;  %v421_v14 = vld [vmem:[%s3866_s30 + $0x380] sm:$0xff]  ;;  %v451_v15 = vld [vmem:[%s3866_s30 + $0x470] sm:$0xff] }
  0x83   : > { %1730 = vmatpush.msrb.mxu0 %v380_v32  ;;  %1749 = vmatpush.msrb.mxu1 %v397_v33  ;;  %v468_v16 = vld [vmem:[%s3866_s30 + $0x4f8] sm:$0xff]  ;;  %v483_v17 = vld [vmem:[%s3866_s30 + $0x570] sm:$0xff]  ;;  %v450_v19 = vld [vmem:[%s3866_s30 + $0x468] sm:$0xff] }
  0x84   : > { %1770 = vmatpush.msrb.mxu2 %v412_v34  ;;  %1789 = vmatpush.msrb.mxu3 %v429_v35  ;;  %v500_v18 = vld [vmem:[%s3866_s30 + $0x5f8] sm:$0xff]  ;;  %v467_v20 = vld [vmem:[%s3866_s30 + $0x4f0] sm:$0xff]  ;;  %v482_v21 = vld [vmem:[%s3866_s30 + $0x568] sm:$0xff] }
  0x85   : > { %1731 = vmatpush.msrb.mxu0 %v379_v36  ;;  %1750 = vmatpush.msrb.mxu1 %v396_v37  ;;  %v499_v22 = vld [vmem:[%s3866_s30 + $0x5f0] sm:$0xff]  ;;  %v449_v23 = vld [vmem:[%s3866_s30 + $0x460] sm:$0xff]  ;;  %v466_v24 = vld [vmem:[%s3866_s30 + $0x4e8] sm:$0xff] }
  0x86   : > { %1771 = vmatpush.msrb.mxu2 %v411_v38  ;;  %1790 = vmatpush.msrb.mxu3 %v428_v39  ;;  %v481_v25 = vld [vmem:[%s3866_s30 + $0x560] sm:$0xff]  ;;  %v4046_v26 = vld.sshfl [vmem:[#allocation1] sm:$0xff pattern:$0x73625140]  ;;  %v498_v29 = vld [vmem:[%s3866_s30 + $0x5e8] sm:$0xff] }
  0x87   : > { %1732 = vmatpush.msrb.mxu0 %v378_v41  ;;  %1751 = vmatpush.msrb.mxu1 %v395_v42  ;;  %v4048_v27 = vld.sshfl [vmem:[#allocation1 + $0x10] sm:$0xff pattern:$0x73625140]  ;;  %v4050_v28 = vld.sshfl [vmem:[#allocation1 + $0x8] sm:$0xff pattern:$0x73625140] }
  0x88   : > { %1772 = vmatpush.msrb.mxu2 %v410_v44  ;;  %1791 = vmatpush.msrb.mxu3 %v427_v49  ;;  %v295_v30 = vld [vmem:[%s3858_s29 + $0x20] sm:$0xff]  ;;  %v448_v32 = vld [vmem:[%s3866_s30 + $0x458] sm:$0xff]  ;;  %v446_v40 = vld [vmem:[%s3866_s30 + $0x448] sm:$0xff] }
  0x89   : > { %1733 = vmatpush.msrb.mxu0 %v377_v50  ;;  %1752 = vmatpush.msrb.mxu1 %v394_v51  ;;  %v4054_v31 = vld.sshfl [vmem:[#allocation1 + $0x18] sm:$0xff pattern:$0x73625140]  ;;  %v465_v33 = vld [vmem:[%s3866_s30 + $0x4e0] sm:$0xff]  ;;  %v480_v34 = vld [vmem:[%s3866_s30 + $0x558] sm:$0xff] }
  0x8a   : > { %1773 = vmatpush.msrb.mxu2 %v409_v52  ;;  %1792 = vmatpush.msrb.mxu3 %v426_v53  ;;  %1500 = vst [vmem:[#allocation1] ss:$4 sm:$0xff] %v295_v30  ;;  %v497_v35 = vld [vmem:[%s3866_s30 + $0x5e0] sm:$0xff]  ;;  %v447_v36 = vld [vmem:[%s3866_s30 + $0x450] sm:$0xff]  ;;  %v464_v37 = vld [vmem:[%s3866_s30 + $0x4d8] sm:$0xff] }
  0x8b   : > { %1734 = vmatpush.msrb.mxu0 %v376_v54  ;;  %1753 = vmatpush.msrb.mxu1 %v393_v55  ;;  %v479_v38 = vld [vmem:[%s3866_s30 + $0x550] sm:$0xff]  ;;  %v496_v39 = vld [vmem:[%s3866_s30 + $0x5d8] sm:$0xff]  ;;  %v478_v42 = vld [vmem:[%s3866_s30 + $0x548] sm:$0xff] }
  0x8c   : > { %1774 = vmatpush.msrb.mxu2 %v408_v56  ;;  %1793 = vmatpush.msrb.mxu3 %v425_v57  ;;  %v463_v41 = vld [vmem:[%s3866_s30 + $0x4d0] sm:$0xff]  ;;  %v445_v44 = vld [vmem:[%s3866_s30 + $0x440] sm:$0xff]  ;;  %v476_v50 = vld [vmem:[%s3866_s30 + $0x538] sm:$0xff] }
  0x8d   : > { %1735 = vmatpush.msrb.mxu0 %v375_v58  ;;  %1754 = vmatpush.msrb.mxu1 %v392_v59  ;;  %v495_v43 = vld [vmem:[%s3866_s30 + $0x5d0] sm:$0xff]  ;;  %v461_v49 = vld [vmem:[%s3866_s30 + $0x4c0] sm:$0xff]  ;;  %v460_v53 = vld [vmem:[%s3866_s30 + $0x4b8] sm:$0xff] }
  0x8e   : > { %1775 = vmatpush.msrb.mxu2 %v407_v1  ;;  %1794 = vmatpush.msrb.mxu3 %v424_v2  ;;  %v493_v51 = vld [vmem:[%s3866_s30 + $0x5c0] sm:$0xff]  ;;  %v443_v52 = vld [vmem:[%s3866_s30 + $0x430] sm:$0xff]  ;;  %v492_v55 = vld [vmem:[%s3866_s30 + $0x5b8] sm:$0xff] }
  0x8f   : > { %1736 = vmatpush.msrb.mxu0 %v374_v3  ;;  %1755 = vmatpush.msrb.mxu1 %v391_v4  ;;  %v475_v54 = vld [vmem:[%s3866_s30 + $0x530] sm:$0xff]  ;;  %v442_v56 = vld [vmem:[%s3866_s30 + $0x428] sm:$0xff]  ;;  %v441_v60 = vld [vmem:[%s3866_s30 + $0x420] sm:$0xff] }
  0x90   : > { %1776 = vmatpush.msrb.mxu2 %v406_v5  ;;  %1795 = vmatpush.msrb.mxu3 %v423_v6  ;;  %v459_v57 = vld [vmem:[%s3866_s30 + $0x4b0] sm:$0xff]  ;;  %v474_v58 = vld [vmem:[%s3866_s30 + $0x528] sm:$0xff]  ;;  %v457_v1 = vld [vmem:[%s3866_s30 + $0x4a0] sm:$0xff] }
  0x91   : > { %1698 = vmatmul.f32.vlgmr.msra.gmra.mxu2 %v1484_v45  ;;  %1737 = vmatpush.msrb.mxu0 %v373_v7  ;;  %v462_v45 = vld [vmem:[%s3866_s30 + $0x4c8] sm:$0xff]  ;;  %v491_v59 = vld [vmem:[%s3866_s30 + $0x5b0] sm:$0xff]  ;;  %v472_v2 = vld [vmem:[%s3866_s30 + $0x518] sm:$0xff] }
  0x92   : > { %1756 = vmatpush.msrb.mxu1 %v390_v8  ;;  %1777 = vmatpush.msrb.mxu2 %v405_v9  ;;  %v489_v3 = vld [vmem:[%s3866_s30 + $0x5a0] sm:$0xff]  ;;  %v439_v4 = vld [vmem:[%s3866_s30 + $0x410] sm:$0xff]  ;;  %v456_v5 = vld [vmem:[%s3866_s30 + $0x498] sm:$0xff] }
  0x93   : > { %1796 = vmatpush.msrb.mxu3 %v422_v10  ;;  %1658 = vmatmul.f32.vlgmr.msra.gmra.mxu0 %v3992_v46  ;;  %v477_v46 = vld [vmem:[%s3866_s30 + $0x540] sm:$0xff]  ;;  %v471_v6 = vld [vmem:[%s3866_s30 + $0x510] sm:$0xff]  ;;  %v488_v7 = vld [vmem:[%s3866_s30 + $0x598] sm:$0xff] }
  0x94   : > { %1718 = vmatmul.f32.vlgmr.msra.gmra.mxu3 %v3994_v47  ;;  %1802 = vmatpush.msra.mxu0 %v452_v11  ;;  %v494_v47 = vld [vmem:[%s3866_s30 + $0x5c8] sm:$0xff]  ;;  %v455_v9 = vld [vmem:[%s3866_s30 + $0x490] sm:$0xff] }
  0x95   : > { %1842 = vmatpush.msra.mxu2 %v484_v12  ;;  %1757 = vmatpush.msrb.mxu1 %v389_v13  ;;  %v438_v8 = vld [vmem:[%s3866_s30 + $0x408] sm:$0xff]  ;;  %v487_v11 = vld [vmem:[%s3866_s30 + $0x590] sm:$0xff]  ;;  %v437_v12 = vld [vmem:[%s3866_s30 + $0x400] sm:$0xff] }
  0x96   : > { %1797 = vmatpush.msrb.mxu3 %v421_v14  ;;  %1678 = vmatmul.f32.vlgmr.msra.gmra.mxu1 %v3996_v48  ;;  %v444_v48 = vld [vmem:[%s3866_s30 + $0x438] sm:$0xff]  ;;  %v470_v10 = vld [vmem:[%s3866_s30 + $0x508] sm:$0xff]  ;;  %v469_v14 = vld [vmem:[%s3866_s30 + $0x500] sm:$0xff] }
  0x97   : > { %1803 = vmatpush.msra.mxu0 %v451_v15  ;;  %1822 = vmatpush.msra.mxu1 %v468_v16  ;;  %v454_v13 = vld [vmem:[%s3866_s30 + $0x488] sm:$0xff]  ;;  %v516_v16 = vld [vmem:[%s3866_s30 + $0x678] sm:$0xff] }
  0x98   : > { %1843 = vmatpush.msra.mxu2 %v483_v17  ;;  %1862 = vmatpush.msra.mxu3 %v500_v18  ;;  %v486_v15 = vld [vmem:[%s3866_s30 + $0x588] sm:$0xff]  ;;  %v548_v17 = vld [vmem:[%s3866_s30 + $0x778] sm:$0xff]  ;;  %v453_v18 = vld [vmem:[%s3866_s30 + $0x480] sm:$0xff] }
  0x99   : > { %1804 = vmatpush.msra.mxu0 %v450_v19  ;;  %1823 = vmatpush.msra.mxu1 %v467_v20  ;;  %v485_v19 = vld [vmem:[%s3866_s30 + $0x580] sm:$0xff]  ;;  %v515_v20 = vld [vmem:[%s3866_s30 + $0x670] sm:$0xff] }
  0x9a   : > { %1844 = vmatpush.msra.mxu2 %v482_v21  ;;  %1863 = vmatpush.msra.mxu3 %v499_v22  ;;  %v532_v21 = vld [vmem:[%s3866_s30 + $0x6f8] sm:$0xff]  ;;  %v547_v22 = vld [vmem:[%s3866_s30 + $0x770] sm:$0xff] }
  0x9b   : > { %1778 = vmatmul.f32.vlgmr.msrb.gmra.mxu2 %v4010_v61  ;;  %1805 = vmatpush.msra.mxu0 %v449_v23  ;;  %v458_v61 = vld [vmem:[%s3866_s30 + $0x4a8] sm:$0xff]  ;;  %v564_v23 = vld [vmem:[%s3866_s30 + $0x7f8] sm:$0xff] }
  0x9c   : > { %1824 = vmatpush.msra.mxu1 %v466_v24  ;;  %1845 = vmatpush.msra.mxu2 %v481_v25  ;;  %v514_v24 = vld [vmem:[%s3866_s30 + $0x668] sm:$0xff]  ;;  %v531_v25 = vld [vmem:[%s3866_s30 + $0x6f0] sm:$0xff] }
  0x9d   : > { %1864 = vmatpush.msra.mxu3 %v498_v29  ;;  %1738 = vmatmul.f32.vlgmr.msrb.gmra.mxu0 %v4012_v62  ;;  %v473_v62 = vld [vmem:[%s3866_s30 + $0x520] sm:$0xff]  ;;  %v546_v29 = vld [vmem:[%s3866_s30 + $0x768] sm:$0xff]  ;;  %v4125_v30 = vld.sshfl [vmem:[#allocation1 + $0x20] sm:$0xff pattern:$0x73625140] }
  0x9e   : > { %1798 = vmatmul.f32.vlgmr.msrb.gmra.mxu3 %v4014_v63  ;;  %1806 = vmatpush.msra.mxu0 %v448_v32  ;;  %v490_v63 = vld [vmem:[%s3866_s30 + $0x5a8] sm:$0xff] }
  0x9f   : > { %1825 = vmatpush.msra.mxu1 %v465_v33  ;;  %1846 = vmatpush.msra.mxu2 %v480_v34  ;;  %v4127_v32 = vld.sshfl [vmem:[#allocation1 + $0x30] sm:$0xff pattern:$0x73625140]  ;;  %v4129_v33 = vld.sshfl [vmem:[#allocation1 + $0x28] sm:$0xff pattern:$0x73625140] }
  0xa0   : > { %1865 = vmatpush.msra.mxu3 %v497_v35  ;;  %1758 = vmatmul.f32.vlgmr.msrb.gmra.mxu1 %v4016_v0  ;;  %v440_v0 = vld [vmem:[%s3866_s30 + $0x418] sm:$0xff]  ;;  %v545_v35 = vld [vmem:[%s3866_s30 + $0x760] sm:$0xff] }
  0xa1   : > { %1807 = vmatpush.msra.mxu0 %v447_v36  ;;  %1826 = vmatpush.msra.mxu1 %v464_v37  ;;  %v296_v34 = vld [vmem:[%s3858_s29 + $0x28] sm:$0xff] }
  0xa2   : > { %1847 = vmatpush.msra.mxu2 %v479_v38  ;;  %1866 = vmatpush.msra.mxu3 %v496_v39  ;;  %v562_v36 = vld [vmem:[%s3866_s30 + $0x7e8] sm:$0xff]  ;;  %v512_v37 = vld [vmem:[%s3866_s30 + $0x658] sm:$0xff]  ;;  %v529_v38 = vld [vmem:[%s3866_s30 + $0x6e0] sm:$0xff] }
  0xa3   : > { %1808 = vmatpush.msra.mxu0 %v446_v40  ;;  %1827 = vmatpush.msra.mxu1 %v463_v41  ;;  %v544_v39 = vld [vmem:[%s3866_s30 + $0x758] sm:$0xff]  ;;  %v561_v40 = vld [vmem:[%s3866_s30 + $0x7e0] sm:$0xff]  ;;  %v511_v41 = vld [vmem:[%s3866_s30 + $0x650] sm:$0xff] }
  0xa4   : > { %1848 = vmatpush.msra.mxu2 %v478_v42  ;;  %1867 = vmatpush.msra.mxu3 %v495_v43  ;;  %v528_v42 = vld [vmem:[%s3866_s30 + $0x6d8] sm:$0xff]  ;;  %v543_v43 = vld [vmem:[%s3866_s30 + $0x750] sm:$0xff] }
  0xa5   : > { %1809 = vmatpush.msra.mxu0 %v445_v44  ;;  %1828 = vmatpush.msra.mxu1 %v462_v45  ;;  %v560_v44 = vld [vmem:[%s3866_s30 + $0x7d8] sm:$0xff]  ;;  %v510_v45 = vld [vmem:[%s3866_s30 + $0x648] sm:$0xff] }
  0xa6   : > { %1849 = vmatpush.msra.mxu2 %v477_v46  ;;  %1868 = vmatpush.msra.mxu3 %v494_v47  ;;  %v527_v46 = vld [vmem:[%s3866_s30 + $0x6d0] sm:$0xff]  ;;  %v542_v47 = vld [vmem:[%s3866_s30 + $0x748] sm:$0xff] }
  0xa7   : > { %1810 = vmatpush.msra.mxu0 %v444_v48  ;;  %1829 = vmatpush.msra.mxu1 %v461_v49  ;;  %v559_v48 = vld [vmem:[%s3866_s30 + $0x7d0] sm:$0xff]  ;;  %v509_v49 = vld [vmem:[%s3866_s30 + $0x640] sm:$0xff] }
  0xa8   : > { %1850 = vmatpush.msra.mxu2 %v476_v50  ;;  %1869 = vmatpush.msra.mxu3 %v493_v51  ;;  %v526_v50 = vld [vmem:[%s3866_s30 + $0x6c8] sm:$0xff]  ;;  %v541_v51 = vld [vmem:[%s3866_s30 + $0x740] sm:$0xff] }
  0xa9   : > { %1811 = vmatpush.msra.mxu0 %v443_v52  ;;  %1830 = vmatpush.msra.mxu1 %v460_v53  ;;  %v558_v52 = vld [vmem:[%s3866_s30 + $0x7c8] sm:$0xff]  ;;  %v508_v53 = vld [vmem:[%s3866_s30 + $0x638] sm:$0xff] }
  0xaa   : > { %1851 = vmatpush.msra.mxu2 %v475_v54  ;;  %1870 = vmatpush.msra.mxu3 %v492_v55  ;;  %v525_v54 = vld [vmem:[%s3866_s30 + $0x6c0] sm:$0xff]  ;;  %v540_v55 = vld [vmem:[%s3866_s30 + $0x738] sm:$0xff] }
  0xab   : > { %1812 = vmatpush.msra.mxu0 %v442_v56  ;;  %1831 = vmatpush.msra.mxu1 %v459_v57  ;;  %v557_v56 = vld [vmem:[%s3866_s30 + $0x7c0] sm:$0xff]  ;;  %v507_v57 = vld [vmem:[%s3866_s30 + $0x630] sm:$0xff] }
  0xac   : > { %1852 = vmatpush.msra.mxu2 %v474_v58  ;;  %1871 = vmatpush.msra.mxu3 %v491_v59  ;;  %v524_v58 = vld [vmem:[%s3866_s30 + $0x6b8] sm:$0xff]  ;;  %v539_v59 = vld [vmem:[%s3866_s30 + $0x730] sm:$0xff] }
  0xad   : > { %1813 = vmatpush.msra.mxu0 %v441_v60  ;;  %1832 = vmatpush.msra.mxu1 %v458_v61  ;;  %v556_v60 = vld [vmem:[%s3866_s30 + $0x7b8] sm:$0xff]  ;;  %v506_v61 = vld [vmem:[%s3866_s30 + $0x628] sm:$0xff] }
  0xae   : > { %1853 = vmatpush.msra.mxu2 %v473_v62  ;;  %1872 = vmatpush.msra.mxu3 %v490_v63  ;;  %v523_v62 = vld [vmem:[%s3866_s30 + $0x6b0] sm:$0xff]  ;;  %v538_v63 = vld [vmem:[%s3866_s30 + $0x728] sm:$0xff] }
  0xaf   : > { %1814 = vmatpush.msra.mxu0 %v440_v0  ;;  %1833 = vmatpush.msra.mxu1 %v457_v1  ;;  %v555_v0 = vld [vmem:[%s3866_s30 + $0x7b0] sm:$0xff]  ;;  %v505_v1 = vld [vmem:[%s3866_s30 + $0x620] sm:$0xff] }
  0xb0   : > { %1854 = vmatpush.msra.mxu2 %v472_v2  ;;  %1873 = vmatpush.msra.mxu3 %v489_v3  ;;  %v522_v2 = vld [vmem:[%s3866_s30 + $0x6a8] sm:$0xff]  ;;  %v537_v3 = vld [vmem:[%s3866_s30 + $0x720] sm:$0xff] }
  0xb1   : > { %1815 = vmatpush.msra.mxu0 %v439_v4  ;;  %1834 = vmatpush.msra.mxu1 %v456_v5  ;;  %v554_v4 = vld [vmem:[%s3866_s30 + $0x7a8] sm:$0xff]  ;;  %v504_v5 = vld [vmem:[%s3866_s30 + $0x618] sm:$0xff] }
  0xb2   : > { %1855 = vmatpush.msra.mxu2 %v471_v6  ;;  %1874 = vmatpush.msra.mxu3 %v488_v7  ;;  %v521_v6 = vld [vmem:[%s3866_s30 + $0x6a0] sm:$0xff]  ;;  %v536_v7 = vld [vmem:[%s3866_s30 + $0x718] sm:$0xff] }
  0xb3   : > { %1816 = vmatpush.msra.mxu0 %v438_v8  ;;  %1835 = vmatpush.msra.mxu1 %v455_v9  ;;  %v553_v8 = vld [vmem:[%s3866_s30 + $0x7a0] sm:$0xff]  ;;  %v503_v9 = vld [vmem:[%s3866_s30 + $0x610] sm:$0xff] }
  0xb4   : > { %1856 = vmatpush.msra.mxu2 %v470_v10  ;;  %1875 = vmatpush.msra.mxu3 %v487_v11  ;;  %v520_v10 = vld [vmem:[%s3866_s30 + $0x698] sm:$0xff]  ;;  %v535_v11 = vld [vmem:[%s3866_s30 + $0x710] sm:$0xff] }
  0xb5   : > { %1817 = vmatpush.msra.mxu0 %v437_v12  ;;  %1836 = vmatpush.msra.mxu1 %v454_v13  ;;  %v552_v12 = vld [vmem:[%s3866_s30 + $0x798] sm:$0xff]  ;;  %v502_v13 = vld [vmem:[%s3866_s30 + $0x608] sm:$0xff] }
  0xb6   : > { %1857 = vmatpush.msra.mxu2 %v469_v14  ;;  %1876 = vmatpush.msra.mxu3 %v486_v15  ;;  %v519_v14 = vld [vmem:[%s3866_s30 + $0x690] sm:$0xff]  ;;  %v534_v15 = vld [vmem:[%s3866_s30 + $0x708] sm:$0xff] }
  0xb7   : > { %1818 = vmatmul.f32.vlgmr.msra.gmra.mxu0 %v4046_v26  ;;  %1858 = vmatmul.f32.vlgmr.msra.gmra.mxu2 %v4048_v27  ;;  %v563_v26 = vld [vmem:[%s3866_s30 + $0x7f0] sm:$0xff]  ;;  %v513_v27 = vld [vmem:[%s3866_s30 + $0x660] sm:$0xff] }
  0xb8   : > { %1882 = vmatpush.msrb.mxu0 %v516_v16  ;;  %1922 = vmatpush.msrb.mxu2 %v548_v17  ;;  %v551_v16 = vld [vmem:[%s3866_s30 + $0x790] sm:$0xff]  ;;  %v501_v17 = vld [vmem:[%s3866_s30 + $0x600] sm:$0xff] }
  0xb9   : > { %1837 = vmatpush.msra.mxu1 %v453_v18  ;;  %1877 = vmatpush.msra.mxu3 %v485_v19  ;;  %v518_v18 = vld [vmem:[%s3866_s30 + $0x688] sm:$0xff]  ;;  %v533_v19 = vld [vmem:[%s3866_s30 + $0x700] sm:$0xff] }
  0xba   : > { %1838 = vmatmul.f32.vlgmr.msra.gmra.mxu1 %v4050_v28  ;;  %1878 = vmatmul.f32.vlgmr.msra.gmra.mxu3 %v4054_v31  ;;  %v530_v28 = vld [vmem:[%s3866_s30 + $0x6e8] sm:$0xff] }
  0xbb   : > { %1883 = vmatpush.msrb.mxu0 %v515_v20  ;;  %1902 = vmatpush.msrb.mxu1 %v532_v21  ;;  %v4133_v31 = vld.sshfl [vmem:[#allocation1 + $0x38] sm:$0xff pattern:$0x73625140]  ;;  %v580_v21 = vld [vmem:[%s3866_s30 + $0x878] sm:$0xff] }
  0xbc   : > { %1923 = vmatpush.msrb.mxu2 %v547_v22  ;;  %1942 = vmatpush.msrb.mxu3 %v564_v23  ;;  %1501 = vst [vmem:[#allocation1 + $0x20] ss:$4 sm:$0xff] %v296_v34  ;;  %v550_v20 = vld [vmem:[%s3866_s30 + $0x788] sm:$0xff]  ;;  %v612_v22 = vld [vmem:[%s3866_s30 + $0x978] sm:$0xff]  ;;  %v517_v23 = vld [vmem:[%s3866_s30 + $0x680] sm:$0xff] }
  0xbd   : > { %1884 = vmatpush.msrb.mxu0 %v514_v24  ;;  %1903 = vmatpush.msrb.mxu1 %v531_v25  ;;  %v549_v24 = vld [vmem:[%s3866_s30 + $0x780] sm:$0xff]  ;;  %v579_v25 = vld [vmem:[%s3866_s30 + $0x870] sm:$0xff] }
  0xbe   : > { %1924 = vmatpush.msrb.mxu2 %v546_v29  ;;  %1943 = vmatpush.msrb.mxu3 %v563_v26  ;;  %v596_v29 = vld [vmem:[%s3866_s30 + $0x8f8] sm:$0xff]  ;;  %v611_v26 = vld [vmem:[%s3866_s30 + $0x970] sm:$0xff] }
  0xbf   : > { %1885 = vmatpush.msrb.mxu0 %v513_v27  ;;  %1904 = vmatpush.msrb.mxu1 %v530_v28  ;;  %v628_v27 = vld [vmem:[%s3866_s30 + $0x9f8] sm:$0xff]  ;;  %v610_v28 = vld [vmem:[%s3866_s30 + $0x968] sm:$0xff]  ;;  %v627_v34 = vld [vmem:[%s3866_s30 + $0x9f0] sm:$0xff] }
  0xc0   : > { %1925 = vmatpush.msrb.mxu2 %v545_v35  ;;  %1944 = vmatpush.msrb.mxu3 %v562_v36  ;;  %v577_v35 = vld [vmem:[%s3866_s30 + $0x860] sm:$0xff]  ;;  %v594_v36 = vld [vmem:[%s3866_s30 + $0x8e8] sm:$0xff] }
  0xc1   : > { %1886 = vmatpush.msrb.mxu0 %v512_v37  ;;  %1905 = vmatpush.msrb.mxu1 %v529_v38  ;;  %v576_v37 = vld [vmem:[%s3866_s30 + $0x858] sm:$0xff]  ;;  %v593_v38 = vld [vmem:[%s3866_s30 + $0x8e0] sm:$0xff] }
  0xc2   : > { %1926 = vmatpush.msrb.mxu2 %v544_v39  ;;  %1945 = vmatpush.msrb.mxu3 %v561_v40  ;;  %v608_v39 = vld [vmem:[%s3866_s30 + $0x958] sm:$0xff]  ;;  %v625_v40 = vld [vmem:[%s3866_s30 + $0x9e0] sm:$0xff] }
  0xc3   : > { %1887 = vmatpush.msrb.mxu0 %v511_v41  ;;  %1906 = vmatpush.msrb.mxu1 %v528_v42  ;;  %v575_v41 = vld [vmem:[%s3866_s30 + $0x850] sm:$0xff]  ;;  %v592_v42 = vld [vmem:[%s3866_s30 + $0x8d8] sm:$0xff] }
  0xc4   : > { %1927 = vmatpush.msrb.mxu2 %v543_v43  ;;  %1946 = vmatpush.msrb.mxu3 %v560_v44  ;;  %v607_v43 = vld [vmem:[%s3866_s30 + $0x950] sm:$0xff]  ;;  %v624_v44 = vld [vmem:[%s3866_s30 + $0x9d8] sm:$0xff] }
  0xc5   : > { %1888 = vmatpush.msrb.mxu0 %v510_v45  ;;  %1907 = vmatpush.msrb.mxu1 %v527_v46  ;;  %v574_v45 = vld [vmem:[%s3866_s30 + $0x848] sm:$0xff]  ;;  %v591_v46 = vld [vmem:[%s3866_s30 + $0x8d0] sm:$0xff] }
  0xc6   : > { %1928 = vmatpush.msrb.mxu2 %v542_v47  ;;  %1947 = vmatpush.msrb.mxu3 %v559_v48  ;;  %v606_v47 = vld [vmem:[%s3866_s30 + $0x948] sm:$0xff]  ;;  %v623_v48 = vld [vmem:[%s3866_s30 + $0x9d0] sm:$0xff] }
  0xc7   : > { %1889 = vmatpush.msrb.mxu0 %v509_v49  ;;  %1908 = vmatpush.msrb.mxu1 %v526_v50  ;;  %v573_v49 = vld [vmem:[%s3866_s30 + $0x840] sm:$0xff]  ;;  %v590_v50 = vld [vmem:[%s3866_s30 + $0x8c8] sm:$0xff] }
  0xc8   : > { %1929 = vmatpush.msrb.mxu2 %v541_v51  ;;  %1948 = vmatpush.msrb.mxu3 %v558_v52  ;;  %v605_v51 = vld [vmem:[%s3866_s30 + $0x940] sm:$0xff]  ;;  %v622_v52 = vld [vmem:[%s3866_s30 + $0x9c8] sm:$0xff] }
  0xc9   : > { %1890 = vmatpush.msrb.mxu0 %v508_v53  ;;  %1909 = vmatpush.msrb.mxu1 %v525_v54  ;;  %v572_v53 = vld [vmem:[%s3866_s30 + $0x838] sm:$0xff]  ;;  %v589_v54 = vld [vmem:[%s3866_s30 + $0x8c0] sm:$0xff] }
  0xca   : > { %1930 = vmatpush.msrb.mxu2 %v540_v55  ;;  %1949 = vmatpush.msrb.mxu3 %v557_v56  ;;  %v604_v55 = vld [vmem:[%s3866_s30 + $0x938] sm:$0xff]  ;;  %v621_v56 = vld [vmem:[%s3866_s30 + $0x9c0] sm:$0xff] }
  0xcb   : > { %1891 = vmatpush.msrb.mxu0 %v507_v57  ;;  %1910 = vmatpush.msrb.mxu1 %v524_v58  ;;  %v571_v57 = vld [vmem:[%s3866_s30 + $0x830] sm:$0xff]  ;;  %v588_v58 = vld [vmem:[%s3866_s30 + $0x8b8] sm:$0xff] }
  0xcc   : > { %1931 = vmatpush.msrb.mxu2 %v539_v59  ;;  %1950 = vmatpush.msrb.mxu3 %v556_v60  ;;  %v603_v59 = vld [vmem:[%s3866_s30 + $0x930] sm:$0xff]  ;;  %v620_v60 = vld [vmem:[%s3866_s30 + $0x9b8] sm:$0xff] }
  0xcd   : > { %1892 = vmatpush.msrb.mxu0 %v506_v61  ;;  %1911 = vmatpush.msrb.mxu1 %v523_v62  ;;  %v570_v61 = vld [vmem:[%s3866_s30 + $0x828] sm:$0xff]  ;;  %v587_v62 = vld [vmem:[%s3866_s30 + $0x8b0] sm:$0xff] }
  0xce   : > { %1932 = vmatpush.msrb.mxu2 %v538_v63  ;;  %1951 = vmatpush.msrb.mxu3 %v555_v0  ;;  %v602_v63 = vld [vmem:[%s3866_s30 + $0x928] sm:$0xff]  ;;  %v619_v0 = vld [vmem:[%s3866_s30 + $0x9b0] sm:$0xff] }
  0xcf   : > { %1893 = vmatpush.msrb.mxu0 %v505_v1  ;;  %1912 = vmatpush.msrb.mxu1 %v522_v2  ;;  %v569_v1 = vld [vmem:[%s3866_s30 + $0x820] sm:$0xff]  ;;  %v586_v2 = vld [vmem:[%s3866_s30 + $0x8a8] sm:$0xff] }
  0xd0   : > { %1933 = vmatpush.msrb.mxu2 %v537_v3  ;;  %1952 = vmatpush.msrb.mxu3 %v554_v4  ;;  %v601_v3 = vld [vmem:[%s3866_s30 + $0x920] sm:$0xff]  ;;  %v618_v4 = vld [vmem:[%s3866_s30 + $0x9a8] sm:$0xff] }
  0xd1   : > { %1894 = vmatpush.msrb.mxu0 %v504_v5  ;;  %1913 = vmatpush.msrb.mxu1 %v521_v6  ;;  %v568_v5 = vld [vmem:[%s3866_s30 + $0x818] sm:$0xff]  ;;  %v585_v6 = vld [vmem:[%s3866_s30 + $0x8a0] sm:$0xff] }
  0xd2   : > { %1934 = vmatpush.msrb.mxu2 %v536_v7  ;;  %1953 = vmatpush.msrb.mxu3 %v553_v8  ;;  %v600_v7 = vld [vmem:[%s3866_s30 + $0x918] sm:$0xff]  ;;  %v617_v8 = vld [vmem:[%s3866_s30 + $0x9a0] sm:$0xff] }
  0xd3   : > { %1895 = vmatpush.msrb.mxu0 %v503_v9  ;;  %1914 = vmatpush.msrb.mxu1 %v520_v10  ;;  %v567_v9 = vld [vmem:[%s3866_s30 + $0x810] sm:$0xff]  ;;  %v584_v10 = vld [vmem:[%s3866_s30 + $0x898] sm:$0xff] }
  0xd4   : > { %1935 = vmatpush.msrb.mxu2 %v535_v11  ;;  %1954 = vmatpush.msrb.mxu3 %v552_v12  ;;  %v599_v11 = vld [vmem:[%s3866_s30 + $0x910] sm:$0xff]  ;;  %v616_v12 = vld [vmem:[%s3866_s30 + $0x998] sm:$0xff] }
  0xd5   : > { %1896 = vmatpush.msrb.mxu0 %v502_v13  ;;  %1915 = vmatpush.msrb.mxu1 %v519_v14  ;;  %v566_v13 = vld [vmem:[%s3866_s30 + $0x808] sm:$0xff]  ;;  %v583_v14 = vld [vmem:[%s3866_s30 + $0x890] sm:$0xff] }
  0xd6   : > { %1936 = vmatpush.msrb.mxu2 %v534_v15  ;;  %1955 = vmatpush.msrb.mxu3 %v551_v16  ;;  %v598_v15 = vld [vmem:[%s3866_s30 + $0x908] sm:$0xff]  ;;  %v615_v16 = vld [vmem:[%s3866_s30 + $0x990] sm:$0xff] }
  0xd7   : > { %1897 = vmatpush.msrb.mxu0 %v501_v17  ;;  %1916 = vmatpush.msrb.mxu1 %v518_v18  ;;  %v565_v17 = vld [vmem:[%s3866_s30 + $0x800] sm:$0xff]  ;;  %v582_v18 = vld [vmem:[%s3866_s30 + $0x888] sm:$0xff] }
  0xd8   : > { %1937 = vmatpush.msrb.mxu2 %v533_v19  ;;  %1956 = vmatpush.msrb.mxu3 %v550_v20  ;;  %v597_v19 = vld [vmem:[%s3866_s30 + $0x900] sm:$0xff]  ;;  %v614_v20 = vld [vmem:[%s3866_s30 + $0x988] sm:$0xff] }
  0xd9   : > { %1898 = vmatmul.f32.vlgmr.msrb.gmra.mxu0 %v4125_v30  ;;  %1938 = vmatmul.f32.vlgmr.msrb.gmra.mxu2 %v4127_v32  ;;  %v578_v30 = vld [vmem:[%s3866_s30 + $0x868] sm:$0xff]  ;;  %v595_v32 = vld [vmem:[%s3866_s30 + $0x8f0] sm:$0xff] }
  0xda   : > { %1962 = vmatpush.msra.mxu0 %v580_v21  ;;  %2002 = vmatpush.msra.mxu2 %v612_v22  ;;  %v1502_v21 = vld.sshfl [vmem:[#allocation1] sm:$0xff pattern:$0x73625140]  ;;  %v1504_v22 = vld.sshfl [vmem:[#allocation1 + $0x10] sm:$0xff pattern:$0x73625140] }
  0xdb   : > { %1917 = vmatpush.msrb.mxu1 %v517_v23  ;;  %1957 = vmatpush.msrb.mxu3 %v549_v24  ;;  %v644_v23 = vld [vmem:[%s3866_s30 + $0xa78] sm:$0xff] }
  0xdc   : > { %1918 = vmatmul.f32.vlgmr.msrb.gmra.mxu1 %v4129_v33  ;;  %1958 = vmatmul.f32.vlgmr.msrb.gmra.mxu3 %v4133_v31  ;;  %v609_v33 = vld [vmem:[%s3866_s30 + $0x960] sm:$0xff]  ;;  %v626_v31 = vld [vmem:[%s3866_s30 + $0x9e8] sm:$0xff]  ;;  %v676_v24 = vld [vmem:[%s3866_s30 + $0xb78] sm:$0xff] }
  0xdd   : > { %1963 = vmatpush.msra.mxu0 %v579_v25  ;;  %1982 = vmatpush.msra.mxu1 %v596_v29  ;;  %v581_v25 = vld [vmem:[%s3866_s30 + $0x880] sm:$0xff] }
  0xde   : > { %2003 = vmatpush.msra.mxu2 %v611_v26  ;;  %2022 = vmatpush.msra.mxu3 %v628_v27  ;;  %v613_v29 = vld [vmem:[%s3866_s30 + $0x980] sm:$0xff]  ;;  %v1505_v27 = vld.sshfl [vmem:[#allocation1 + $0x18] sm:$0xff pattern:$0x73625140] }
  0xdf   : > { %1964 = vmatpush.msra.mxu0 %v578_v30  ;;  %1983 = vmatpush.msra.mxu1 %v595_v32  ;;  %v1503_v26 = vld.sshfl [vmem:[#allocation1 + $0x8] sm:$0xff pattern:$0x73625140]  ;;  %v643_v30 = vld [vmem:[%s3866_s30 + $0xa70] sm:$0xff] }
  0xe0   : > { %2004 = vmatpush.msra.mxu2 %v610_v28  ;;  %2023 = vmatpush.msra.mxu3 %v627_v34  ;;  %v660_v32 = vld [vmem:[%s3866_s30 + $0xaf8] sm:$0xff]  ;;  %v675_v28 = vld [vmem:[%s3866_s30 + $0xb70] sm:$0xff] }
  0xe1   : > { %1965 = vmatpush.msra.mxu0 %v577_v35  ;;  %1984 = vmatpush.msra.mxu1 %v594_v36  ;;  %v692_v34 = vld [vmem:[%s3866_s30 + $0xbf8] sm:$0xff]  ;;  %v642_v35 = vld [vmem:[%s3866_s30 + $0xa68] sm:$0xff]  ;;  %v659_v36 = vld [vmem:[%s3866_s30 + $0xaf0] sm:$0xff] }
  0xe2   : > { %2005 = vmatpush.msra.mxu2 %v609_v33  ;;  %2024 = vmatpush.msra.mxu3 %v626_v31  ;;  %v674_v33 = vld [vmem:[%s3866_s30 + $0xb68] sm:$0xff]  ;;  %v691_v31 = vld [vmem:[%s3866_s30 + $0xbf0] sm:$0xff] }
  0xe3   : > { %1966 = vmatpush.msra.mxu0 %v576_v37  ;;  %1985 = vmatpush.msra.mxu1 %v593_v38  ;;  %v641_v37 = vld [vmem:[%s3866_s30 + $0xa60] sm:$0xff]  ;;  %v658_v38 = vld [vmem:[%s3866_s30 + $0xae8] sm:$0xff] }
  0xe4   : > { %2006 = vmatpush.msra.mxu2 %v608_v39  ;;  %2025 = vmatpush.msra.mxu3 %v625_v40  ;;  %v673_v39 = vld [vmem:[%s3866_s30 + $0xb60] sm:$0xff]  ;;  %v690_v40 = vld [vmem:[%s3866_s30 + $0xbe8] sm:$0xff] }
  0xe5   : > { %1967 = vmatpush.msra.mxu0 %v575_v41  ;;  %1986 = vmatpush.msra.mxu1 %v592_v42  ;;  %v640_v41 = vld [vmem:[%s3866_s30 + $0xa58] sm:$0xff]  ;;  %v657_v42 = vld [vmem:[%s3866_s30 + $0xae0] sm:$0xff] }
  0xe6   : > { %2007 = vmatpush.msra.mxu2 %v607_v43  ;;  %2026 = vmatpush.msra.mxu3 %v624_v44  ;;  %v672_v43 = vld [vmem:[%s3866_s30 + $0xb58] sm:$0xff]  ;;  %v689_v44 = vld [vmem:[%s3866_s30 + $0xbe0] sm:$0xff] }
  0xe7   : > { %1968 = vmatpush.msra.mxu0 %v574_v45  ;;  %1987 = vmatpush.msra.mxu1 %v591_v46  ;;  %v639_v45 = vld [vmem:[%s3866_s30 + $0xa50] sm:$0xff]  ;;  %v656_v46 = vld [vmem:[%s3866_s30 + $0xad8] sm:$0xff] }
  0xe8   : > { %2008 = vmatpush.msra.mxu2 %v606_v47  ;;  %2027 = vmatpush.msra.mxu3 %v623_v48  ;;  %v671_v47 = vld [vmem:[%s3866_s30 + $0xb50] sm:$0xff]  ;;  %v688_v48 = vld [vmem:[%s3866_s30 + $0xbd8] sm:$0xff] }
  0xe9   : > { %1969 = vmatpush.msra.mxu0 %v573_v49  ;;  %1988 = vmatpush.msra.mxu1 %v590_v50  ;;  %v638_v49 = vld [vmem:[%s3866_s30 + $0xa48] sm:$0xff]  ;;  %v655_v50 = vld [vmem:[%s3866_s30 + $0xad0] sm:$0xff] }
  0xea   : > { %2009 = vmatpush.msra.mxu2 %v605_v51  ;;  %2028 = vmatpush.msra.mxu3 %v622_v52  ;;  %v670_v51 = vld [vmem:[%s3866_s30 + $0xb48] sm:$0xff]  ;;  %v687_v52 = vld [vmem:[%s3866_s30 + $0xbd0] sm:$0xff] }
  0xeb   : > { %1970 = vmatpush.msra.mxu0 %v572_v53  ;;  %1989 = vmatpush.msra.mxu1 %v589_v54  ;;  %v637_v53 = vld [vmem:[%s3866_s30 + $0xa40] sm:$0xff]  ;;  %v654_v54 = vld [vmem:[%s3866_s30 + $0xac8] sm:$0xff] }
  0xec   : > { %2010 = vmatpush.msra.mxu2 %v604_v55  ;;  %2029 = vmatpush.msra.mxu3 %v621_v56  ;;  %v669_v55 = vld [vmem:[%s3866_s30 + $0xb40] sm:$0xff]  ;;  %v686_v56 = vld [vmem:[%s3866_s30 + $0xbc8] sm:$0xff] }
  0xed   : > { %1971 = vmatpush.msra.mxu0 %v571_v57  ;;  %1990 = vmatpush.msra.mxu1 %v588_v58  ;;  %v636_v57 = vld [vmem:[%s3866_s30 + $0xa38] sm:$0xff]  ;;  %v653_v58 = vld [vmem:[%s3866_s30 + $0xac0] sm:$0xff] }
  0xee   : > { %2011 = vmatpush.msra.mxu2 %v603_v59  ;;  %2030 = vmatpush.msra.mxu3 %v620_v60  ;;  %v668_v59 = vld [vmem:[%s3866_s30 + $0xb38] sm:$0xff]  ;;  %v685_v60 = vld [vmem:[%s3866_s30 + $0xbc0] sm:$0xff] }
  0xef   : > { %1972 = vmatpush.msra.mxu0 %v570_v61  ;;  %1991 = vmatpush.msra.mxu1 %v587_v62  ;;  %v635_v61 = vld [vmem:[%s3866_s30 + $0xa30] sm:$0xff]  ;;  %v652_v62 = vld [vmem:[%s3866_s30 + $0xab8] sm:$0xff] }
  0xf0   : > { %2012 = vmatpush.msra.mxu2 %v602_v63  ;;  %2031 = vmatpush.msra.mxu3 %v619_v0  ;;  %v667_v63 = vld [vmem:[%s3866_s30 + $0xb30] sm:$0xff]  ;;  %v684_v0 = vld [vmem:[%s3866_s30 + $0xbb8] sm:$0xff] }
  0xf1   : > { %1973 = vmatpush.msra.mxu0 %v569_v1  ;;  %1992 = vmatpush.msra.mxu1 %v586_v2  ;;  %v634_v1 = vld [vmem:[%s3866_s30 + $0xa28] sm:$0xff]  ;;  %v651_v2 = vld [vmem:[%s3866_s30 + $0xab0] sm:$0xff] }
  0xf2   : > { %2013 = vmatpush.msra.mxu2 %v601_v3  ;;  %2032 = vmatpush.msra.mxu3 %v618_v4  ;;  %v666_v3 = vld [vmem:[%s3866_s30 + $0xb28] sm:$0xff]  ;;  %v683_v4 = vld [vmem:[%s3866_s30 + $0xbb0] sm:$0xff] }
  0xf3   : > { %1974 = vmatpush.msra.mxu0 %v568_v5  ;;  %1993 = vmatpush.msra.mxu1 %v585_v6  ;;  %v633_v5 = vld [vmem:[%s3866_s30 + $0xa20] sm:$0xff]  ;;  %v650_v6 = vld [vmem:[%s3866_s30 + $0xaa8] sm:$0xff] }
  0xf4   : > { %2014 = vmatpush.msra.mxu2 %v600_v7  ;;  %2033 = vmatpush.msra.mxu3 %v617_v8  ;;  %v665_v7 = vld [vmem:[%s3866_s30 + $0xb20] sm:$0xff]  ;;  %v682_v8 = vld [vmem:[%s3866_s30 + $0xba8] sm:$0xff] }
  0xf5   : > { %1975 = vmatpush.msra.mxu0 %v567_v9  ;;  %1994 = vmatpush.msra.mxu1 %v584_v10  ;;  %v632_v9 = vld [vmem:[%s3866_s30 + $0xa18] sm:$0xff]  ;;  %v649_v10 = vld [vmem:[%s3866_s30 + $0xaa0] sm:$0xff] }
  0xf6   : > { %2015 = vmatpush.msra.mxu2 %v599_v11  ;;  %2034 = vmatpush.msra.mxu3 %v616_v12  ;;  %v664_v11 = vld [vmem:[%s3866_s30 + $0xb18] sm:$0xff]  ;;  %v681_v12 = vld [vmem:[%s3866_s30 + $0xba0] sm:$0xff] }
  0xf7   : > { %1976 = vmatpush.msra.mxu0 %v566_v13  ;;  %1995 = vmatpush.msra.mxu1 %v583_v14  ;;  %v631_v13 = vld [vmem:[%s3866_s30 + $0xa10] sm:$0xff]  ;;  %v648_v14 = vld [vmem:[%s3866_s30 + $0xa98] sm:$0xff] }
  0xf8   : > { %2016 = vmatpush.msra.mxu2 %v598_v15  ;;  %2035 = vmatpush.msra.mxu3 %v615_v16  ;;  %v663_v15 = vld [vmem:[%s3866_s30 + $0xb10] sm:$0xff]  ;;  %v680_v16 = vld [vmem:[%s3866_s30 + $0xb98] sm:$0xff] }
  0xf9   : > { %1977 = vmatpush.msra.mxu0 %v565_v17  ;;  %1996 = vmatpush.msra.mxu1 %v582_v18  ;;  %v630_v17 = vld [vmem:[%s3866_s30 + $0xa08] sm:$0xff]  ;;  %v647_v18 = vld [vmem:[%s3866_s30 + $0xa90] sm:$0xff] }
  0xfa   : > { %2017 = vmatpush.msra.mxu2 %v597_v19  ;;  %2036 = vmatpush.msra.mxu3 %v614_v20  ;;  %v297_v19 = vld [vmem:[%s3858_s29 + $0x30] sm:$0xff]  ;;  %v662_v20 = vld [vmem:[%s3866_s30 + $0xb08] sm:$0xff] }
  0xfb   : > { %1978 = vmatmul.f32.vlgmr.msra.gmra.mxu0 %v1502_v21  ;;  %2018 = vmatmul.f32.vlgmr.msra.gmra.mxu2 %v1504_v22  ;;  %v679_v21 = vld [vmem:[%s3866_s30 + $0xb90] sm:$0xff]  ;;  %1510 = vst [vmem:[#allocation1] ss:$4 sm:$0xff] %v297_v19  ;;  %v629_v22 = vld [vmem:[%s3866_s30 + $0xa00] sm:$0xff]  ;;  %v712_v19 = vld [vmem:[%s3866_s30 + $0xc98] sm:$0xff] }
  0xfc   : > { %2042 = vmatpush.msrb.mxu0 %v644_v23  ;;  %2082 = vmatpush.msrb.mxu2 %v676_v24  ;;  %v646_v23 = vld [vmem:[%s3866_s30 + $0xa88] sm:$0xff]  ;;  %v661_v24 = vld [vmem:[%s3866_s30 + $0xb00] sm:$0xff] }
  0xfd   : > { %1997 = vmatpush.msra.mxu1 %v581_v25  ;;  %2037 = vmatpush.msra.mxu3 %v613_v29  ;;  %v678_v25 = vld [vmem:[%s3866_s30 + $0xb88] sm:$0xff]  ;;  %v1506_v29 = vld.sshfl [vmem:[#allocation1 + $0x20] sm:$0xff pattern:$0x73625140] }
  0xfe   : > { %1998 = vmatmul.f32.vlgmr.msra.gmra.mxu1 %v1503_v26  ;;  %2038 = vmatmul.f32.vlgmr.msra.gmra.mxu3 %v1505_v27  ;;  %v1508_v26 = vld.sshfl [vmem:[#allocation1 + $0x30] sm:$0xff pattern:$0x73625140]  ;;  %v708_v27 = vld [vmem:[%s3866_s30 + $0xc78] sm:$0xff] }
  0xff   : > { %2043 = vmatpush.msrb.mxu0 %v643_v30  ;;  %2062 = vmatpush.msrb.mxu1 %v660_v32  ;;  %v740_v30 = vld [vmem:[%s3866_s30 + $0xd78] sm:$0xff]  ;;  %v645_v32 = vld [vmem:[%s3866_s30 + $0xa80] sm:$0xff] }
 0x100   : > { %2083 = vmatpush.msrb.mxu2 %v675_v28  ;;  %2102 = vmatpush.msrb.mxu3 %v692_v34  ;;  %v677_v28 = vld [vmem:[%s3866_s30 + $0xb80] sm:$0xff] }
 0x101   : > { %2044 = vmatpush.msrb.mxu0 %v642_v35  ;;  %2063 = vmatpush.msrb.mxu1 %v659_v36  ;;  %v1507_v34 = vld.sshfl [vmem:[#allocation1 + $0x28] sm:$0xff pattern:$0x73625140]  ;;  %v1509_v35 = vld.sshfl [vmem:[#allocation1 + $0x38] sm:$0xff pattern:$0x73625140] }
 0x102   : > { %2084 = vmatpush.msrb.mxu2 %v674_v33  ;;  %2103 = vmatpush.msrb.mxu3 %v691_v31  ;;  %v707_v36 = vld [vmem:[%s3866_s30 + $0xc70] sm:$0xff]  ;;  %v724_v33 = vld [vmem:[%s3866_s30 + $0xcf8] sm:$0xff] }
 0x103   : > { %2045 = vmatpush.msrb.mxu0 %v641_v37  ;;  %2064 = vmatpush.msrb.mxu1 %v658_v38  ;;  %v739_v31 = vld [vmem:[%s3866_s30 + $0xd70] sm:$0xff]  ;;  %v756_v37 = vld [vmem:[%s3866_s30 + $0xdf8] sm:$0xff]  ;;  %v706_v38 = vld [vmem:[%s3866_s30 + $0xc68] sm:$0xff] }
 0x104   : > { %2085 = vmatpush.msrb.mxu2 %v673_v39  ;;  %2104 = vmatpush.msrb.mxu3 %v690_v40  ;;  %v723_v39 = vld [vmem:[%s3866_s30 + $0xcf0] sm:$0xff]  ;;  %v738_v40 = vld [vmem:[%s3866_s30 + $0xd68] sm:$0xff] }
 0x105   : > { %2046 = vmatpush.msrb.mxu0 %v640_v41  ;;  %2065 = vmatpush.msrb.mxu1 %v657_v42  ;;  %v755_v41 = vld [vmem:[%s3866_s30 + $0xdf0] sm:$0xff]  ;;  %v705_v42 = vld [vmem:[%s3866_s30 + $0xc60] sm:$0xff] }
 0x106   : > { %2086 = vmatpush.msrb.mxu2 %v672_v43  ;;  %2105 = vmatpush.msrb.mxu3 %v689_v44  ;;  %v722_v43 = vld [vmem:[%s3866_s30 + $0xce8] sm:$0xff]  ;;  %v737_v44 = vld [vmem:[%s3866_s30 + $0xd60] sm:$0xff] }
 0x107   : > { %2047 = vmatpush.msrb.mxu0 %v639_v45  ;;  %2066 = vmatpush.msrb.mxu1 %v656_v46  ;;  %v754_v45 = vld [vmem:[%s3866_s30 + $0xde8] sm:$0xff]  ;;  %v704_v46 = vld [vmem:[%s3866_s30 + $0xc58] sm:$0xff] }
 0x108   : > { %2087 = vmatpush.msrb.mxu2 %v671_v47  ;;  %2106 = vmatpush.msrb.mxu3 %v688_v48  ;;  %v721_v47 = vld [vmem:[%s3866_s30 + $0xce0] sm:$0xff]  ;;  %v736_v48 = vld [vmem:[%s3866_s30 + $0xd58] sm:$0xff] }
 0x109   : > { %2048 = vmatpush.msrb.mxu0 %v638_v49  ;;  %2067 = vmatpush.msrb.mxu1 %v655_v50  ;;  %v753_v49 = vld [vmem:[%s3866_s30 + $0xde0] sm:$0xff]  ;;  %v703_v50 = vld [vmem:[%s3866_s30 + $0xc50] sm:$0xff] }
 0x10a   : > { %2088 = vmatpush.msrb.mxu2 %v670_v51  ;;  %2107 = vmatpush.msrb.mxu3 %v687_v52  ;;  %v720_v51 = vld [vmem:[%s3866_s30 + $0xcd8] sm:$0xff]  ;;  %v735_v52 = vld [vmem:[%s3866_s30 + $0xd50] sm:$0xff] }
 0x10b   : > { %2049 = vmatpush.msrb.mxu0 %v637_v53  ;;  %2068 = vmatpush.msrb.mxu1 %v654_v54  ;;  %v752_v53 = vld [vmem:[%s3866_s30 + $0xdd8] sm:$0xff]  ;;  %v702_v54 = vld [vmem:[%s3866_s30 + $0xc48] sm:$0xff] }
 0x10c   : > { %2089 = vmatpush.msrb.mxu2 %v669_v55  ;;  %2108 = vmatpush.msrb.mxu3 %v686_v56  ;;  %v719_v55 = vld [vmem:[%s3866_s30 + $0xcd0] sm:$0xff]  ;;  %v734_v56 = vld [vmem:[%s3866_s30 + $0xd48] sm:$0xff] }
 0x10d   : > { %2050 = vmatpush.msrb.mxu0 %v636_v57  ;;  %2069 = vmatpush.msrb.mxu1 %v653_v58  ;;  %v751_v57 = vld [vmem:[%s3866_s30 + $0xdd0] sm:$0xff]  ;;  %v701_v58 = vld [vmem:[%s3866_s30 + $0xc40] sm:$0xff] }
 0x10e   : > { %2090 = vmatpush.msrb.mxu2 %v668_v59  ;;  %2109 = vmatpush.msrb.mxu3 %v685_v60  ;;  %v718_v59 = vld [vmem:[%s3866_s30 + $0xcc8] sm:$0xff]  ;;  %v733_v60 = vld [vmem:[%s3866_s30 + $0xd40] sm:$0xff] }
 0x10f   : > { %2051 = vmatpush.msrb.mxu0 %v635_v61  ;;  %2070 = vmatpush.msrb.mxu1 %v652_v62  ;;  %v750_v61 = vld [vmem:[%s3866_s30 + $0xdc8] sm:$0xff]  ;;  %v700_v62 = vld [vmem:[%s3866_s30 + $0xc38] sm:$0xff] }
 0x110   : > { %2091 = vmatpush.msrb.mxu2 %v667_v63  ;;  %2110 = vmatpush.msrb.mxu3 %v684_v0  ;;  %v717_v63 = vld [vmem:[%s3866_s30 + $0xcc0] sm:$0xff]  ;;  %v732_v0 = vld [vmem:[%s3866_s30 + $0xd38] sm:$0xff] }
 0x111   : > { %2052 = vmatpush.msrb.mxu0 %v634_v1  ;;  %2071 = vmatpush.msrb.mxu1 %v651_v2  ;;  %v749_v1 = vld [vmem:[%s3866_s30 + $0xdc0] sm:$0xff]  ;;  %v699_v2 = vld [vmem:[%s3866_s30 + $0xc30] sm:$0xff] }
 0x112   : > { %2092 = vmatpush.msrb.mxu2 %v666_v3  ;;  %2111 = vmatpush.msrb.mxu3 %v683_v4  ;;  %v716_v3 = vld [vmem:[%s3866_s30 + $0xcb8] sm:$0xff]  ;;  %v731_v4 = vld [vmem:[%s3866_s30 + $0xd30] sm:$0xff] }
 0x113   : > { %2053 = vmatpush.msrb.mxu0 %v633_v5  ;;  %2072 = vmatpush.msrb.mxu1 %v650_v6  ;;  %v748_v5 = vld [vmem:[%s3866_s30 + $0xdb8] sm:$0xff]  ;;  %v698_v6 = vld [vmem:[%s3866_s30 + $0xc28] sm:$0xff] }
 0x114   : > { %2093 = vmatpush.msrb.mxu2 %v665_v7  ;;  %2112 = vmatpush.msrb.mxu3 %v682_v8  ;;  %v715_v7 = vld [vmem:[%s3866_s30 + $0xcb0] sm:$0xff]  ;;  %v730_v8 = vld [vmem:[%s3866_s30 + $0xd28] sm:$0xff] }
 0x115   : > { %2054 = vmatpush.msrb.mxu0 %v632_v9  ;;  %2073 = vmatpush.msrb.mxu1 %v649_v10  ;;  %v747_v9 = vld [vmem:[%s3866_s30 + $0xdb0] sm:$0xff]  ;;  %v697_v10 = vld [vmem:[%s3866_s30 + $0xc20] sm:$0xff] }
 0x116   : > { %2094 = vmatpush.msrb.mxu2 %v664_v11  ;;  %2113 = vmatpush.msrb.mxu3 %v681_v12  ;;  %v714_v11 = vld [vmem:[%s3866_s30 + $0xca8] sm:$0xff]  ;;  %v729_v12 = vld [vmem:[%s3866_s30 + $0xd20] sm:$0xff] }
 0x117   : > { %2055 = vmatpush.msrb.mxu0 %v631_v13  ;;  %2074 = vmatpush.msrb.mxu1 %v648_v14  ;;  %v746_v13 = vld [vmem:[%s3866_s30 + $0xda8] sm:$0xff]  ;;  %v696_v14 = vld [vmem:[%s3866_s30 + $0xc18] sm:$0xff] }
 0x118   : > { %2095 = vmatpush.msrb.mxu2 %v663_v15  ;;  %2114 = vmatpush.msrb.mxu3 %v680_v16  ;;  %v713_v15 = vld [vmem:[%s3866_s30 + $0xca0] sm:$0xff]  ;;  %v728_v16 = vld [vmem:[%s3866_s30 + $0xd18] sm:$0xff] }
 0x119   : > { %2056 = vmatpush.msrb.mxu0 %v630_v17  ;;  %2075 = vmatpush.msrb.mxu1 %v647_v18  ;;  %v745_v17 = vld [vmem:[%s3866_s30 + $0xda0] sm:$0xff]  ;;  %v695_v18 = vld [vmem:[%s3866_s30 + $0xc10] sm:$0xff] }
 0x11a   : > { %2096 = vmatpush.msrb.mxu2 %v662_v20  ;;  %2115 = vmatpush.msrb.mxu3 %v679_v21  ;;  %v727_v20 = vld [vmem:[%s3866_s30 + $0xd10] sm:$0xff]  ;;  %v744_v21 = vld [vmem:[%s3866_s30 + $0xd98] sm:$0xff] }
 0x11b   : > { %2057 = vmatpush.msrb.mxu0 %v629_v22  ;;  %2076 = vmatpush.msrb.mxu1 %v646_v23  ;;  %v694_v22 = vld [vmem:[%s3866_s30 + $0xc08] sm:$0xff]  ;;  %v711_v23 = vld [vmem:[%s3866_s30 + $0xc90] sm:$0xff] }
 0x11c   : > { %2097 = vmatpush.msrb.mxu2 %v661_v24  ;;  %2116 = vmatpush.msrb.mxu3 %v678_v25  ;;  %v298_v24 = vld [vmem:[%s3858_s29 + $0x38] sm:$0xff] }
 0x11d   : > { %2058 = vmatmul.f32.vlgmr.msrb.gmra.mxu0 %v1506_v29  ;;  %2098 = vmatmul.f32.vlgmr.msrb.gmra.mxu2 %v1508_v26  ;;  %v726_v25 = vld [vmem:[%s3866_s30 + $0xd08] sm:$0xff]  ;;  %v743_v29 = vld [vmem:[%s3866_s30 + $0xd90] sm:$0xff]  ;;  %1511 = vst [vmem:[#allocation1 + $0x20] ss:$4 sm:$0xff] %v298_v24  ;;  %v693_v26 = vld [vmem:[%s3866_s30 + $0xc00] sm:$0xff] }
 0x11e   : > { %2122 = vmatpush.msra.mxu0 %v708_v27  ;;  %2162 = vmatpush.msra.mxu2 %v740_v30  ;;  %v710_v27 = vld [vmem:[%s3866_s30 + $0xc88] sm:$0xff]  ;;  %v725_v30 = vld [vmem:[%s3866_s30 + $0xd00] sm:$0xff]  ;;  %v776_v24 = vld [vmem:[%s3866_s30 + $0xe98] sm:$0xff] }
 0x11f   : > { %2077 = vmatpush.msrb.mxu1 %v645_v32  ;;  %2117 = vmatpush.msrb.mxu3 %v677_v28  ;;  %v742_v32 = vld [vmem:[%s3866_s30 + $0xd88] sm:$0xff]  ;;  %v1512_v28 = vld.sshfl [vmem:[#allocation1] sm:$0xff pattern:$0x73625140] }
 0x120   : > { %2078 = vmatmul.f32.vlgmr.msrb.gmra.mxu1 %v1507_v34  ;;  %2118 = vmatmul.f32.vlgmr.msrb.gmra.mxu3 %v1509_v35  ;;  %v1514_v34 = vld.sshfl [vmem:[#allocation1 + $0x10] sm:$0xff pattern:$0x73625140]  ;;  %v772_v35 = vld [vmem:[%s3866_s30 + $0xe78] sm:$0xff] }
 0x121   : > { %2123 = vmatpush.msra.mxu0 %v707_v36  ;;  %2142 = vmatpush.msra.mxu1 %v724_v33  ;;  %v804_v36 = vld [vmem:[%s3866_s30 + $0xf78] sm:$0xff]  ;;  %v709_v33 = vld [vmem:[%s3866_s30 + $0xc80] sm:$0xff] }
 0x122   : > { %2163 = vmatpush.msra.mxu2 %v739_v31  ;;  %2182 = vmatpush.msra.mxu3 %v756_v37  ;;  %v741_v31 = vld [vmem:[%s3866_s30 + $0xd80] sm:$0xff] }
 0x123   : > { %2124 = vmatpush.msra.mxu0 %v706_v38  ;;  %2143 = vmatpush.msra.mxu1 %v723_v39  ;;  %v1513_v37 = vld.sshfl [vmem:[#allocation1 + $0x8] sm:$0xff pattern:$0x73625140]  ;;  %v1515_v38 = vld.sshfl [vmem:[#allocation1 + $0x18] sm:$0xff pattern:$0x73625140] }
 0x124   : > { %2164 = vmatpush.msra.mxu2 %v738_v40  ;;  %2183 = vmatpush.msra.mxu3 %v755_v41  ;;  %v771_v39 = vld [vmem:[%s3866_s30 + $0xe70] sm:$0xff]  ;;  %v788_v40 = vld [vmem:[%s3866_s30 + $0xef8] sm:$0xff] }
 0x125   : > { %2125 = vmatpush.msra.mxu0 %v705_v42  ;;  %2144 = vmatpush.msra.mxu1 %v722_v43  ;;  %v803_v41 = vld [vmem:[%s3866_s30 + $0xf70] sm:$0xff]  ;;  %v820_v42 = vld [vmem:[%s3866_s30 + $0xff8] sm:$0xff]  ;;  %v770_v43 = vld [vmem:[%s3866_s30 + $0xe68] sm:$0xff] }
 0x126   : > { %2165 = vmatpush.msra.mxu2 %v737_v44  ;;  %2184 = vmatpush.msra.mxu3 %v754_v45  ;;  %v787_v44 = vld [vmem:[%s3866_s30 + $0xef0] sm:$0xff]  ;;  %v802_v45 = vld [vmem:[%s3866_s30 + $0xf68] sm:$0xff] }
 0x127   : > { %2126 = vmatpush.msra.mxu0 %v704_v46  ;;  %2145 = vmatpush.msra.mxu1 %v721_v47  ;;  %v819_v46 = vld [vmem:[%s3866_s30 + $0xff0] sm:$0xff]  ;;  %v769_v47 = vld [vmem:[%s3866_s30 + $0xe60] sm:$0xff] }
 0x128   : > { %2166 = vmatpush.msra.mxu2 %v736_v48  ;;  %2185 = vmatpush.msra.mxu3 %v753_v49  ;;  %v786_v48 = vld [vmem:[%s3866_s30 + $0xee8] sm:$0xff]  ;;  %v801_v49 = vld [vmem:[%s3866_s30 + $0xf60] sm:$0xff] }
 0x129   : > { %2127 = vmatpush.msra.mxu0 %v703_v50  ;;  %2146 = vmatpush.msra.mxu1 %v720_v51  ;;  %v818_v50 = vld [vmem:[%s3866_s30 + $0xfe8] sm:$0xff]  ;;  %v768_v51 = vld [vmem:[%s3866_s30 + $0xe58] sm:$0xff] }
 0x12a   : > { %2167 = vmatpush.msra.mxu2 %v735_v52  ;;  %2186 = vmatpush.msra.mxu3 %v752_v53  ;;  %v785_v52 = vld [vmem:[%s3866_s30 + $0xee0] sm:$0xff]  ;;  %v800_v53 = vld [vmem:[%s3866_s30 + $0xf58] sm:$0xff] }
 0x12b   : > { %2128 = vmatpush.msra.mxu0 %v702_v54  ;;  %2147 = vmatpush.msra.mxu1 %v719_v55  ;;  %v817_v54 = vld [vmem:[%s3866_s30 + $0xfe0] sm:$0xff]  ;;  %v767_v55 = vld [vmem:[%s3866_s30 + $0xe50] sm:$0xff] }
 0x12c   : > { %2168 = vmatpush.msra.mxu2 %v734_v56  ;;  %2187 = vmatpush.msra.mxu3 %v751_v57  ;;  %v784_v56 = vld [vmem:[%s3866_s30 + $0xed8] sm:$0xff]  ;;  %v799_v57 = vld [vmem:[%s3866_s30 + $0xf50] sm:$0xff] }
 0x12d   : > { %2129 = vmatpush.msra.mxu0 %v701_v58  ;;  %2148 = vmatpush.msra.mxu1 %v718_v59  ;;  %v816_v58 = vld [vmem:[%s3866_s30 + $0xfd8] sm:$0xff]  ;;  %v766_v59 = vld [vmem:[%s3866_s30 + $0xe48] sm:$0xff] }
 0x12e   : > { %2169 = vmatpush.msra.mxu2 %v733_v60  ;;  %2188 = vmatpush.msra.mxu3 %v750_v61  ;;  %v783_v60 = vld [vmem:[%s3866_s30 + $0xed0] sm:$0xff]  ;;  %v798_v61 = vld [vmem:[%s3866_s30 + $0xf48] sm:$0xff] }
 0x12f   : > { %2130 = vmatpush.msra.mxu0 %v700_v62  ;;  %2149 = vmatpush.msra.mxu1 %v717_v63  ;;  %v815_v62 = vld [vmem:[%s3866_s30 + $0xfd0] sm:$0xff]  ;;  %v765_v63 = vld [vmem:[%s3866_s30 + $0xe40] sm:$0xff] }
 0x130   : > { %2170 = vmatpush.msra.mxu2 %v732_v0  ;;  %2189 = vmatpush.msra.mxu3 %v749_v1  ;;  %v782_v0 = vld [vmem:[%s3866_s30 + $0xec8] sm:$0xff]  ;;  %v797_v1 = vld [vmem:[%s3866_s30 + $0xf40] sm:$0xff] }
 0x131   : > { %2131 = vmatpush.msra.mxu0 %v699_v2  ;;  %2150 = vmatpush.msra.mxu1 %v716_v3  ;;  %v814_v2 = vld [vmem:[%s3866_s30 + $0xfc8] sm:$0xff]  ;;  %v764_v3 = vld [vmem:[%s3866_s30 + $0xe38] sm:$0xff] }
 0x132   : > { %2171 = vmatpush.msra.mxu2 %v731_v4  ;;  %2190 = vmatpush.msra.mxu3 %v748_v5  ;;  %v781_v4 = vld [vmem:[%s3866_s30 + $0xec0] sm:$0xff]  ;;  %v796_v5 = vld [vmem:[%s3866_s30 + $0xf38] sm:$0xff] }
 0x133   : > { %2132 = vmatpush.msra.mxu0 %v698_v6  ;;  %2151 = vmatpush.msra.mxu1 %v715_v7  ;;  %v813_v6 = vld [vmem:[%s3866_s30 + $0xfc0] sm:$0xff]  ;;  %v763_v7 = vld [vmem:[%s3866_s30 + $0xe30] sm:$0xff] }
 0x134   : > { %2172 = vmatpush.msra.mxu2 %v730_v8  ;;  %2191 = vmatpush.msra.mxu3 %v747_v9  ;;  %v780_v8 = vld [vmem:[%s3866_s30 + $0xeb8] sm:$0xff]  ;;  %v795_v9 = vld [vmem:[%s3866_s30 + $0xf30] sm:$0xff] }
 0x135   : > { %2133 = vmatpush.msra.mxu0 %v697_v10  ;;  %2152 = vmatpush.msra.mxu1 %v714_v11  ;;  %v812_v10 = vld [vmem:[%s3866_s30 + $0xfb8] sm:$0xff]  ;;  %v762_v11 = vld [vmem:[%s3866_s30 + $0xe28] sm:$0xff] }
 0x136   : > { %2173 = vmatpush.msra.mxu2 %v729_v12  ;;  %2192 = vmatpush.msra.mxu3 %v746_v13  ;;  %v779_v12 = vld [vmem:[%s3866_s30 + $0xeb0] sm:$0xff]  ;;  %v794_v13 = vld [vmem:[%s3866_s30 + $0xf28] sm:$0xff] }
 0x137   : > { %2134 = vmatpush.msra.mxu0 %v696_v14  ;;  %2153 = vmatpush.msra.mxu1 %v713_v15  ;;  %v811_v14 = vld [vmem:[%s3866_s30 + $0xfb0] sm:$0xff]  ;;  %v761_v15 = vld [vmem:[%s3866_s30 + $0xe20] sm:$0xff] }
 0x138   : > { %2174 = vmatpush.msra.mxu2 %v728_v16  ;;  %2193 = vmatpush.msra.mxu3 %v745_v17  ;;  %v778_v16 = vld [vmem:[%s3866_s30 + $0xea8] sm:$0xff]  ;;  %v793_v17 = vld [vmem:[%s3866_s30 + $0xf20] sm:$0xff] }
 0x139   : > { %2135 = vmatpush.msra.mxu0 %v695_v18  ;;  %2154 = vmatpush.msra.mxu1 %v712_v19  ;;  %v810_v18 = vld [vmem:[%s3866_s30 + $0xfa8] sm:$0xff]  ;;  %v760_v19 = vld [vmem:[%s3866_s30 + $0xe18] sm:$0xff] }
 0x13a   : > { %2175 = vmatpush.msra.mxu2 %v727_v20  ;;  %2194 = vmatpush.msra.mxu3 %v744_v21  ;;  %v777_v20 = vld [vmem:[%s3866_s30 + $0xea0] sm:$0xff]  ;;  %v792_v21 = vld [vmem:[%s3866_s30 + $0xf18] sm:$0xff] }
 0x13b   : > { %2136 = vmatpush.msra.mxu0 %v694_v22  ;;  %2155 = vmatpush.msra.mxu1 %v711_v23  ;;  %v809_v22 = vld [vmem:[%s3866_s30 + $0xfa0] sm:$0xff]  ;;  %v759_v23 = vld [vmem:[%s3866_s30 + $0xe10] sm:$0xff] }
 0x13c   : > { %2176 = vmatpush.msra.mxu2 %v726_v25  ;;  %2195 = vmatpush.msra.mxu3 %v743_v29  ;;  %v791_v25 = vld [vmem:[%s3866_s30 + $0xf10] sm:$0xff]  ;;  %v808_v29 = vld [vmem:[%s3866_s30 + $0xf98] sm:$0xff] }
 0x13d   : > { %2137 = vmatpush.msra.mxu0 %v693_v26  ;;  %2156 = vmatpush.msra.mxu1 %v710_v27  ;;  %v758_v26 = vld [vmem:[%s3866_s30 + $0xe08] sm:$0xff]  ;;  %v775_v27 = vld [vmem:[%s3866_s30 + $0xe90] sm:$0xff] }
 0x13e   : > { %2177 = vmatpush.msra.mxu2 %v725_v30  ;;  %2196 = vmatpush.msra.mxu3 %v742_v32  ;;  %v299_v30 = vld [vmem:[%s3858_s29 + $0x40] sm:$0xff]  ;;  %v790_v32 = vld [vmem:[%s3866_s30 + $0xf08] sm:$0xff] }
 0x13f   : > { %2138 = vmatmul.f32.vlgmr.msra.gmra.mxu0 %v1512_v28  ;;  %2178 = vmatmul.f32.vlgmr.msra.gmra.mxu2 %v1514_v34  ;;  %v807_v28 = vld [vmem:[%s3866_s30 + $0xf90] sm:$0xff]  ;;  %1520 = vst [vmem:[#allocation1] ss:$4 sm:$0xff] %v299_v30  ;;  %v757_v34 = vld [vmem:[%s3866_s30 + $0xe00] sm:$0xff]  ;;  %v840_v30 = vld [vmem:[%s3866_s30 + $0x1098] sm:$0xff] }
 0x140   : > { %2202 = vmatpush.msrb.mxu0 %v772_v35  ;;  %2242 = vmatpush.msrb.mxu2 %v804_v36  ;;  %v774_v35 = vld [vmem:[%s3866_s30 + $0xe88] sm:$0xff]  ;;  %v789_v36 = vld [vmem:[%s3866_s30 + $0xf00] sm:$0xff] }
 0x141   : > { %2157 = vmatpush.msra.mxu1 %v709_v33  ;;  %2197 = vmatpush.msra.mxu3 %v741_v31  ;;  %v806_v33 = vld [vmem:[%s3866_s30 + $0xf88] sm:$0xff]  ;;  %v1516_v31 = vld.sshfl [vmem:[#allocation1 + $0x20] sm:$0xff pattern:$0x73625140] }
 0x142   : > { %2158 = vmatmul.f32.vlgmr.msra.gmra.mxu1 %v1513_v37  ;;  %2198 = vmatmul.f32.vlgmr.msra.gmra.mxu3 %v1515_v38  ;;  %v1518_v37 = vld.sshfl [vmem:[#allocation1 + $0x30] sm:$0xff pattern:$0x73625140]  ;;  %v836_v38 = vld [vmem:[%s3866_s30 + $0x1078] sm:$0xff] }
 0x143   : > { %2203 = vmatpush.msrb.mxu0 %v771_v39  ;;  %2222 = vmatpush.msrb.mxu1 %v788_v40  ;;  %v868_v39 = vld [vmem:[%s3866_s30 + $0x1178] sm:$0xff]  ;;  %v773_v40 = vld [vmem:[%s3866_s30 + $0xe80] sm:$0xff] }
 0x144   : > { %2243 = vmatpush.msrb.mxu2 %v803_v41  ;;  %2262 = vmatpush.msrb.mxu3 %v820_v42  ;;  %v805_v41 = vld [vmem:[%s3866_s30 + $0xf80] sm:$0xff] }
 0x145   : > { %2204 = vmatpush.msrb.mxu0 %v770_v43  ;;  %2223 = vmatpush.msrb.mxu1 %v787_v44  ;;  %v1517_v42 = vld.sshfl [vmem:[#allocation1 + $0x28] sm:$0xff pattern:$0x73625140]  ;;  %v1519_v43 = vld.sshfl [vmem:[#allocation1 + $0x38] sm:$0xff pattern:$0x73625140] }
 0x146   : > { %2244 = vmatpush.msrb.mxu2 %v802_v45  ;;  %2263 = vmatpush.msrb.mxu3 %v819_v46  ;;  %v835_v44 = vld [vmem:[%s3866_s30 + $0x1070] sm:$0xff]  ;;  %v852_v45 = vld [vmem:[%s3866_s30 + $0x10f8] sm:$0xff] }
 0x147   : > { %2205 = vmatpush.msrb.mxu0 %v769_v47  ;;  %2224 = vmatpush.msrb.mxu1 %v786_v48  ;;  %v867_v46 = vld [vmem:[%s3866_s30 + $0x1170] sm:$0xff]  ;;  %v884_v47 = vld [vmem:[%s3866_s30 + $0x11f8] sm:$0xff]  ;;  %v834_v48 = vld [vmem:[%s3866_s30 + $0x1068] sm:$0xff] }
 0x148   : > { %2245 = vmatpush.msrb.mxu2 %v801_v49  ;;  %2264 = vmatpush.msrb.mxu3 %v818_v50  ;;  %v851_v49 = vld [vmem:[%s3866_s30 + $0x10f0] sm:$0xff]  ;;  %v866_v50 = vld [vmem:[%s3866_s30 + $0x1168] sm:$0xff] }
 0x149   : > { %2206 = vmatpush.msrb.mxu0 %v768_v51  ;;  %2225 = vmatpush.msrb.mxu1 %v785_v52  ;;  %v883_v51 = vld [vmem:[%s3866_s30 + $0x11f0] sm:$0xff]  ;;  %v833_v52 = vld [vmem:[%s3866_s30 + $0x1060] sm:$0xff] }
 0x14a   : > { %2246 = vmatpush.msrb.mxu2 %v800_v53  ;;  %2265 = vmatpush.msrb.mxu3 %v817_v54  ;;  %v850_v53 = vld [vmem:[%s3866_s30 + $0x10e8] sm:$0xff]  ;;  %v865_v54 = vld [vmem:[%s3866_s30 + $0x1160] sm:$0xff] }
 0x14b   : > { %2207 = vmatpush.msrb.mxu0 %v767_v55  ;;  %2226 = vmatpush.msrb.mxu1 %v784_v56  ;;  %v882_v55 = vld [vmem:[%s3866_s30 + $0x11e8] sm:$0xff]  ;;  %v832_v56 = vld [vmem:[%s3866_s30 + $0x1058] sm:$0xff] }
 0x14c   : > { %2247 = vmatpush.msrb.mxu2 %v799_v57  ;;  %2266 = vmatpush.msrb.mxu3 %v816_v58  ;;  %v849_v57 = vld [vmem:[%s3866_s30 + $0x10e0] sm:$0xff]  ;;  %v864_v58 = vld [vmem:[%s3866_s30 + $0x1158] sm:$0xff] }
 0x14d   : > { %2208 = vmatpush.msrb.mxu0 %v766_v59  ;;  %2227 = vmatpush.msrb.mxu1 %v783_v60  ;;  %v881_v59 = vld [vmem:[%s3866_s30 + $0x11e0] sm:$0xff]  ;;  %v831_v60 = vld [vmem:[%s3866_s30 + $0x1050] sm:$0xff] }
 0x14e   : > { %2248 = vmatpush.msrb.mxu2 %v798_v61  ;;  %2267 = vmatpush.msrb.mxu3 %v815_v62  ;;  %v848_v61 = vld [vmem:[%s3866_s30 + $0x10d8] sm:$0xff]  ;;  %v863_v62 = vld [vmem:[%s3866_s30 + $0x1150] sm:$0xff] }
 0x14f   : > { %2209 = vmatpush.msrb.mxu0 %v765_v63  ;;  %2228 = vmatpush.msrb.mxu1 %v782_v0  ;;  %v880_v63 = vld [vmem:[%s3866_s30 + $0x11d8] sm:$0xff]  ;;  %v830_v0 = vld [vmem:[%s3866_s30 + $0x1048] sm:$0xff] }
 0x150   : > { %2249 = vmatpush.msrb.mxu2 %v797_v1  ;;  %2268 = vmatpush.msrb.mxu3 %v814_v2  ;;  %v847_v1 = vld [vmem:[%s3866_s30 + $0x10d0] sm:$0xff]  ;;  %v862_v2 = vld [vmem:[%s3866_s30 + $0x1148] sm:$0xff] }
 0x151   : > { %2210 = vmatpush.msrb.mxu0 %v764_v3  ;;  %2229 = vmatpush.msrb.mxu1 %v781_v4  ;;  %v879_v3 = vld [vmem:[%s3866_s30 + $0x11d0] sm:$0xff]  ;;  %v829_v4 = vld [vmem:[%s3866_s30 + $0x1040] sm:$0xff] }
 0x152   : > { %2250 = vmatpush.msrb.mxu2 %v796_v5  ;;  %2269 = vmatpush.msrb.mxu3 %v813_v6  ;;  %v846_v5 = vld [vmem:[%s3866_s30 + $0x10c8] sm:$0xff]  ;;  %v861_v6 = vld [vmem:[%s3866_s30 + $0x1140] sm:$0xff] }
 0x153   : > { %2211 = vmatpush.msrb.mxu0 %v763_v7  ;;  %2230 = vmatpush.msrb.mxu1 %v780_v8  ;;  %v878_v7 = vld [vmem:[%s3866_s30 + $0x11c8] sm:$0xff]  ;;  %v828_v8 = vld [vmem:[%s3866_s30 + $0x1038] sm:$0xff] }
 0x154   : > { %2251 = vmatpush.msrb.mxu2 %v795_v9  ;;  %2270 = vmatpush.msrb.mxu3 %v812_v10  ;;  %v845_v9 = vld [vmem:[%s3866_s30 + $0x10c0] sm:$0xff]  ;;  %v860_v10 = vld [vmem:[%s3866_s30 + $0x1138] sm:$0xff] }
 0x155   : > { %2212 = vmatpush.msrb.mxu0 %v762_v11  ;;  %2231 = vmatpush.msrb.mxu1 %v779_v12  ;;  %v877_v11 = vld [vmem:[%s3866_s30 + $0x11c0] sm:$0xff]  ;;  %v827_v12 = vld [vmem:[%s3866_s30 + $0x1030] sm:$0xff] }
 0x156   : > { %2252 = vmatpush.msrb.mxu2 %v794_v13  ;;  %2271 = vmatpush.msrb.mxu3 %v811_v14  ;;  %v844_v13 = vld [vmem:[%s3866_s30 + $0x10b8] sm:$0xff]  ;;  %v859_v14 = vld [vmem:[%s3866_s30 + $0x1130] sm:$0xff] }
 0x157   : > { %2213 = vmatpush.msrb.mxu0 %v761_v15  ;;  %2232 = vmatpush.msrb.mxu1 %v778_v16  ;;  %v876_v15 = vld [vmem:[%s3866_s30 + $0x11b8] sm:$0xff]  ;;  %v826_v16 = vld [vmem:[%s3866_s30 + $0x1028] sm:$0xff] }
 0x158   : > { %2253 = vmatpush.msrb.mxu2 %v793_v17  ;;  %2272 = vmatpush.msrb.mxu3 %v810_v18  ;;  %v843_v17 = vld [vmem:[%s3866_s30 + $0x10b0] sm:$0xff]  ;;  %v858_v18 = vld [vmem:[%s3866_s30 + $0x1128] sm:$0xff] }
 0x159   : > { %2214 = vmatpush.msrb.mxu0 %v760_v19  ;;  %2233 = vmatpush.msrb.mxu1 %v777_v20  ;;  %v875_v19 = vld [vmem:[%s3866_s30 + $0x11b0] sm:$0xff]  ;;  %v825_v20 = vld [vmem:[%s3866_s30 + $0x1020] sm:$0xff] }
 0x15a   : > { %2254 = vmatpush.msrb.mxu2 %v792_v21  ;;  %2273 = vmatpush.msrb.mxu3 %v809_v22  ;;  %v842_v21 = vld [vmem:[%s3866_s30 + $0x10a8] sm:$0xff]  ;;  %v857_v22 = vld [vmem:[%s3866_s30 + $0x1120] sm:$0xff] }
 0x15b   : > { %2215 = vmatpush.msrb.mxu0 %v759_v23  ;;  %2234 = vmatpush.msrb.mxu1 %v776_v24  ;;  %v874_v23 = vld [vmem:[%s3866_s30 + $0x11a8] sm:$0xff]  ;;  %v824_v24 = vld [vmem:[%s3866_s30 + $0x1018] sm:$0xff] }
 0x15c   : > { %2255 = vmatpush.msrb.mxu2 %v791_v25  ;;  %2274 = vmatpush.msrb.mxu3 %v808_v29  ;;  %v841_v25 = vld [vmem:[%s3866_s30 + $0x10a0] sm:$0xff]  ;;  %v856_v29 = vld [vmem:[%s3866_s30 + $0x1118] sm:$0xff] }
 0x15d   : > { %2216 = vmatpush.msrb.mxu0 %v758_v26  ;;  %2235 = vmatpush.msrb.mxu1 %v775_v27  ;;  %v873_v26 = vld [vmem:[%s3866_s30 + $0x11a0] sm:$0xff]  ;;  %v823_v27 = vld [vmem:[%s3866_s30 + $0x1010] sm:$0xff] }
 0x15e   : > { %2256 = vmatpush.msrb.mxu2 %v790_v32  ;;  %2275 = vmatpush.msrb.mxu3 %v807_v28  ;;  %v855_v32 = vld [vmem:[%s3866_s30 + $0x1110] sm:$0xff]  ;;  %v872_v28 = vld [vmem:[%s3866_s30 + $0x1198] sm:$0xff] }
 0x15f   : > { %2217 = vmatpush.msrb.mxu0 %v757_v34  ;;  %2236 = vmatpush.msrb.mxu1 %v774_v35  ;;  %v822_v34 = vld [vmem:[%s3866_s30 + $0x1008] sm:$0xff]  ;;  %v839_v35 = vld [vmem:[%s3866_s30 + $0x1090] sm:$0xff] }
 0x160   : > { %2257 = vmatpush.msrb.mxu2 %v789_v36  ;;  %2276 = vmatpush.msrb.mxu3 %v806_v33  ;;  %v300_v36 = vld [vmem:[%s3858_s29 + $0x48] sm:$0xff] }
 0x161   : > { %2218 = vmatmul.f32.vlgmr.msrb.gmra.mxu0 %v1516_v31  ;;  %2258 = vmatmul.f32.vlgmr.msrb.gmra.mxu2 %v1518_v37  ;;  %v854_v33 = vld [vmem:[%s3866_s30 + $0x1108] sm:$0xff]  ;;  %v871_v31 = vld [vmem:[%s3866_s30 + $0x1190] sm:$0xff]  ;;  %1521 = vst [vmem:[#allocation1 + $0x20] ss:$4 sm:$0xff] %v300_v36  ;;  %v821_v37 = vld [vmem:[%s3866_s30 + $0x1000] sm:$0xff] }
 0x162   : > { %2282 = vmatpush.msra.mxu0 %v836_v38  ;;  %2322 = vmatpush.msra.mxu2 %v868_v39  ;;  %v838_v38 = vld [vmem:[%s3866_s30 + $0x1088] sm:$0xff]  ;;  %v853_v39 = vld [vmem:[%s3866_s30 + $0x1100] sm:$0xff]  ;;  %v904_v36 = vld [vmem:[%s3866_s30 + $0x1298] sm:$0xff] }
 0x163   : > { %2237 = vmatpush.msrb.mxu1 %v773_v40  ;;  %2277 = vmatpush.msrb.mxu3 %v805_v41  ;;  %v870_v40 = vld [vmem:[%s3866_s30 + $0x1188] sm:$0xff]  ;;  %v1522_v41 = vld.sshfl [vmem:[#allocation1] sm:$0xff pattern:$0x73625140] }
 0x164   : > { %2238 = vmatmul.f32.vlgmr.msrb.gmra.mxu1 %v1517_v42  ;;  %2278 = vmatmul.f32.vlgmr.msrb.gmra.mxu3 %v1519_v43  ;;  %v1524_v42 = vld.sshfl [vmem:[#allocation1 + $0x10] sm:$0xff pattern:$0x73625140]  ;;  %v900_v43 = vld [vmem:[%s3866_s30 + $0x1278] sm:$0xff] }
 0x165   : > { %2283 = vmatpush.msra.mxu0 %v835_v44  ;;  %2302 = vmatpush.msra.mxu1 %v852_v45  ;;  %v932_v44 = vld [vmem:[%s3866_s30 + $0x1378] sm:$0xff]  ;;  %v837_v45 = vld [vmem:[%s3866_s30 + $0x1080] sm:$0xff] }
 0x166   : > { %2323 = vmatpush.msra.mxu2 %v867_v46  ;;  %2342 = vmatpush.msra.mxu3 %v884_v47  ;;  %v869_v46 = vld [vmem:[%s3866_s30 + $0x1180] sm:$0xff] }
 0x167   : > { %2284 = vmatpush.msra.mxu0 %v834_v48  ;;  %2303 = vmatpush.msra.mxu1 %v851_v49  ;;  %v1523_v47 = vld.sshfl [vmem:[#allocation1 + $0x8] sm:$0xff pattern:$0x73625140]  ;;  %v1525_v48 = vld.sshfl [vmem:[#allocation1 + $0x18] sm:$0xff pattern:$0x73625140] }
 0x168   : > { %2324 = vmatpush.msra.mxu2 %v866_v50  ;;  %2343 = vmatpush.msra.mxu3 %v883_v51  ;;  %v899_v49 = vld [vmem:[%s3866_s30 + $0x1270] sm:$0xff]  ;;  %v916_v50 = vld [vmem:[%s3866_s30 + $0x12f8] sm:$0xff] }
 0x169   : > { %2285 = vmatpush.msra.mxu0 %v833_v52  ;;  %2304 = vmatpush.msra.mxu1 %v850_v53  ;;  %v931_v51 = vld [vmem:[%s3866_s30 + $0x1370] sm:$0xff]  ;;  %v948_v52 = vld [vmem:[%s3866_s30 + $0x13f8] sm:$0xff]  ;;  %v898_v53 = vld [vmem:[%s3866_s30 + $0x1268] sm:$0xff] }
 0x16a   : > { %2325 = vmatpush.msra.mxu2 %v865_v54  ;;  %2344 = vmatpush.msra.mxu3 %v882_v55  ;;  %v915_v54 = vld [vmem:[%s3866_s30 + $0x12f0] sm:$0xff]  ;;  %v930_v55 = vld [vmem:[%s3866_s30 + $0x1368] sm:$0xff] }
 0x16b   : > { %2286 = vmatpush.msra.mxu0 %v832_v56  ;;  %2305 = vmatpush.msra.mxu1 %v849_v57  ;;  %v947_v56 = vld [vmem:[%s3866_s30 + $0x13f0] sm:$0xff]  ;;  %v897_v57 = vld [vmem:[%s3866_s30 + $0x1260] sm:$0xff] }
 0x16c   : > { %2326 = vmatpush.msra.mxu2 %v864_v58  ;;  %2345 = vmatpush.msra.mxu3 %v881_v59  ;;  %v914_v58 = vld [vmem:[%s3866_s30 + $0x12e8] sm:$0xff]  ;;  %v929_v59 = vld [vmem:[%s3866_s30 + $0x1360] sm:$0xff] }
 0x16d   : > { %2287 = vmatpush.msra.mxu0 %v831_v60  ;;  %2306 = vmatpush.msra.mxu1 %v848_v61  ;;  %v946_v60 = vld [vmem:[%s3866_s30 + $0x13e8] sm:$0xff]  ;;  %v896_v61 = vld [vmem:[%s3866_s30 + $0x1258] sm:$0xff] }
 0x16e   : > { %2327 = vmatpush.msra.mxu2 %v863_v62  ;;  %2346 = vmatpush.msra.mxu3 %v880_v63  ;;  %v913_v62 = vld [vmem:[%s3866_s30 + $0x12e0] sm:$0xff]  ;;  %v928_v63 = vld [vmem:[%s3866_s30 + $0x1358] sm:$0xff] }
 0x16f   : > { %2288 = vmatpush.msra.mxu0 %v830_v0  ;;  %2307 = vmatpush.msra.mxu1 %v847_v1  ;;  %v945_v0 = vld [vmem:[%s3866_s30 + $0x13e0] sm:$0xff]  ;;  %v895_v1 = vld [vmem:[%s3866_s30 + $0x1250] sm:$0xff] }
 0x170   : > { %2328 = vmatpush.msra.mxu2 %v862_v2  ;;  %2347 = vmatpush.msra.mxu3 %v879_v3  ;;  %v912_v2 = vld [vmem:[%s3866_s30 + $0x12d8] sm:$0xff]  ;;  %v927_v3 = vld [vmem:[%s3866_s30 + $0x1350] sm:$0xff] }
 0x171   : > { %2289 = vmatpush.msra.mxu0 %v829_v4  ;;  %2308 = vmatpush.msra.mxu1 %v846_v5  ;;  %v944_v4 = vld [vmem:[%s3866_s30 + $0x13d8] sm:$0xff]  ;;  %v894_v5 = vld [vmem:[%s3866_s30 + $0x1248] sm:$0xff] }
 0x172   : > { %2329 = vmatpush.msra.mxu2 %v861_v6  ;;  %2348 = vmatpush.msra.mxu3 %v878_v7  ;;  %v911_v6 = vld [vmem:[%s3866_s30 + $0x12d0] sm:$0xff]  ;;  %v926_v7 = vld [vmem:[%s3866_s30 + $0x1348] sm:$0xff] }
 0x173   : > { %2290 = vmatpush.msra.mxu0 %v828_v8  ;;  %2309 = vmatpush.msra.mxu1 %v845_v9  ;;  %v943_v8 = vld [vmem:[%s3866_s30 + $0x13d0] sm:$0xff]  ;;  %v893_v9 = vld [vmem:[%s3866_s30 + $0x1240] sm:$0xff] }
 0x174   : > { %2330 = vmatpush.msra.mxu2 %v860_v10  ;;  %2349 = vmatpush.msra.mxu3 %v877_v11  ;;  %v910_v10 = vld [vmem:[%s3866_s30 + $0x12c8] sm:$0xff]  ;;  %v925_v11 = vld [vmem:[%s3866_s30 + $0x1340] sm:$0xff] }
 0x175   : > { %2291 = vmatpush.msra.mxu0 %v827_v12  ;;  %2310 = vmatpush.msra.mxu1 %v844_v13  ;;  %v942_v12 = vld [vmem:[%s3866_s30 + $0x13c8] sm:$0xff]  ;;  %v892_v13 = vld [vmem:[%s3866_s30 + $0x1238] sm:$0xff] }
 0x176   : > { %2331 = vmatpush.msra.mxu2 %v859_v14  ;;  %2350 = vmatpush.msra.mxu3 %v876_v15  ;;  %v909_v14 = vld [vmem:[%s3866_s30 + $0x12c0] sm:$0xff]  ;;  %v924_v15 = vld [vmem:[%s3866_s30 + $0x1338] sm:$0xff] }
 0x177   : > { %2292 = vmatpush.msra.mxu0 %v826_v16  ;;  %2311 = vmatpush.msra.mxu1 %v843_v17  ;;  %v941_v16 = vld [vmem:[%s3866_s30 + $0x13c0] sm:$0xff]  ;;  %v891_v17 = vld [vmem:[%s3866_s30 + $0x1230] sm:$0xff] }
 0x178   : > { %2332 = vmatpush.msra.mxu2 %v858_v18  ;;  %2351 = vmatpush.msra.mxu3 %v875_v19  ;;  %v908_v18 = vld [vmem:[%s3866_s30 + $0x12b8] sm:$0xff]  ;;  %v923_v19 = vld [vmem:[%s3866_s30 + $0x1330] sm:$0xff] }
 0x179   : > { %2293 = vmatpush.msra.mxu0 %v825_v20  ;;  %2312 = vmatpush.msra.mxu1 %v842_v21  ;;  %v940_v20 = vld [vmem:[%s3866_s30 + $0x13b8] sm:$0xff]  ;;  %v890_v21 = vld [vmem:[%s3866_s30 + $0x1228] sm:$0xff] }
 0x17a   : > { %2333 = vmatpush.msra.mxu2 %v857_v22  ;;  %2352 = vmatpush.msra.mxu3 %v874_v23  ;;  %v907_v22 = vld [vmem:[%s3866_s30 + $0x12b0] sm:$0xff]  ;;  %v922_v23 = vld [vmem:[%s3866_s30 + $0x1328] sm:$0xff] }
 0x17b   : > { %2294 = vmatpush.msra.mxu0 %v824_v24  ;;  %2313 = vmatpush.msra.mxu1 %v841_v25  ;;  %v939_v24 = vld [vmem:[%s3866_s30 + $0x13b0] sm:$0xff]  ;;  %v889_v25 = vld [vmem:[%s3866_s30 + $0x1220] sm:$0xff] }
 0x17c   : > { %2334 = vmatpush.msra.mxu2 %v856_v29  ;;  %2353 = vmatpush.msra.mxu3 %v873_v26  ;;  %v906_v29 = vld [vmem:[%s3866_s30 + $0x12a8] sm:$0xff]  ;;  %v921_v26 = vld [vmem:[%s3866_s30 + $0x1320] sm:$0xff] }
 0x17d   : > { %2295 = vmatpush.msra.mxu0 %v823_v27  ;;  %2314 = vmatpush.msra.mxu1 %v840_v30  ;;  %v938_v27 = vld [vmem:[%s3866_s30 + $0x13a8] sm:$0xff]  ;;  %v888_v30 = vld [vmem:[%s3866_s30 + $0x1218] sm:$0xff] }
 0x17e   : > { %2335 = vmatpush.msra.mxu2 %v855_v32  ;;  %2354 = vmatpush.msra.mxu3 %v872_v28  ;;  %v905_v32 = vld [vmem:[%s3866_s30 + $0x12a0] sm:$0xff]  ;;  %v920_v28 = vld [vmem:[%s3866_s30 + $0x1318] sm:$0xff] }
 0x17f   : > { %2296 = vmatpush.msra.mxu0 %v822_v34  ;;  %2315 = vmatpush.msra.mxu1 %v839_v35  ;;  %v937_v34 = vld [vmem:[%s3866_s30 + $0x13a0] sm:$0xff]  ;;  %v887_v35 = vld [vmem:[%s3866_s30 + $0x1210] sm:$0xff] }
 0x180   : > { %2336 = vmatpush.msra.mxu2 %v854_v33  ;;  %2355 = vmatpush.msra.mxu3 %v871_v31  ;;  %v919_v33 = vld [vmem:[%s3866_s30 + $0x1310] sm:$0xff]  ;;  %v936_v31 = vld [vmem:[%s3866_s30 + $0x1398] sm:$0xff] }
 0x181   : > { %2297 = vmatpush.msra.mxu0 %v821_v37  ;;  %2316 = vmatpush.msra.mxu1 %v838_v38  ;;  %v886_v37 = vld [vmem:[%s3866_s30 + $0x1208] sm:$0xff]  ;;  %v903_v38 = vld [vmem:[%s3866_s30 + $0x1290] sm:$0xff] }
 0x182   : > { %2337 = vmatpush.msra.mxu2 %v853_v39  ;;  %2356 = vmatpush.msra.mxu3 %v870_v40  ;;  %v301_v39 = vld [vmem:[%s3858_s29 + $0x50] sm:$0xff]  ;;  %v918_v40 = vld [vmem:[%s3866_s30 + $0x1308] sm:$0xff] }
 0x183   : > { %2298 = vmatmul.f32.vlgmr.msra.gmra.mxu0 %v1522_v41  ;;  %2338 = vmatmul.f32.vlgmr.msra.gmra.mxu2 %v1524_v42  ;;  %v935_v41 = vld [vmem:[%s3866_s30 + $0x1390] sm:$0xff]  ;;  %1530 = vst [vmem:[#allocation1] ss:$4 sm:$0xff] %v301_v39  ;;  %v885_v42 = vld [vmem:[%s3866_s30 + $0x1200] sm:$0xff]  ;;  %v968_v39 = vld [vmem:[%s3866_s30 + $0x1498] sm:$0xff] }
 0x184   : > { %2362 = vmatpush.msrb.mxu0 %v900_v43  ;;  %2402 = vmatpush.msrb.mxu2 %v932_v44  ;;  %v902_v43 = vld [vmem:[%s3866_s30 + $0x1288] sm:$0xff]  ;;  %v917_v44 = vld [vmem:[%s3866_s30 + $0x1300] sm:$0xff] }
 0x185   : > { %2317 = vmatpush.msra.mxu1 %v837_v45  ;;  %2357 = vmatpush.msra.mxu3 %v869_v46  ;;  %v934_v45 = vld [vmem:[%s3866_s30 + $0x1388] sm:$0xff]  ;;  %v1526_v46 = vld.sshfl [vmem:[#allocation1 + $0x20] sm:$0xff pattern:$0x73625140] }
 0x186   : > { %2318 = vmatmul.f32.vlgmr.msra.gmra.mxu1 %v1523_v47  ;;  %2358 = vmatmul.f32.vlgmr.msra.gmra.mxu3 %v1525_v48  ;;  %v1528_v47 = vld.sshfl [vmem:[#allocation1 + $0x30] sm:$0xff pattern:$0x73625140]  ;;  %v964_v48 = vld [vmem:[%s3866_s30 + $0x1478] sm:$0xff] }
 0x187   : > { %2363 = vmatpush.msrb.mxu0 %v899_v49  ;;  %2382 = vmatpush.msrb.mxu1 %v916_v50  ;;  %v996_v49 = vld [vmem:[%s3866_s30 + $0x1578] sm:$0xff]  ;;  %v901_v50 = vld [vmem:[%s3866_s30 + $0x1280] sm:$0xff] }
 0x188   : > { %2403 = vmatpush.msrb.mxu2 %v931_v51  ;;  %2422 = vmatpush.msrb.mxu3 %v948_v52  ;;  %v933_v51 = vld [vmem:[%s3866_s30 + $0x1380] sm:$0xff] }
 0x189   : > { %2364 = vmatpush.msrb.mxu0 %v898_v53  ;;  %2383 = vmatpush.msrb.mxu1 %v915_v54  ;;  %v1527_v52 = vld.sshfl [vmem:[#allocation1 + $0x28] sm:$0xff pattern:$0x73625140]  ;;  %v1529_v53 = vld.sshfl [vmem:[#allocation1 + $0x38] sm:$0xff pattern:$0x73625140] }
 0x18a   : > { %2404 = vmatpush.msrb.mxu2 %v930_v55  ;;  %2423 = vmatpush.msrb.mxu3 %v947_v56  ;;  %v963_v54 = vld [vmem:[%s3866_s30 + $0x1470] sm:$0xff]  ;;  %v980_v55 = vld [vmem:[%s3866_s30 + $0x14f8] sm:$0xff] }
 0x18b   : > { %2365 = vmatpush.msrb.mxu0 %v897_v57  ;;  %2384 = vmatpush.msrb.mxu1 %v914_v58  ;;  %v995_v56 = vld [vmem:[%s3866_s30 + $0x1570] sm:$0xff]  ;;  %v1012_v57 = vld [vmem:[%s3866_s30 + $0x15f8] sm:$0xff]  ;;  %v962_v58 = vld [vmem:[%s3866_s30 + $0x1468] sm:$0xff] }
 0x18c   : > { %2405 = vmatpush.msrb.mxu2 %v929_v59  ;;  %2424 = vmatpush.msrb.mxu3 %v946_v60  ;;  %v979_v59 = vld [vmem:[%s3866_s30 + $0x14f0] sm:$0xff]  ;;  %v994_v60 = vld [vmem:[%s3866_s30 + $0x1568] sm:$0xff] }
 0x18d   : > { %2366 = vmatpush.msrb.mxu0 %v896_v61  ;;  %2385 = vmatpush.msrb.mxu1 %v913_v62  ;;  %v1011_v61 = vld [vmem:[%s3866_s30 + $0x15f0] sm:$0xff]  ;;  %v961_v62 = vld [vmem:[%s3866_s30 + $0x1460] sm:$0xff] }
 0x18e   : > { %2406 = vmatpush.msrb.mxu2 %v928_v63  ;;  %2425 = vmatpush.msrb.mxu3 %v945_v0  ;;  %v978_v63 = vld [vmem:[%s3866_s30 + $0x14e8] sm:$0xff]  ;;  %v993_v0 = vld [vmem:[%s3866_s30 + $0x1560] sm:$0xff] }
 0x18f   : > { %2367 = vmatpush.msrb.mxu0 %v895_v1  ;;  %2386 = vmatpush.msrb.mxu1 %v912_v2  ;;  %v1010_v1 = vld [vmem:[%s3866_s30 + $0x15e8] sm:$0xff]  ;;  %v960_v2 = vld [vmem:[%s3866_s30 + $0x1458] sm:$0xff] }
 0x190   : > { %2407 = vmatpush.msrb.mxu2 %v927_v3  ;;  %2426 = vmatpush.msrb.mxu3 %v944_v4  ;;  %v977_v3 = vld [vmem:[%s3866_s30 + $0x14e0] sm:$0xff]  ;;  %v992_v4 = vld [vmem:[%s3866_s30 + $0x1558] sm:$0xff] }
 0x191   : > { %2368 = vmatpush.msrb.mxu0 %v894_v5  ;;  %2387 = vmatpush.msrb.mxu1 %v911_v6  ;;  %v1009_v5 = vld [vmem:[%s3866_s30 + $0x15e0] sm:$0xff]  ;;  %v959_v6 = vld [vmem:[%s3866_s30 + $0x1450] sm:$0xff] }
 0x192   : > { %2408 = vmatpush.msrb.mxu2 %v926_v7  ;;  %2427 = vmatpush.msrb.mxu3 %v943_v8  ;;  %v976_v7 = vld [vmem:[%s3866_s30 + $0x14d8] sm:$0xff]  ;;  %v991_v8 = vld [vmem:[%s3866_s30 + $0x1550] sm:$0xff] }
 0x193   : > { %2369 = vmatpush.msrb.mxu0 %v893_v9  ;;  %2388 = vmatpush.msrb.mxu1 %v910_v10  ;;  %v1008_v9 = vld [vmem:[%s3866_s30 + $0x15d8] sm:$0xff]  ;;  %v958_v10 = vld [vmem:[%s3866_s30 + $0x1448] sm:$0xff] }
 0x194   : > { %2409 = vmatpush.msrb.mxu2 %v925_v11  ;;  %2428 = vmatpush.msrb.mxu3 %v942_v12  ;;  %v975_v11 = vld [vmem:[%s3866_s30 + $0x14d0] sm:$0xff]  ;;  %v990_v12 = vld [vmem:[%s3866_s30 + $0x1548] sm:$0xff] }
 0x195   : > { %2370 = vmatpush.msrb.mxu0 %v892_v13  ;;  %2389 = vmatpush.msrb.mxu1 %v909_v14  ;;  %v1007_v13 = vld [vmem:[%s3866_s30 + $0x15d0] sm:$0xff]  ;;  %v957_v14 = vld [vmem:[%s3866_s30 + $0x1440] sm:$0xff] }
 0x196   : > { %2410 = vmatpush.msrb.mxu2 %v924_v15  ;;  %2429 = vmatpush.msrb.mxu3 %v941_v16  ;;  %v974_v15 = vld [vmem:[%s3866_s30 + $0x14c8] sm:$0xff]  ;;  %v989_v16 = vld [vmem:[%s3866_s30 + $0x1540] sm:$0xff] }
 0x197   : > { %2371 = vmatpush.msrb.mxu0 %v891_v17  ;;  %2390 = vmatpush.msrb.mxu1 %v908_v18  ;;  %v1006_v17 = vld [vmem:[%s3866_s30 + $0x15c8] sm:$0xff]  ;;  %v956_v18 = vld [vmem:[%s3866_s30 + $0x1438] sm:$0xff] }
 0x198   : > { %2411 = vmatpush.msrb.mxu2 %v923_v19  ;;  %2430 = vmatpush.msrb.mxu3 %v940_v20  ;;  %v973_v19 = vld [vmem:[%s3866_s30 + $0x14c0] sm:$0xff]  ;;  %v988_v20 = vld [vmem:[%s3866_s30 + $0x1538] sm:$0xff] }
 0x199   : > { %2372 = vmatpush.msrb.mxu0 %v890_v21  ;;  %2391 = vmatpush.msrb.mxu1 %v907_v22  ;;  %v1005_v21 = vld [vmem:[%s3866_s30 + $0x15c0] sm:$0xff]  ;;  %v955_v22 = vld [vmem:[%s3866_s30 + $0x1430] sm:$0xff] }
 0x19a   : > { %2412 = vmatpush.msrb.mxu2 %v922_v23  ;;  %2431 = vmatpush.msrb.mxu3 %v939_v24  ;;  %v972_v23 = vld [vmem:[%s3866_s30 + $0x14b8] sm:$0xff]  ;;  %v987_v24 = vld [vmem:[%s3866_s30 + $0x1530] sm:$0xff] }
 0x19b   : > { %2373 = vmatpush.msrb.mxu0 %v889_v25  ;;  %2392 = vmatpush.msrb.mxu1 %v906_v29  ;;  %v1004_v25 = vld [vmem:[%s3866_s30 + $0x15b8] sm:$0xff]  ;;  %v954_v29 = vld [vmem:[%s3866_s30 + $0x1428] sm:$0xff] }
 0x19c   : > { %2413 = vmatpush.msrb.mxu2 %v921_v26  ;;  %2432 = vmatpush.msrb.mxu3 %v938_v27  ;;  %v971_v26 = vld [vmem:[%s3866_s30 + $0x14b0] sm:$0xff]  ;;  %v986_v27 = vld [vmem:[%s3866_s30 + $0x1528] sm:$0xff] }
 0x19d   : > { %2374 = vmatpush.msrb.mxu0 %v888_v30  ;;  %2393 = vmatpush.msrb.mxu1 %v905_v32  ;;  %v1003_v30 = vld [vmem:[%s3866_s30 + $0x15b0] sm:$0xff]  ;;  %v953_v32 = vld [vmem:[%s3866_s30 + $0x1420] sm:$0xff] }
 0x19e   : > { %2414 = vmatpush.msrb.mxu2 %v920_v28  ;;  %2433 = vmatpush.msrb.mxu3 %v937_v34  ;;  %v970_v28 = vld [vmem:[%s3866_s30 + $0x14a8] sm:$0xff]  ;;  %v985_v34 = vld [vmem:[%s3866_s30 + $0x1520] sm:$0xff] }
 0x19f   : > { %2375 = vmatpush.msrb.mxu0 %v887_v35  ;;  %2394 = vmatpush.msrb.mxu1 %v904_v36  ;;  %v1002_v35 = vld [vmem:[%s3866_s30 + $0x15a8] sm:$0xff]  ;;  %v952_v36 = vld [vmem:[%s3866_s30 + $0x1418] sm:$0xff] }
 0x1a0   : > { %2415 = vmatpush.msrb.mxu2 %v919_v33  ;;  %2434 = vmatpush.msrb.mxu3 %v936_v31  ;;  %v969_v33 = vld [vmem:[%s3866_s30 + $0x14a0] sm:$0xff]  ;;  %v984_v31 = vld [vmem:[%s3866_s30 + $0x1518] sm:$0xff] }
 0x1a1   : > { %2376 = vmatpush.msrb.mxu0 %v886_v37  ;;  %2395 = vmatpush.msrb.mxu1 %v903_v38  ;;  %v1001_v37 = vld [vmem:[%s3866_s30 + $0x15a0] sm:$0xff]  ;;  %v951_v38 = vld [vmem:[%s3866_s30 + $0x1410] sm:$0xff] }
 0x1a2   : > { %2416 = vmatpush.msrb.mxu2 %v918_v40  ;;  %2435 = vmatpush.msrb.mxu3 %v935_v41  ;;  %v983_v40 = vld [vmem:[%s3866_s30 + $0x1510] sm:$0xff]  ;;  %v1000_v41 = vld [vmem:[%s3866_s30 + $0x1598] sm:$0xff] }
 0x1a3   : > { %2377 = vmatpush.msrb.mxu0 %v885_v42  ;;  %2396 = vmatpush.msrb.mxu1 %v902_v43  ;;  %v950_v42 = vld [vmem:[%s3866_s30 + $0x1408] sm:$0xff]  ;;  %v967_v43 = vld [vmem:[%s3866_s30 + $0x1490] sm:$0xff] }
 0x1a4   : > { %2417 = vmatpush.msrb.mxu2 %v917_v44  ;;  %2436 = vmatpush.msrb.mxu3 %v934_v45  ;;  %v302_v44 = vld [vmem:[%s3858_s29 + $0x58] sm:$0xff] }
 0x1a5   : > { %2378 = vmatmul.f32.vlgmr.msrb.gmra.mxu0 %v1526_v46  ;;  %2418 = vmatmul.f32.vlgmr.msrb.gmra.mxu2 %v1528_v47  ;;  %v982_v45 = vld [vmem:[%s3866_s30 + $0x1508] sm:$0xff]  ;;  %v999_v46 = vld [vmem:[%s3866_s30 + $0x1590] sm:$0xff]  ;;  %1531 = vst [vmem:[#allocation1 + $0x20] ss:$4 sm:$0xff] %v302_v44  ;;  %v949_v47 = vld [vmem:[%s3866_s30 + $0x1400] sm:$0xff] }
 0x1a6   : > { %2442 = vmatpush.msra.mxu0 %v964_v48  ;;  %2482 = vmatpush.msra.mxu2 %v996_v49  ;;  %v966_v48 = vld [vmem:[%s3866_s30 + $0x1488] sm:$0xff]  ;;  %v981_v49 = vld [vmem:[%s3866_s30 + $0x1500] sm:$0xff]  ;;  %v1032_v44 = vld [vmem:[%s3866_s30 + $0x1698] sm:$0xff] }
 0x1a7   : > { %2397 = vmatpush.msrb.mxu1 %v901_v50  ;;  %2437 = vmatpush.msrb.mxu3 %v933_v51  ;;  %v998_v50 = vld [vmem:[%s3866_s30 + $0x1588] sm:$0xff]  ;;  %v1532_v51 = vld.sshfl [vmem:[#allocation1] sm:$0xff pattern:$0x73625140] }
 0x1a8   : > { %2398 = vmatmul.f32.vlgmr.msrb.gmra.mxu1 %v1527_v52  ;;  %2438 = vmatmul.f32.vlgmr.msrb.gmra.mxu3 %v1529_v53  ;;  %v1534_v52 = vld.sshfl [vmem:[#allocation1 + $0x10] sm:$0xff pattern:$0x73625140]  ;;  %v1028_v53 = vld [vmem:[%s3866_s30 + $0x1678] sm:$0xff] }
 0x1a9   : > { %2443 = vmatpush.msra.mxu0 %v963_v54  ;;  %2462 = vmatpush.msra.mxu1 %v980_v55  ;;  %v1060_v54 = vld [vmem:[%s3866_s30 + $0x1778] sm:$0xff]  ;;  %v965_v55 = vld [vmem:[%s3866_s30 + $0x1480] sm:$0xff] }
 0x1aa   : > { %2483 = vmatpush.msra.mxu2 %v995_v56  ;;  %2502 = vmatpush.msra.mxu3 %v1012_v57  ;;  %v997_v56 = vld [vmem:[%s3866_s30 + $0x1580] sm:$0xff] }
 0x1ab   : > { %2444 = vmatpush.msra.mxu0 %v962_v58  ;;  %2463 = vmatpush.msra.mxu1 %v979_v59  ;;  %v1533_v57 = vld.sshfl [vmem:[#allocation1 + $0x8] sm:$0xff pattern:$0x73625140]  ;;  %v1535_v58 = vld.sshfl [vmem:[#allocation1 + $0x18] sm:$0xff pattern:$0x73625140] }
 0x1ac   : > { %2484 = vmatpush.msra.mxu2 %v994_v60  ;;  %2503 = vmatpush.msra.mxu3 %v1011_v61  ;;  %v1027_v59 = vld [vmem:[%s3866_s30 + $0x1670] sm:$0xff]  ;;  %v1044_v60 = vld [vmem:[%s3866_s30 + $0x16f8] sm:$0xff] }
 0x1ad   : > { %2445 = vmatpush.msra.mxu0 %v961_v62  ;;  %2464 = vmatpush.msra.mxu1 %v978_v63  ;;  %v1059_v61 = vld [vmem:[%s3866_s30 + $0x1770] sm:$0xff]  ;;  %v1076_v62 = vld [vmem:[%s3866_s30 + $0x17f8] sm:$0xff]  ;;  %v1026_v63 = vld [vmem:[%s3866_s30 + $0x1668] sm:$0xff] }
 0x1ae   : > { %2485 = vmatpush.msra.mxu2 %v993_v0  ;;  %2504 = vmatpush.msra.mxu3 %v1010_v1  ;;  %v1043_v0 = vld [vmem:[%s3866_s30 + $0x16f0] sm:$0xff]  ;;  %v1058_v1 = vld [vmem:[%s3866_s30 + $0x1768] sm:$0xff] }
 0x1af   : > { %2446 = vmatpush.msra.mxu0 %v960_v2  ;;  %2465 = vmatpush.msra.mxu1 %v977_v3  ;;  %v1075_v2 = vld [vmem:[%s3866_s30 + $0x17f0] sm:$0xff]  ;;  %v1025_v3 = vld [vmem:[%s3866_s30 + $0x1660] sm:$0xff] }
 0x1b0   : > { %2486 = vmatpush.msra.mxu2 %v992_v4  ;;  %2505 = vmatpush.msra.mxu3 %v1009_v5  ;;  %v1042_v4 = vld [vmem:[%s3866_s30 + $0x16e8] sm:$0xff]  ;;  %v1057_v5 = vld [vmem:[%s3866_s30 + $0x1760] sm:$0xff] }
 0x1b1   : > { %2447 = vmatpush.msra.mxu0 %v959_v6  ;;  %2466 = vmatpush.msra.mxu1 %v976_v7  ;;  %v1074_v6 = vld [vmem:[%s3866_s30 + $0x17e8] sm:$0xff]  ;;  %v1024_v7 = vld [vmem:[%s3866_s30 + $0x1658] sm:$0xff] }
 0x1b2   : > { %2487 = vmatpush.msra.mxu2 %v991_v8  ;;  %2506 = vmatpush.msra.mxu3 %v1008_v9  ;;  %v1041_v8 = vld [vmem:[%s3866_s30 + $0x16e0] sm:$0xff]  ;;  %v1056_v9 = vld [vmem:[%s3866_s30 + $0x1758] sm:$0xff] }
 0x1b3   : > { %2448 = vmatpush.msra.mxu0 %v958_v10  ;;  %2467 = vmatpush.msra.mxu1 %v975_v11  ;;  %v1073_v10 = vld [vmem:[%s3866_s30 + $0x17e0] sm:$0xff]  ;;  %v1023_v11 = vld [vmem:[%s3866_s30 + $0x1650] sm:$0xff] }
 0x1b4   : > { %2488 = vmatpush.msra.mxu2 %v990_v12  ;;  %2507 = vmatpush.msra.mxu3 %v1007_v13  ;;  %v1040_v12 = vld [vmem:[%s3866_s30 + $0x16d8] sm:$0xff]  ;;  %v1055_v13 = vld [vmem:[%s3866_s30 + $0x1750] sm:$0xff] }
 0x1b5   : > { %2449 = vmatpush.msra.mxu0 %v957_v14  ;;  %2468 = vmatpush.msra.mxu1 %v974_v15  ;;  %v1072_v14 = vld [vmem:[%s3866_s30 + $0x17d8] sm:$0xff]  ;;  %v1022_v15 = vld [vmem:[%s3866_s30 + $0x1648] sm:$0xff] }
 0x1b6   : > { %2489 = vmatpush.msra.mxu2 %v989_v16  ;;  %2508 = vmatpush.msra.mxu3 %v1006_v17  ;;  %v1039_v16 = vld [vmem:[%s3866_s30 + $0x16d0] sm:$0xff]  ;;  %v1054_v17 = vld [vmem:[%s3866_s30 + $0x1748] sm:$0xff] }
 0x1b7   : > { %2450 = vmatpush.msra.mxu0 %v956_v18  ;;  %2469 = vmatpush.msra.mxu1 %v973_v19  ;;  %v1071_v18 = vld [vmem:[%s3866_s30 + $0x17d0] sm:$0xff]  ;;  %v1021_v19 = vld [vmem:[%s3866_s30 + $0x1640] sm:$0xff] }
 0x1b8   : > { %2490 = vmatpush.msra.mxu2 %v988_v20  ;;  %2509 = vmatpush.msra.mxu3 %v1005_v21  ;;  %v1038_v20 = vld [vmem:[%s3866_s30 + $0x16c8] sm:$0xff]  ;;  %v1053_v21 = vld [vmem:[%s3866_s30 + $0x1740] sm:$0xff] }
 0x1b9   : > { %2451 = vmatpush.msra.mxu0 %v955_v22  ;;  %2470 = vmatpush.msra.mxu1 %v972_v23  ;;  %v1070_v22 = vld [vmem:[%s3866_s30 + $0x17c8] sm:$0xff]  ;;  %v1020_v23 = vld [vmem:[%s3866_s30 + $0x1638] sm:$0xff] }
 0x1ba   : > { %2491 = vmatpush.msra.mxu2 %v987_v24  ;;  %2510 = vmatpush.msra.mxu3 %v1004_v25  ;;  %v1037_v24 = vld [vmem:[%s3866_s30 + $0x16c0] sm:$0xff]  ;;  %v1052_v25 = vld [vmem:[%s3866_s30 + $0x1738] sm:$0xff] }
 0x1bb   : > { %2452 = vmatpush.msra.mxu0 %v954_v29  ;;  %2471 = vmatpush.msra.mxu1 %v971_v26  ;;  %v1069_v29 = vld [vmem:[%s3866_s30 + $0x17c0] sm:$0xff]  ;;  %v1019_v26 = vld [vmem:[%s3866_s30 + $0x1630] sm:$0xff] }
 0x1bc   : > { %2492 = vmatpush.msra.mxu2 %v986_v27  ;;  %2511 = vmatpush.msra.mxu3 %v1003_v30  ;;  %v1036_v27 = vld [vmem:[%s3866_s30 + $0x16b8] sm:$0xff]  ;;  %v1051_v30 = vld [vmem:[%s3866_s30 + $0x1730] sm:$0xff] }
 0x1bd   : > { %2453 = vmatpush.msra.mxu0 %v953_v32  ;;  %2472 = vmatpush.msra.mxu1 %v970_v28  ;;  %v1068_v32 = vld [vmem:[%s3866_s30 + $0x17b8] sm:$0xff]  ;;  %v1018_v28 = vld [vmem:[%s3866_s30 + $0x1628] sm:$0xff] }
 0x1be   : > { %2493 = vmatpush.msra.mxu2 %v985_v34  ;;  %2512 = vmatpush.msra.mxu3 %v1002_v35  ;;  %v1035_v34 = vld [vmem:[%s3866_s30 + $0x16b0] sm:$0xff]  ;;  %v1050_v35 = vld [vmem:[%s3866_s30 + $0x1728] sm:$0xff] }
 0x1bf   : > { %2454 = vmatpush.msra.mxu0 %v952_v36  ;;  %2473 = vmatpush.msra.mxu1 %v969_v33  ;;  %v1067_v36 = vld [vmem:[%s3866_s30 + $0x17b0] sm:$0xff]  ;;  %v1017_v33 = vld [vmem:[%s3866_s30 + $0x1620] sm:$0xff] }
 0x1c0   : > { %2494 = vmatpush.msra.mxu2 %v984_v31  ;;  %2513 = vmatpush.msra.mxu3 %v1001_v37  ;;  %v1034_v31 = vld [vmem:[%s3866_s30 + $0x16a8] sm:$0xff]  ;;  %v1049_v37 = vld [vmem:[%s3866_s30 + $0x1720] sm:$0xff] }
 0x1c1   : > { %2455 = vmatpush.msra.mxu0 %v951_v38  ;;  %2474 = vmatpush.msra.mxu1 %v968_v39  ;;  %v1066_v38 = vld [vmem:[%s3866_s30 + $0x17a8] sm:$0xff]  ;;  %v1016_v39 = vld [vmem:[%s3866_s30 + $0x1618] sm:$0xff] }
 0x1c2   : > { %2495 = vmatpush.msra.mxu2 %v983_v40  ;;  %2514 = vmatpush.msra.mxu3 %v1000_v41  ;;  %v1033_v40 = vld [vmem:[%s3866_s30 + $0x16a0] sm:$0xff]  ;;  %v1048_v41 = vld [vmem:[%s3866_s30 + $0x1718] sm:$0xff] }
 0x1c3   : > { %2456 = vmatpush.msra.mxu0 %v950_v42  ;;  %2475 = vmatpush.msra.mxu1 %v967_v43  ;;  %v1065_v42 = vld [vmem:[%s3866_s30 + $0x17a0] sm:$0xff]  ;;  %v1015_v43 = vld [vmem:[%s3866_s30 + $0x1610] sm:$0xff] }
 0x1c4   : > { %2496 = vmatpush.msra.mxu2 %v982_v45  ;;  %2515 = vmatpush.msra.mxu3 %v999_v46  ;;  %v1047_v45 = vld [vmem:[%s3866_s30 + $0x1710] sm:$0xff]  ;;  %v1064_v46 = vld [vmem:[%s3866_s30 + $0x1798] sm:$0xff] }
 0x1c5   : > { %2457 = vmatpush.msra.mxu0 %v949_v47  ;;  %2476 = vmatpush.msra.mxu1 %v966_v48  ;;  %v1014_v47 = vld [vmem:[%s3866_s30 + $0x1608] sm:$0xff]  ;;  %v1031_v48 = vld [vmem:[%s3866_s30 + $0x1690] sm:$0xff] }
 0x1c6   : > { %2497 = vmatpush.msra.mxu2 %v981_v49  ;;  %2516 = vmatpush.msra.mxu3 %v998_v50  ;;  %v303_v49 = vld [vmem:[%s3858_s29 + $0x60] sm:$0xff]  ;;  %v1046_v50 = vld [vmem:[%s3866_s30 + $0x1708] sm:$0xff] }
 0x1c7   : > { %2458 = vmatmul.f32.vlgmr.msra.gmra.mxu0 %v1532_v51  ;;  %2498 = vmatmul.f32.vlgmr.msra.gmra.mxu2 %v1534_v52  ;;  %v1063_v51 = vld [vmem:[%s3866_s30 + $0x1790] sm:$0xff]  ;;  %1540 = vst [vmem:[#allocation1] ss:$4 sm:$0xff] %v303_v49  ;;  %v1013_v52 = vld [vmem:[%s3866_s30 + $0x1600] sm:$0xff]  ;;  %v1096_v49 = vld [vmem:[%s3866_s30 + $0x1898] sm:$0xff] }
 0x1c8   : > { %2522 = vmatpush.msrb.mxu0 %v1028_v53  ;;  %2562 = vmatpush.msrb.mxu2 %v1060_v54  ;;  %v1030_v53 = vld [vmem:[%s3866_s30 + $0x1688] sm:$0xff]  ;;  %v1045_v54 = vld [vmem:[%s3866_s30 + $0x1700] sm:$0xff] }
 0x1c9   : > { %2477 = vmatpush.msra.mxu1 %v965_v55  ;;  %2517 = vmatpush.msra.mxu3 %v997_v56  ;;  %v1062_v55 = vld [vmem:[%s3866_s30 + $0x1788] sm:$0xff]  ;;  %v1536_v56 = vld.sshfl [vmem:[#allocation1 + $0x20] sm:$0xff pattern:$0x73625140] }
 0x1ca   : > { %2478 = vmatmul.f32.vlgmr.msra.gmra.mxu1 %v1533_v57  ;;  %2518 = vmatmul.f32.vlgmr.msra.gmra.mxu3 %v1535_v58  ;;  %v1538_v57 = vld.sshfl [vmem:[#allocation1 + $0x30] sm:$0xff pattern:$0x73625140]  ;;  %v1092_v58 = vld [vmem:[%s3866_s30 + $0x1878] sm:$0xff] }
 0x1cb   : > { %2523 = vmatpush.msrb.mxu0 %v1027_v59  ;;  %2542 = vmatpush.msrb.mxu1 %v1044_v60  ;;  %v1124_v59 = vld [vmem:[%s3866_s30 + $0x1978] sm:$0xff]  ;;  %v1029_v60 = vld [vmem:[%s3866_s30 + $0x1680] sm:$0xff] }
 0x1cc   : > { %2563 = vmatpush.msrb.mxu2 %v1059_v61  ;;  %2582 = vmatpush.msrb.mxu3 %v1076_v62  ;;  %v1061_v61 = vld [vmem:[%s3866_s30 + $0x1780] sm:$0xff] }
 0x1cd   : > { %2524 = vmatpush.msrb.mxu0 %v1026_v63  ;;  %2543 = vmatpush.msrb.mxu1 %v1043_v0  ;;  %v1537_v62 = vld.sshfl [vmem:[#allocation1 + $0x28] sm:$0xff pattern:$0x73625140]  ;;  %v1539_v63 = vld.sshfl [vmem:[#allocation1 + $0x38] sm:$0xff pattern:$0x73625140] }
 0x1ce   : > { %2564 = vmatpush.msrb.mxu2 %v1058_v1  ;;  %2583 = vmatpush.msrb.mxu3 %v1075_v2  ;;  %v1091_v0 = vld [vmem:[%s3866_s30 + $0x1870] sm:$0xff]  ;;  %v1108_v1 = vld [vmem:[%s3866_s30 + $0x18f8] sm:$0xff] }
 0x1cf   : > { %2525 = vmatpush.msrb.mxu0 %v1025_v3  ;;  %2544 = vmatpush.msrb.mxu1 %v1042_v4  ;;  %v1123_v2 = vld [vmem:[%s3866_s30 + $0x1970] sm:$0xff]  ;;  %v1140_v3 = vld [vmem:[%s3866_s30 + $0x19f8] sm:$0xff]  ;;  %v1090_v4 = vld [vmem:[%s3866_s30 + $0x1868] sm:$0xff] }
 0x1d0   : > { %2565 = vmatpush.msrb.mxu2 %v1057_v5  ;;  %2584 = vmatpush.msrb.mxu3 %v1074_v6  ;;  %v1107_v5 = vld [vmem:[%s3866_s30 + $0x18f0] sm:$0xff]  ;;  %v1122_v6 = vld [vmem:[%s3866_s30 + $0x1968] sm:$0xff] }
 0x1d1   : > { %2526 = vmatpush.msrb.mxu0 %v1024_v7  ;;  %2545 = vmatpush.msrb.mxu1 %v1041_v8  ;;  %v1139_v7 = vld [vmem:[%s3866_s30 + $0x19f0] sm:$0xff]  ;;  %v1089_v8 = vld [vmem:[%s3866_s30 + $0x1860] sm:$0xff] }
 0x1d2   : > { %2566 = vmatpush.msrb.mxu2 %v1056_v9  ;;  %2585 = vmatpush.msrb.mxu3 %v1073_v10  ;;  %v1106_v9 = vld [vmem:[%s3866_s30 + $0x18e8] sm:$0xff]  ;;  %v1121_v10 = vld [vmem:[%s3866_s30 + $0x1960] sm:$0xff] }
 0x1d3   : > { %2527 = vmatpush.msrb.mxu0 %v1023_v11  ;;  %2546 = vmatpush.msrb.mxu1 %v1040_v12  ;;  %v1138_v11 = vld [vmem:[%s3866_s30 + $0x19e8] sm:$0xff]  ;;  %v1088_v12 = vld [vmem:[%s3866_s30 + $0x1858] sm:$0xff] }
 0x1d4   : > { %2567 = vmatpush.msrb.mxu2 %v1055_v13  ;;  %2586 = vmatpush.msrb.mxu3 %v1072_v14  ;;  %v1105_v13 = vld [vmem:[%s3866_s30 + $0x18e0] sm:$0xff]  ;;  %v1120_v14 = vld [vmem:[%s3866_s30 + $0x1958] sm:$0xff] }
 0x1d5   : > { %2528 = vmatpush.msrb.mxu0 %v1022_v15  ;;  %2547 = vmatpush.msrb.mxu1 %v1039_v16  ;;  %v1137_v15 = vld [vmem:[%s3866_s30 + $0x19e0] sm:$0xff]  ;;  %v1087_v16 = vld [vmem:[%s3866_s30 + $0x1850] sm:$0xff] }
 0x1d6   : > { %2568 = vmatpush.msrb.mxu2 %v1054_v17  ;;  %2587 = vmatpush.msrb.mxu3 %v1071_v18  ;;  %v1104_v17 = vld [vmem:[%s3866_s30 + $0x18d8] sm:$0xff]  ;;  %v1119_v18 = vld [vmem:[%s3866_s30 + $0x1950] sm:$0xff] }
 0x1d7   : > { %2529 = vmatpush.msrb.mxu0 %v1021_v19  ;;  %2548 = vmatpush.msrb.mxu1 %v1038_v20  ;;  %v1136_v19 = vld [vmem:[%s3866_s30 + $0x19d8] sm:$0xff]  ;;  %v1086_v20 = vld [vmem:[%s3866_s30 + $0x1848] sm:$0xff] }
 0x1d8   : > { %2569 = vmatpush.msrb.mxu2 %v1053_v21  ;;  %2588 = vmatpush.msrb.mxu3 %v1070_v22  ;;  %v1103_v21 = vld [vmem:[%s3866_s30 + $0x18d0] sm:$0xff]  ;;  %v1118_v22 = vld [vmem:[%s3866_s30 + $0x1948] sm:$0xff] }
 0x1d9   : > { %2530 = vmatpush.msrb.mxu0 %v1020_v23  ;;  %2549 = vmatpush.msrb.mxu1 %v1037_v24  ;;  %v1135_v23 = vld [vmem:[%s3866_s30 + $0x19d0] sm:$0xff]  ;;  %v1085_v24 = vld [vmem:[%s3866_s30 + $0x1840] sm:$0xff] }
 0x1da   : > { %2570 = vmatpush.msrb.mxu2 %v1052_v25  ;;  %2589 = vmatpush.msrb.mxu3 %v1069_v29  ;;  %v1102_v25 = vld [vmem:[%s3866_s30 + $0x18c8] sm:$0xff]  ;;  %v1117_v29 = vld [vmem:[%s3866_s30 + $0x1940] sm:$0xff] }
 0x1db   : > { %2531 = vmatpush.msrb.mxu0 %v1019_v26  ;;  %2550 = vmatpush.msrb.mxu1 %v1036_v27  ;;  %v1134_v26 = vld [vmem:[%s3866_s30 + $0x19c8] sm:$0xff]  ;;  %v1084_v27 = vld [vmem:[%s3866_s30 + $0x1838] sm:$0xff] }
 0x1dc   : > { %2571 = vmatpush.msrb.mxu2 %v1051_v30  ;;  %2590 = vmatpush.msrb.mxu3 %v1068_v32  ;;  %v1101_v30 = vld [vmem:[%s3866_s30 + $0x18c0] sm:$0xff]  ;;  %v1116_v32 = vld [vmem:[%s3866_s30 + $0x1938] sm:$0xff] }
 0x1dd   : > { %2532 = vmatpush.msrb.mxu0 %v1018_v28  ;;  %2551 = vmatpush.msrb.mxu1 %v1035_v34  ;;  %v1133_v28 = vld [vmem:[%s3866_s30 + $0x19c0] sm:$0xff]  ;;  %v1083_v34 = vld [vmem:[%s3866_s30 + $0x1830] sm:$0xff] }
 0x1de   : > { %2572 = vmatpush.msrb.mxu2 %v1050_v35  ;;  %2591 = vmatpush.msrb.mxu3 %v1067_v36  ;;  %v1100_v35 = vld [vmem:[%s3866_s30 + $0x18b8] sm:$0xff]  ;;  %v1115_v36 = vld [vmem:[%s3866_s30 + $0x1930] sm:$0xff] }
 0x1df   : > { %2533 = vmatpush.msrb.mxu0 %v1017_v33  ;;  %2552 = vmatpush.msrb.mxu1 %v1034_v31  ;;  %v1132_v33 = vld [vmem:[%s3866_s30 + $0x19b8] sm:$0xff]  ;;  %v1082_v31 = vld [vmem:[%s3866_s30 + $0x1828] sm:$0xff] }
 0x1e0   : > { %2573 = vmatpush.msrb.mxu2 %v1049_v37  ;;  %2592 = vmatpush.msrb.mxu3 %v1066_v38  ;;  %v1099_v37 = vld [vmem:[%s3866_s30 + $0x18b0] sm:$0xff]  ;;  %v1114_v38 = vld [vmem:[%s3866_s30 + $0x1928] sm:$0xff] }
 0x1e1   : > { %2534 = vmatpush.msrb.mxu0 %v1016_v39  ;;  %2553 = vmatpush.msrb.mxu1 %v1033_v40  ;;  %v1131_v39 = vld [vmem:[%s3866_s30 + $0x19b0] sm:$0xff]  ;;  %v1081_v40 = vld [vmem:[%s3866_s30 + $0x1820] sm:$0xff] }
 0x1e2   : > { %2574 = vmatpush.msrb.mxu2 %v1048_v41  ;;  %2593 = vmatpush.msrb.mxu3 %v1065_v42  ;;  %v1098_v41 = vld [vmem:[%s3866_s30 + $0x18a8] sm:$0xff]  ;;  %v1113_v42 = vld [vmem:[%s3866_s30 + $0x1920] sm:$0xff] }
 0x1e3   : > { %2535 = vmatpush.msrb.mxu0 %v1015_v43  ;;  %2554 = vmatpush.msrb.mxu1 %v1032_v44  ;;  %v1130_v43 = vld [vmem:[%s3866_s30 + $0x19a8] sm:$0xff]  ;;  %v1080_v44 = vld [vmem:[%s3866_s30 + $0x1818] sm:$0xff] }
 0x1e4   : > { %2575 = vmatpush.msrb.mxu2 %v1047_v45  ;;  %2594 = vmatpush.msrb.mxu3 %v1064_v46  ;;  %v1097_v45 = vld [vmem:[%s3866_s30 + $0x18a0] sm:$0xff]  ;;  %v1112_v46 = vld [vmem:[%s3866_s30 + $0x1918] sm:$0xff] }
 0x1e5   : > { %2536 = vmatpush.msrb.mxu0 %v1014_v47  ;;  %2555 = vmatpush.msrb.mxu1 %v1031_v48  ;;  %v1129_v47 = vld [vmem:[%s3866_s30 + $0x19a0] sm:$0xff]  ;;  %v1079_v48 = vld [vmem:[%s3866_s30 + $0x1810] sm:$0xff] }
 0x1e6   : > { %2576 = vmatpush.msrb.mxu2 %v1046_v50  ;;  %2595 = vmatpush.msrb.mxu3 %v1063_v51  ;;  %v1111_v50 = vld [vmem:[%s3866_s30 + $0x1910] sm:$0xff]  ;;  %v1128_v51 = vld [vmem:[%s3866_s30 + $0x1998] sm:$0xff] }
 0x1e7   : > { %2537 = vmatpush.msrb.mxu0 %v1013_v52  ;;  %2556 = vmatpush.msrb.mxu1 %v1030_v53  ;;  %v1078_v52 = vld [vmem:[%s3866_s30 + $0x1808] sm:$0xff]  ;;  %v1095_v53 = vld [vmem:[%s3866_s30 + $0x1890] sm:$0xff] }
 0x1e8   : > { %2577 = vmatpush.msrb.mxu2 %v1045_v54  ;;  %2596 = vmatpush.msrb.mxu3 %v1062_v55  ;;  %v304_v54 = vld [vmem:[%s3858_s29 + $0x68] sm:$0xff] }
 0x1e9   : > { %2538 = vmatmul.f32.vlgmr.msrb.gmra.mxu0 %v1536_v56  ;;  %2578 = vmatmul.f32.vlgmr.msrb.gmra.mxu2 %v1538_v57  ;;  %v1110_v55 = vld [vmem:[%s3866_s30 + $0x1908] sm:$0xff]  ;;  %v1127_v56 = vld [vmem:[%s3866_s30 + $0x1990] sm:$0xff]  ;;  %1541 = vst [vmem:[#allocation1 + $0x20] ss:$4 sm:$0xff] %v304_v54  ;;  %v1077_v57 = vld [vmem:[%s3866_s30 + $0x1800] sm:$0xff] }
 0x1ea   : > { %2602 = vmatpush.msra.mxu0 %v1092_v58  ;;  %2642 = vmatpush.msra.mxu2 %v1124_v59  ;;  %v1094_v58 = vld [vmem:[%s3866_s30 + $0x1888] sm:$0xff]  ;;  %v1109_v59 = vld [vmem:[%s3866_s30 + $0x1900] sm:$0xff]  ;;  %v1160_v54 = vld [vmem:[%s3866_s30 + $0x1a98] sm:$0xff] }
 0x1eb   : > { %2557 = vmatpush.msrb.mxu1 %v1029_v60  ;;  %2597 = vmatpush.msrb.mxu3 %v1061_v61  ;;  %v1126_v60 = vld [vmem:[%s3866_s30 + $0x1988] sm:$0xff]  ;;  %v1542_v61 = vld.sshfl [vmem:[#allocation1] sm:$0xff pattern:$0x73625140] }
 0x1ec   : > { %2558 = vmatmul.f32.vlgmr.msrb.gmra.mxu1 %v1537_v62  ;;  %2598 = vmatmul.f32.vlgmr.msrb.gmra.mxu3 %v1539_v63  ;;  %v1544_v62 = vld.sshfl [vmem:[#allocation1 + $0x10] sm:$0xff pattern:$0x73625140]  ;;  %v1156_v63 = vld [vmem:[%s3866_s30 + $0x1a78] sm:$0xff] }
 0x1ed   : > { %2603 = vmatpush.msra.mxu0 %v1091_v0  ;;  %2622 = vmatpush.msra.mxu1 %v1108_v1  ;;  %v1188_v0 = vld [vmem:[%s3866_s30 + $0x1b78] sm:$0xff]  ;;  %v1093_v1 = vld [vmem:[%s3866_s30 + $0x1880] sm:$0xff] }
 0x1ee   : > { %2643 = vmatpush.msra.mxu2 %v1123_v2  ;;  %2662 = vmatpush.msra.mxu3 %v1140_v3  ;;  %v1125_v2 = vld [vmem:[%s3866_s30 + $0x1980] sm:$0xff] }
 0x1ef   : > { %2604 = vmatpush.msra.mxu0 %v1090_v4  ;;  %2623 = vmatpush.msra.mxu1 %v1107_v5  ;;  %v1543_v3 = vld.sshfl [vmem:[#allocation1 + $0x8] sm:$0xff pattern:$0x73625140]  ;;  %v1545_v4 = vld.sshfl [vmem:[#allocation1 + $0x18] sm:$0xff pattern:$0x73625140] }
 0x1f0   : > { %2644 = vmatpush.msra.mxu2 %v1122_v6  ;;  %2663 = vmatpush.msra.mxu3 %v1139_v7  ;;  %v1155_v5 = vld [vmem:[%s3866_s30 + $0x1a70] sm:$0xff]  ;;  %v1172_v6 = vld [vmem:[%s3866_s30 + $0x1af8] sm:$0xff] }
 0x1f1   : > { %2605 = vmatpush.msra.mxu0 %v1089_v8  ;;  %2624 = vmatpush.msra.mxu1 %v1106_v9  ;;  %v1187_v7 = vld [vmem:[%s3866_s30 + $0x1b70] sm:$0xff]  ;;  %v1204_v8 = vld [vmem:[%s3866_s30 + $0x1bf8] sm:$0xff]  ;;  %v1154_v9 = vld [vmem:[%s3866_s30 + $0x1a68] sm:$0xff] }
 0x1f2   : > { %2645 = vmatpush.msra.mxu2 %v1121_v10  ;;  %2664 = vmatpush.msra.mxu3 %v1138_v11  ;;  %v1171_v10 = vld [vmem:[%s3866_s30 + $0x1af0] sm:$0xff]  ;;  %v1186_v11 = vld [vmem:[%s3866_s30 + $0x1b68] sm:$0xff] }
 0x1f3   : > { %2606 = vmatpush.msra.mxu0 %v1088_v12  ;;  %2625 = vmatpush.msra.mxu1 %v1105_v13  ;;  %v1203_v12 = vld [vmem:[%s3866_s30 + $0x1bf0] sm:$0xff]  ;;  %v1153_v13 = vld [vmem:[%s3866_s30 + $0x1a60] sm:$0xff] }
 0x1f4   : > { %2646 = vmatpush.msra.mxu2 %v1120_v14  ;;  %2665 = vmatpush.msra.mxu3 %v1137_v15  ;;  %v1170_v14 = vld [vmem:[%s3866_s30 + $0x1ae8] sm:$0xff]  ;;  %v1185_v15 = vld [vmem:[%s3866_s30 + $0x1b60] sm:$0xff] }
 0x1f5   : > { %2607 = vmatpush.msra.mxu0 %v1087_v16  ;;  %2626 = vmatpush.msra.mxu1 %v1104_v17  ;;  %v1202_v16 = vld [vmem:[%s3866_s30 + $0x1be8] sm:$0xff]  ;;  %v1152_v17 = vld [vmem:[%s3866_s30 + $0x1a58] sm:$0xff] }
 0x1f6   : > { %2647 = vmatpush.msra.mxu2 %v1119_v18  ;;  %2666 = vmatpush.msra.mxu3 %v1136_v19  ;;  %v1169_v18 = vld [vmem:[%s3866_s30 + $0x1ae0] sm:$0xff]  ;;  %v1184_v19 = vld [vmem:[%s3866_s30 + $0x1b58] sm:$0xff] }
 0x1f7   : > { %2608 = vmatpush.msra.mxu0 %v1086_v20  ;;  %2627 = vmatpush.msra.mxu1 %v1103_v21  ;;  %v1201_v20 = vld [vmem:[%s3866_s30 + $0x1be0] sm:$0xff]  ;;  %v1151_v21 = vld [vmem:[%s3866_s30 + $0x1a50] sm:$0xff] }
 0x1f8   : > { %2648 = vmatpush.msra.mxu2 %v1118_v22  ;;  %2667 = vmatpush.msra.mxu3 %v1135_v23  ;;  %v1168_v22 = vld [vmem:[%s3866_s30 + $0x1ad8] sm:$0xff]  ;;  %v1183_v23 = vld [vmem:[%s3866_s30 + $0x1b50] sm:$0xff] }
 0x1f9   : > { %2609 = vmatpush.msra.mxu0 %v1085_v24  ;;  %2628 = vmatpush.msra.mxu1 %v1102_v25  ;;  %v1200_v24 = vld [vmem:[%s3866_s30 + $0x1bd8] sm:$0xff]  ;;  %v1150_v25 = vld [vmem:[%s3866_s30 + $0x1a48] sm:$0xff] }
 0x1fa   : > { %2649 = vmatpush.msra.mxu2 %v1117_v29  ;;  %2668 = vmatpush.msra.mxu3 %v1134_v26  ;;  %v1167_v29 = vld [vmem:[%s3866_s30 + $0x1ad0] sm:$0xff]  ;;  %v1182_v26 = vld [vmem:[%s3866_s30 + $0x1b48] sm:$0xff] }
 0x1fb   : > { %2610 = vmatpush.msra.mxu0 %v1084_v27  ;;  %2629 = vmatpush.msra.mxu1 %v1101_v30  ;;  %v1199_v27 = vld [vmem:[%s3866_s30 + $0x1bd0] sm:$0xff]  ;;  %v1149_v30 = vld [vmem:[%s3866_s30 + $0x1a40] sm:$0xff] }
 0x1fc   : > { %2650 = vmatpush.msra.mxu2 %v1116_v32  ;;  %2669 = vmatpush.msra.mxu3 %v1133_v28  ;;  %v1166_v32 = vld [vmem:[%s3866_s30 + $0x1ac8] sm:$0xff]  ;;  %v1181_v28 = vld [vmem:[%s3866_s30 + $0x1b40] sm:$0xff] }
 0x1fd   : > { %2611 = vmatpush.msra.mxu0 %v1083_v34  ;;  %2630 = vmatpush.msra.mxu1 %v1100_v35  ;;  %v1198_v34 = vld [vmem:[%s3866_s30 + $0x1bc8] sm:$0xff]  ;;  %v1148_v35 = vld [vmem:[%s3866_s30 + $0x1a38] sm:$0xff] }
 0x1fe   : > { %2651 = vmatpush.msra.mxu2 %v1115_v36  ;;  %2670 = vmatpush.msra.mxu3 %v1132_v33  ;;  %v1165_v36 = vld [vmem:[%s3866_s30 + $0x1ac0] sm:$0xff]  ;;  %v1180_v33 = vld [vmem:[%s3866_s30 + $0x1b38] sm:$0xff] }
 0x1ff   : > { %2612 = vmatpush.msra.mxu0 %v1082_v31  ;;  %2631 = vmatpush.msra.mxu1 %v1099_v37  ;;  %v1197_v31 = vld [vmem:[%s3866_s30 + $0x1bc0] sm:$0xff]  ;;  %v1147_v37 = vld [vmem:[%s3866_s30 + $0x1a30] sm:$0xff] }
 0x200   : > { %2652 = vmatpush.msra.mxu2 %v1114_v38  ;;  %2671 = vmatpush.msra.mxu3 %v1131_v39  ;;  %v1164_v38 = vld [vmem:[%s3866_s30 + $0x1ab8] sm:$0xff]  ;;  %v1179_v39 = vld [vmem:[%s3866_s30 + $0x1b30] sm:$0xff] }
 0x201   : > { %2613 = vmatpush.msra.mxu0 %v1081_v40  ;;  %2632 = vmatpush.msra.mxu1 %v1098_v41  ;;  %v1196_v40 = vld [vmem:[%s3866_s30 + $0x1bb8] sm:$0xff]  ;;  %v1146_v41 = vld [vmem:[%s3866_s30 + $0x1a28] sm:$0xff] }
 0x202   : > { %2653 = vmatpush.msra.mxu2 %v1113_v42  ;;  %2672 = vmatpush.msra.mxu3 %v1130_v43  ;;  %v1163_v42 = vld [vmem:[%s3866_s30 + $0x1ab0] sm:$0xff]  ;;  %v1178_v43 = vld [vmem:[%s3866_s30 + $0x1b28] sm:$0xff] }
 0x203   : > { %2614 = vmatpush.msra.mxu0 %v1080_v44  ;;  %2633 = vmatpush.msra.mxu1 %v1097_v45  ;;  %v1195_v44 = vld [vmem:[%s3866_s30 + $0x1bb0] sm:$0xff]  ;;  %v1145_v45 = vld [vmem:[%s3866_s30 + $0x1a20] sm:$0xff] }
 0x204   : > { %2654 = vmatpush.msra.mxu2 %v1112_v46  ;;  %2673 = vmatpush.msra.mxu3 %v1129_v47  ;;  %v1162_v46 = vld [vmem:[%s3866_s30 + $0x1aa8] sm:$0xff]  ;;  %v1177_v47 = vld [vmem:[%s3866_s30 + $0x1b20] sm:$0xff] }
 0x205   : > { %2615 = vmatpush.msra.mxu0 %v1079_v48  ;;  %2634 = vmatpush.msra.mxu1 %v1096_v49  ;;  %v1194_v48 = vld [vmem:[%s3866_s30 + $0x1ba8] sm:$0xff]  ;;  %v1144_v49 = vld [vmem:[%s3866_s30 + $0x1a18] sm:$0xff] }
 0x206   : > { %2655 = vmatpush.msra.mxu2 %v1111_v50  ;;  %2674 = vmatpush.msra.mxu3 %v1128_v51  ;;  %v1161_v50 = vld [vmem:[%s3866_s30 + $0x1aa0] sm:$0xff]  ;;  %v1176_v51 = vld [vmem:[%s3866_s30 + $0x1b18] sm:$0xff] }
 0x207   : > { %2616 = vmatpush.msra.mxu0 %v1078_v52  ;;  %2635 = vmatpush.msra.mxu1 %v1095_v53  ;;  %v1193_v52 = vld [vmem:[%s3866_s30 + $0x1ba0] sm:$0xff]  ;;  %v1143_v53 = vld [vmem:[%s3866_s30 + $0x1a10] sm:$0xff] }
 0x208   : > { %2656 = vmatpush.msra.mxu2 %v1110_v55  ;;  %2675 = vmatpush.msra.mxu3 %v1127_v56  ;;  %v1175_v55 = vld [vmem:[%s3866_s30 + $0x1b10] sm:$0xff]  ;;  %v1192_v56 = vld [vmem:[%s3866_s30 + $0x1b98] sm:$0xff] }
 0x209   : > { %2617 = vmatpush.msra.mxu0 %v1077_v57  ;;  %2636 = vmatpush.msra.mxu1 %v1094_v58  ;;  %v1142_v57 = vld [vmem:[%s3866_s30 + $0x1a08] sm:$0xff]  ;;  %v1159_v58 = vld [vmem:[%s3866_s30 + $0x1a90] sm:$0xff] }
 0x20a   : > { %2657 = vmatpush.msra.mxu2 %v1109_v59  ;;  %2676 = vmatpush.msra.mxu3 %v1126_v60  ;;  %v305_v59 = vld [vmem:[%s3858_s29 + $0x70] sm:$0xff]  ;;  %v1174_v60 = vld [vmem:[%s3866_s30 + $0x1b08] sm:$0xff] }
 0x20b   : > { %2618 = vmatmul.f32.vlgmr.msra.gmra.mxu0 %v1542_v61  ;;  %2658 = vmatmul.f32.vlgmr.msra.gmra.mxu2 %v1544_v62  ;;  %v1191_v61 = vld [vmem:[%s3866_s30 + $0x1b90] sm:$0xff]  ;;  %1550 = vst [vmem:[#allocation1] ss:$4 sm:$0xff] %v305_v59  ;;  %v1141_v62 = vld [vmem:[%s3866_s30 + $0x1a00] sm:$0xff]  ;;  %v1224_v59 = vld [vmem:[%s3866_s30 + $0x1c98] sm:$0xff] }
 0x20c   : > { %2682 = vmatpush.msrb.mxu0 %v1156_v63  ;;  %2722 = vmatpush.msrb.mxu2 %v1188_v0  ;;  %v1158_v63 = vld [vmem:[%s3866_s30 + $0x1a88] sm:$0xff]  ;;  %v1173_v0 = vld [vmem:[%s3866_s30 + $0x1b00] sm:$0xff] }
 0x20d   : > { %2637 = vmatpush.msra.mxu1 %v1093_v1  ;;  %2677 = vmatpush.msra.mxu3 %v1125_v2  ;;  %v1190_v1 = vld [vmem:[%s3866_s30 + $0x1b88] sm:$0xff]  ;;  %v1546_v2 = vld.sshfl [vmem:[#allocation1 + $0x20] sm:$0xff pattern:$0x73625140] }
 0x20e   : > { %2638 = vmatmul.f32.vlgmr.msra.gmra.mxu1 %v1543_v3  ;;  %2678 = vmatmul.f32.vlgmr.msra.gmra.mxu3 %v1545_v4  ;;  %v1548_v3 = vld.sshfl [vmem:[#allocation1 + $0x30] sm:$0xff pattern:$0x73625140]  ;;  %v1220_v4 = vld [vmem:[%s3866_s30 + $0x1c78] sm:$0xff] }
 0x20f   : > { %2683 = vmatpush.msrb.mxu0 %v1155_v5  ;;  %2702 = vmatpush.msrb.mxu1 %v1172_v6  ;;  %v1252_v5 = vld [vmem:[%s3866_s30 + $0x1d78] sm:$0xff]  ;;  %v1157_v6 = vld [vmem:[%s3866_s30 + $0x1a80] sm:$0xff] }
 0x210   : > { %2723 = vmatpush.msrb.mxu2 %v1187_v7  ;;  %2742 = vmatpush.msrb.mxu3 %v1204_v8  ;;  %v1189_v7 = vld [vmem:[%s3866_s30 + $0x1b80] sm:$0xff] }
 0x211   : > { %2684 = vmatpush.msrb.mxu0 %v1154_v9  ;;  %2703 = vmatpush.msrb.mxu1 %v1171_v10  ;;  %v1547_v8 = vld.sshfl [vmem:[#allocation1 + $0x28] sm:$0xff pattern:$0x73625140]  ;;  %v1549_v9 = vld.sshfl [vmem:[#allocation1 + $0x38] sm:$0xff pattern:$0x73625140] }
 0x212   : > { %2724 = vmatpush.msrb.mxu2 %v1186_v11  ;;  %2743 = vmatpush.msrb.mxu3 %v1203_v12  ;;  %v1219_v10 = vld [vmem:[%s3866_s30 + $0x1c70] sm:$0xff]  ;;  %v1236_v11 = vld [vmem:[%s3866_s30 + $0x1cf8] sm:$0xff] }
 0x213   : > { %2685 = vmatpush.msrb.mxu0 %v1153_v13  ;;  %2704 = vmatpush.msrb.mxu1 %v1170_v14  ;;  %v1251_v12 = vld [vmem:[%s3866_s30 + $0x1d70] sm:$0xff]  ;;  %v1268_v13 = vld [vmem:[%s3866_s30 + $0x1df8] sm:$0xff]  ;;  %v1218_v14 = vld [vmem:[%s3866_s30 + $0x1c68] sm:$0xff] }
 0x214   : > { %2725 = vmatpush.msrb.mxu2 %v1185_v15  ;;  %2744 = vmatpush.msrb.mxu3 %v1202_v16  ;;  %v1235_v15 = vld [vmem:[%s3866_s30 + $0x1cf0] sm:$0xff]  ;;  %v1250_v16 = vld [vmem:[%s3866_s30 + $0x1d68] sm:$0xff] }
 0x215   : > { %2686 = vmatpush.msrb.mxu0 %v1152_v17  ;;  %2705 = vmatpush.msrb.mxu1 %v1169_v18  ;;  %v1267_v17 = vld [vmem:[%s3866_s30 + $0x1df0] sm:$0xff]  ;;  %v1217_v18 = vld [vmem:[%s3866_s30 + $0x1c60] sm:$0xff] }
 0x216   : > { %2726 = vmatpush.msrb.mxu2 %v1184_v19  ;;  %2745 = vmatpush.msrb.mxu3 %v1201_v20  ;;  %v1234_v19 = vld [vmem:[%s3866_s30 + $0x1ce8] sm:$0xff]  ;;  %v1249_v20 = vld [vmem:[%s3866_s30 + $0x1d60] sm:$0xff] }
 0x217   : > { %2687 = vmatpush.msrb.mxu0 %v1151_v21  ;;  %2706 = vmatpush.msrb.mxu1 %v1168_v22  ;;  %v1266_v21 = vld [vmem:[%s3866_s30 + $0x1de8] sm:$0xff]  ;;  %v1216_v22 = vld [vmem:[%s3866_s30 + $0x1c58] sm:$0xff] }
 0x218   : > { %2727 = vmatpush.msrb.mxu2 %v1183_v23  ;;  %2746 = vmatpush.msrb.mxu3 %v1200_v24  ;;  %v1233_v23 = vld [vmem:[%s3866_s30 + $0x1ce0] sm:$0xff]  ;;  %v1248_v24 = vld [vmem:[%s3866_s30 + $0x1d58] sm:$0xff] }
 0x219   : > { %2688 = vmatpush.msrb.mxu0 %v1150_v25  ;;  %2707 = vmatpush.msrb.mxu1 %v1167_v29  ;;  %v1265_v25 = vld [vmem:[%s3866_s30 + $0x1de0] sm:$0xff]  ;;  %v1215_v29 = vld [vmem:[%s3866_s30 + $0x1c50] sm:$0xff] }
 0x21a   : > { %2728 = vmatpush.msrb.mxu2 %v1182_v26  ;;  %2747 = vmatpush.msrb.mxu3 %v1199_v27  ;;  %v1232_v26 = vld [vmem:[%s3866_s30 + $0x1cd8] sm:$0xff]  ;;  %v1247_v27 = vld [vmem:[%s3866_s30 + $0x1d50] sm:$0xff] }
 0x21b   : > { %2689 = vmatpush.msrb.mxu0 %v1149_v30  ;;  %2708 = vmatpush.msrb.mxu1 %v1166_v32  ;;  %v1264_v30 = vld [vmem:[%s3866_s30 + $0x1dd8] sm:$0xff]  ;;  %v1214_v32 = vld [vmem:[%s3866_s30 + $0x1c48] sm:$0xff] }
 0x21c   : > { %2729 = vmatpush.msrb.mxu2 %v1181_v28  ;;  %2748 = vmatpush.msrb.mxu3 %v1198_v34  ;;  %v1231_v28 = vld [vmem:[%s3866_s30 + $0x1cd0] sm:$0xff]  ;;  %v1246_v34 = vld [vmem:[%s3866_s30 + $0x1d48] sm:$0xff] }
 0x21d   : > { %2690 = vmatpush.msrb.mxu0 %v1148_v35  ;;  %2709 = vmatpush.msrb.mxu1 %v1165_v36  ;;  %v1263_v35 = vld [vmem:[%s3866_s30 + $0x1dd0] sm:$0xff]  ;;  %v1213_v36 = vld [vmem:[%s3866_s30 + $0x1c40] sm:$0xff] }
 0x21e   : > { %2730 = vmatpush.msrb.mxu2 %v1180_v33  ;;  %2749 = vmatpush.msrb.mxu3 %v1197_v31  ;;  %v1230_v33 = vld [vmem:[%s3866_s30 + $0x1cc8] sm:$0xff]  ;;  %v1245_v31 = vld [vmem:[%s3866_s30 + $0x1d40] sm:$0xff] }
 0x21f   : > { %2691 = vmatpush.msrb.mxu0 %v1147_v37  ;;  %2710 = vmatpush.msrb.mxu1 %v1164_v38  ;;  %v1262_v37 = vld [vmem:[%s3866_s30 + $0x1dc8] sm:$0xff]  ;;  %v1212_v38 = vld [vmem:[%s3866_s30 + $0x1c38] sm:$0xff] }
 0x220   : > { %2731 = vmatpush.msrb.mxu2 %v1179_v39  ;;  %2750 = vmatpush.msrb.mxu3 %v1196_v40  ;;  %v1229_v39 = vld [vmem:[%s3866_s30 + $0x1cc0] sm:$0xff]  ;;  %v1244_v40 = vld [vmem:[%s3866_s30 + $0x1d38] sm:$0xff] }
 0x221   : > { %2692 = vmatpush.msrb.mxu0 %v1146_v41  ;;  %2711 = vmatpush.msrb.mxu1 %v1163_v42  ;;  %v1261_v41 = vld [vmem:[%s3866_s30 + $0x1dc0] sm:$0xff]  ;;  %v1211_v42 = vld [vmem:[%s3866_s30 + $0x1c30] sm:$0xff] }
 0x222   : > { %2732 = vmatpush.msrb.mxu2 %v1178_v43  ;;  %2751 = vmatpush.msrb.mxu3 %v1195_v44  ;;  %v1228_v43 = vld [vmem:[%s3866_s30 + $0x1cb8] sm:$0xff]  ;;  %v1243_v44 = vld [vmem:[%s3866_s30 + $0x1d30] sm:$0xff] }
 0x223   : > { %2693 = vmatpush.msrb.mxu0 %v1145_v45  ;;  %2712 = vmatpush.msrb.mxu1 %v1162_v46  ;;  %v1260_v45 = vld [vmem:[%s3866_s30 + $0x1db8] sm:$0xff]  ;;  %v1210_v46 = vld [vmem:[%s3866_s30 + $0x1c28] sm:$0xff] }
 0x224   : > { %2733 = vmatpush.msrb.mxu2 %v1177_v47  ;;  %2752 = vmatpush.msrb.mxu3 %v1194_v48  ;;  %v1227_v47 = vld [vmem:[%s3866_s30 + $0x1cb0] sm:$0xff]  ;;  %v1242_v48 = vld [vmem:[%s3866_s30 + $0x1d28] sm:$0xff] }
 0x225   : > { %2694 = vmatpush.msrb.mxu0 %v1144_v49  ;;  %2713 = vmatpush.msrb.mxu1 %v1161_v50  ;;  %v1259_v49 = vld [vmem:[%s3866_s30 + $0x1db0] sm:$0xff]  ;;  %v1209_v50 = vld [vmem:[%s3866_s30 + $0x1c20] sm:$0xff] }
 0x226   : > { %2734 = vmatpush.msrb.mxu2 %v1176_v51  ;;  %2753 = vmatpush.msrb.mxu3 %v1193_v52  ;;  %v1226_v51 = vld [vmem:[%s3866_s30 + $0x1ca8] sm:$0xff]  ;;  %v1241_v52 = vld [vmem:[%s3866_s30 + $0x1d20] sm:$0xff] }
 0x227   : > { %2695 = vmatpush.msrb.mxu0 %v1143_v53  ;;  %2714 = vmatpush.msrb.mxu1 %v1160_v54  ;;  %v1258_v53 = vld [vmem:[%s3866_s30 + $0x1da8] sm:$0xff]  ;;  %v1208_v54 = vld [vmem:[%s3866_s30 + $0x1c18] sm:$0xff] }
 0x228   : > { %2735 = vmatpush.msrb.mxu2 %v1175_v55  ;;  %2754 = vmatpush.msrb.mxu3 %v1192_v56  ;;  %v1225_v55 = vld [vmem:[%s3866_s30 + $0x1ca0] sm:$0xff]  ;;  %v1240_v56 = vld [vmem:[%s3866_s30 + $0x1d18] sm:$0xff] }
 0x229   : > { %2696 = vmatpush.msrb.mxu0 %v1142_v57  ;;  %2715 = vmatpush.msrb.mxu1 %v1159_v58  ;;  %v1257_v57 = vld [vmem:[%s3866_s30 + $0x1da0] sm:$0xff]  ;;  %v1207_v58 = vld [vmem:[%s3866_s30 + $0x1c10] sm:$0xff] }
 0x22a   : > { %2736 = vmatpush.msrb.mxu2 %v1174_v60  ;;  %2755 = vmatpush.msrb.mxu3 %v1191_v61  ;;  %v1239_v60 = vld [vmem:[%s3866_s30 + $0x1d10] sm:$0xff]  ;;  %v1256_v61 = vld [vmem:[%s3866_s30 + $0x1d98] sm:$0xff] }
 0x22b   : > { %2697 = vmatpush.msrb.mxu0 %v1141_v62  ;;  %2716 = vmatpush.msrb.mxu1 %v1158_v63  ;;  %v1206_v62 = vld [vmem:[%s3866_s30 + $0x1c08] sm:$0xff]  ;;  %v1223_v63 = vld [vmem:[%s3866_s30 + $0x1c90] sm:$0xff] }
 0x22c   : > { %2737 = vmatpush.msrb.mxu2 %v1173_v0  ;;  %2756 = vmatpush.msrb.mxu3 %v1190_v1  ;;  %v306_v0 = vld [vmem:[%s3858_s29 + $0x78] sm:$0xff] }
 0x22d   : > { %2698 = vmatmul.f32.vlgmr.msrb.gmra.mxu0 %v1546_v2  ;;  %2738 = vmatmul.f32.vlgmr.msrb.gmra.mxu2 %v1548_v3  ;;  %v1238_v1 = vld [vmem:[%s3866_s30 + $0x1d08] sm:$0xff]  ;;  %v1255_v2 = vld [vmem:[%s3866_s30 + $0x1d90] sm:$0xff]  ;;  %1551 = vst [vmem:[#allocation1 + $0x20] ss:$4 sm:$0xff] %v306_v0  ;;  %v1205_v3 = vld [vmem:[%s3866_s30 + $0x1c00] sm:$0xff] }
 0x22e   : > { %2762 = vmatpush.msra.mxu0 %v1220_v4  ;;  %2802 = vmatpush.msra.mxu2 %v1252_v5  ;;  %v1222_v4 = vld [vmem:[%s3866_s30 + $0x1c88] sm:$0xff]  ;;  %v1237_v5 = vld [vmem:[%s3866_s30 + $0x1d00] sm:$0xff] }
 0x22f   : > { %2717 = vmatpush.msrb.mxu1 %v1157_v6  ;;  %2757 = vmatpush.msrb.mxu3 %v1189_v7  ;;  %v1254_v6 = vld [vmem:[%s3866_s30 + $0x1d88] sm:$0xff]  ;;  %v1552_v7 = vld.sshfl [vmem:[#allocation1] sm:$0xff pattern:$0x73625140]  ;;  %v1289_v0 = vld [vmem:[%s3866_s30 + $0x1ea0] sm:$0xff] }
 0x230   : > { %2718 = vmatmul.f32.vlgmr.msrb.gmra.mxu1 %v1547_v8  ;;  %2758 = vmatmul.f32.vlgmr.msrb.gmra.mxu3 %v1549_v9  ;;  %v1554_v8 = vld.sshfl [vmem:[#allocation1 + $0x10] sm:$0xff pattern:$0x73625140]  ;;  %v1284_v9 = vld [vmem:[%s3866_s30 + $0x1e78] sm:$0xff] }
 0x231   : > { %2763 = vmatpush.msra.mxu0 %v1219_v10  ;;  %2782 = vmatpush.msra.mxu1 %v1236_v11  ;;  %v1316_v10 = vld [vmem:[%s3866_s30 + $0x1f78] sm:$0xff]  ;;  %v1221_v11 = vld [vmem:[%s3866_s30 + $0x1c80] sm:$0xff] }
 0x232   : > { %2803 = vmatpush.msra.mxu2 %v1251_v12  ;;  %2822 = vmatpush.msra.mxu3 %v1268_v13  ;;  %v1253_v12 = vld [vmem:[%s3866_s30 + $0x1d80] sm:$0xff] }
 0x233   : > { %2764 = vmatpush.msra.mxu0 %v1218_v14  ;;  %2783 = vmatpush.msra.mxu1 %v1235_v15  ;;  %v1553_v13 = vld.sshfl [vmem:[#allocation1 + $0x8] sm:$0xff pattern:$0x73625140]  ;;  %v1555_v14 = vld.sshfl [vmem:[#allocation1 + $0x18] sm:$0xff pattern:$0x73625140] }
 0x234   : > { %2804 = vmatpush.msra.mxu2 %v1250_v16  ;;  %2823 = vmatpush.msra.mxu3 %v1267_v17  ;;  %v1283_v15 = vld [vmem:[%s3866_s30 + $0x1e70] sm:$0xff]  ;;  %v1300_v16 = vld [vmem:[%s3866_s30 + $0x1ef8] sm:$0xff] }
 0x235   : > { %2765 = vmatpush.msra.mxu0 %v1217_v18  ;;  %2784 = vmatpush.msra.mxu1 %v1234_v19  ;;  %v1315_v17 = vld [vmem:[%s3866_s30 + $0x1f70] sm:$0xff]  ;;  %v1332_v18 = vld [vmem:[%s3866_s30 + $0x1ff8] sm:$0xff]  ;;  %v1282_v19 = vld [vmem:[%s3866_s30 + $0x1e68] sm:$0xff] }
 0x236   : > { %2805 = vmatpush.msra.mxu2 %v1249_v20  ;;  %2824 = vmatpush.msra.mxu3 %v1266_v21  ;;  %v1299_v20 = vld [vmem:[%s3866_s30 + $0x1ef0] sm:$0xff]  ;;  %v1314_v21 = vld [vmem:[%s3866_s30 + $0x1f68] sm:$0xff] }
 0x237   : > { %2766 = vmatpush.msra.mxu0 %v1216_v22  ;;  %2785 = vmatpush.msra.mxu1 %v1233_v23  ;;  %v1331_v22 = vld [vmem:[%s3866_s30 + $0x1ff0] sm:$0xff]  ;;  %v1281_v23 = vld [vmem:[%s3866_s30 + $0x1e60] sm:$0xff] }
 0x238   : > { %2806 = vmatpush.msra.mxu2 %v1248_v24  ;;  %2825 = vmatpush.msra.mxu3 %v1265_v25  ;;  %v1298_v24 = vld [vmem:[%s3866_s30 + $0x1ee8] sm:$0xff]  ;;  %v1313_v25 = vld [vmem:[%s3866_s30 + $0x1f60] sm:$0xff] }
 0x239   : > { %2767 = vmatpush.msra.mxu0 %v1215_v29  ;;  %2786 = vmatpush.msra.mxu1 %v1232_v26  ;;  %v1330_v29 = vld [vmem:[%s3866_s30 + $0x1fe8] sm:$0xff]  ;;  %v1280_v26 = vld [vmem:[%s3866_s30 + $0x1e58] sm:$0xff] }
 0x23a   : > { %2807 = vmatpush.msra.mxu2 %v1247_v27  ;;  %2826 = vmatpush.msra.mxu3 %v1264_v30  ;;  %v1297_v27 = vld [vmem:[%s3866_s30 + $0x1ee0] sm:$0xff]  ;;  %v1312_v30 = vld [vmem:[%s3866_s30 + $0x1f58] sm:$0xff] }
 0x23b   : > { %2768 = vmatpush.msra.mxu0 %v1214_v32  ;;  %2787 = vmatpush.msra.mxu1 %v1231_v28  ;;  %v1329_v32 = vld [vmem:[%s3866_s30 + $0x1fe0] sm:$0xff]  ;;  %v1279_v28 = vld [vmem:[%s3866_s30 + $0x1e50] sm:$0xff] }
 0x23c   : > { %2808 = vmatpush.msra.mxu2 %v1246_v34  ;;  %2827 = vmatpush.msra.mxu3 %v1263_v35  ;;  %v1296_v34 = vld [vmem:[%s3866_s30 + $0x1ed8] sm:$0xff]  ;;  %v1311_v35 = vld [vmem:[%s3866_s30 + $0x1f50] sm:$0xff] }
 0x23d   : > { %2769 = vmatpush.msra.mxu0 %v1213_v36  ;;  %2788 = vmatpush.msra.mxu1 %v1230_v33  ;;  %v1328_v36 = vld [vmem:[%s3866_s30 + $0x1fd8] sm:$0xff]  ;;  %v1278_v33 = vld [vmem:[%s3866_s30 + $0x1e48] sm:$0xff] }
 0x23e   : > { %2809 = vmatpush.msra.mxu2 %v1245_v31  ;;  %2828 = vmatpush.msra.mxu3 %v1262_v37  ;;  %v1295_v31 = vld [vmem:[%s3866_s30 + $0x1ed0] sm:$0xff]  ;;  %v1310_v37 = vld [vmem:[%s3866_s30 + $0x1f48] sm:$0xff] }
 0x23f   : > { %2770 = vmatpush.msra.mxu0 %v1212_v38  ;;  %2789 = vmatpush.msra.mxu1 %v1229_v39  ;;  %v1327_v38 = vld [vmem:[%s3866_s30 + $0x1fd0] sm:$0xff]  ;;  %v1277_v39 = vld [vmem:[%s3866_s30 + $0x1e40] sm:$0xff] }
 0x240   : > { %2810 = vmatpush.msra.mxu2 %v1244_v40  ;;  %2829 = vmatpush.msra.mxu3 %v1261_v41  ;;  %v1294_v40 = vld [vmem:[%s3866_s30 + $0x1ec8] sm:$0xff]  ;;  %v1309_v41 = vld [vmem:[%s3866_s30 + $0x1f40] sm:$0xff] }
 0x241   : > { %2771 = vmatpush.msra.mxu0 %v1211_v42  ;;  %2790 = vmatpush.msra.mxu1 %v1228_v43  ;;  %v1326_v42 = vld [vmem:[%s3866_s30 + $0x1fc8] sm:$0xff]  ;;  %v1276_v43 = vld [vmem:[%s3866_s30 + $0x1e38] sm:$0xff] }
 0x242   : > { %2811 = vmatpush.msra.mxu2 %v1243_v44  ;;  %2830 = vmatpush.msra.mxu3 %v1260_v45  ;;  %v1293_v44 = vld [vmem:[%s3866_s30 + $0x1ec0] sm:$0xff]  ;;  %v1308_v45 = vld [vmem:[%s3866_s30 + $0x1f38] sm:$0xff] }
 0x243   : > { %2772 = vmatpush.msra.mxu0 %v1210_v46  ;;  %2791 = vmatpush.msra.mxu1 %v1227_v47  ;;  %v1325_v46 = vld [vmem:[%s3866_s30 + $0x1fc0] sm:$0xff]  ;;  %v1275_v47 = vld [vmem:[%s3866_s30 + $0x1e30] sm:$0xff] }
 0x244   : > { %2812 = vmatpush.msra.mxu2 %v1242_v48  ;;  %2831 = vmatpush.msra.mxu3 %v1259_v49  ;;  %v1292_v48 = vld [vmem:[%s3866_s30 + $0x1eb8] sm:$0xff]  ;;  %v1307_v49 = vld [vmem:[%s3866_s30 + $0x1f30] sm:$0xff] }
 0x245   : > { %2773 = vmatpush.msra.mxu0 %v1209_v50  ;;  %2792 = vmatpush.msra.mxu1 %v1226_v51  ;;  %v1324_v50 = vld [vmem:[%s3866_s30 + $0x1fb8] sm:$0xff]  ;;  %v1679_v51 = vpop.f32.mrf.mxu1 }
 0x246   : > { %2813 = vmatpush.msra.mxu2 %v1241_v52  ;;  %2832 = vmatpush.msra.mxu3 %v1258_v53  ;;  %v1274_v52 = vld [vmem:[%s3866_s30 + $0x1e28] sm:$0xff]  ;;  %v1291_v53 = vld [vmem:[%s3866_s30 + $0x1eb0] sm:$0xff] }
 0x247   : > { %2774 = vmatpush.msra.mxu0 %v1208_v54  ;;  %2793 = vmatpush.msra.mxu1 %v1225_v55  ;;  %v1306_v54 = vld [vmem:[%s3866_s30 + $0x1f28] sm:$0xff]  ;;  %v1323_v55 = vld [vmem:[%s3866_s30 + $0x1fb0] sm:$0xff] }
 0x248   : > { %2814 = vmatpush.msra.mxu2 %v1240_v56  ;;  %2833 = vmatpush.msra.mxu3 %v1257_v57  ;;  %v1659_v56 = vpop.f32.mrf.mxu0  ;;  %v1273_v57 = vld [vmem:[%s3866_s30 + $0x1e20] sm:$0xff] }
 0x249   : > { %2775 = vmatpush.msra.mxu0 %v1207_v58  ;;  %2794 = vmatpush.msra.mxu1 %v1224_v59  ;;  %v1290_v58 = vld [vmem:[%s3866_s30 + $0x1ea8] sm:$0xff]  ;;  %v1680_v59 = vadd.f32 %v1679_v51, %v1659_v56  ;;  %v1360_v51 = vld [vmem:[%s3866_s30 + $0x20d8] sm:$0xff]  ;;  %v1359_v56 = vld [vmem:[%s3866_s30 + $0x20d0] sm:$0xff] }
 0x24a   : > { %2815 = vmatpush.msra.mxu2 %v1239_v60  ;;  %2834 = vmatpush.msra.mxu3 %v1256_v61  ;;  %v1305_v60 = vld [vmem:[%s3866_s30 + $0x1f20] sm:$0xff]  ;;  %v1322_v61 = vld [vmem:[%s3866_s30 + $0x1fa8] sm:$0xff] }
 0x24b   : > { %2776 = vmatpush.msra.mxu0 %v1206_v62  ;;  %2795 = vmatpush.msra.mxu1 %v1223_v63  ;;  %v1699_v62 = vpop.f32.mrf.mxu2  ;;  %v1272_v63 = vld [vmem:[%s3866_s30 + $0x1e18] sm:$0xff] }
 0x24c   : > { %2816 = vmatpush.msra.mxu2 %v1238_v1  ;;  %2835 = vmatpush.msra.mxu3 %v1255_v2  ;;  %v1304_v1 = vld [vmem:[%s3866_s30 + $0x1f18] sm:$0xff]  ;;  %v1321_v2 = vld [vmem:[%s3866_s30 + $0x1fa0] sm:$0xff] }
 0x24d   : > { %2777 = vmatpush.msra.mxu0 %v1205_v3  ;;  %2796 = vmatpush.msra.mxu1 %v1222_v4  ;;  %v1271_v3 = vld [vmem:[%s3866_s30 + $0x1e10] sm:$0xff]  ;;  %v1288_v4 = vld [vmem:[%s3866_s30 + $0x1e98] sm:$0xff] }
 0x24e   : > { %2817 = vmatpush.msra.mxu2 %v1237_v5  ;;  %2836 = vmatpush.msra.mxu3 %v1254_v6  ;;  %v1700_v5 = vadd.f32 %v1699_v62, %v1680_v59  ;;  %v1303_v6 = vld [vmem:[%s3866_s30 + $0x1f10] sm:$0xff] }
 0x24f   : > { %2778 = vmatmul.f32.vlgmr.msra.gmra.mxu0 %v1552_v7  ;;  %2818 = vmatmul.f32.vlgmr.msra.gmra.mxu2 %v1554_v8  ;;  %v1320_v7 = vld [vmem:[%s3866_s30 + $0x1f98] sm:$0xff]  ;;  %v1719_v8 = vpop.f32.mrf.mxu3  ;;  %v1391_v59 = vld [vmem:[%s3866_s30 + $0x21d0] sm:$0xff] }
 0x250   : > { %2842 = vmatpush.msrb.mxu0 %v1284_v9  ;;  %2882 = vmatpush.msrb.mxu2 %v1316_v10  ;;  %v1270_v9 = vld [vmem:[%s3866_s30 + $0x1e08] sm:$0xff]  ;;  %v1287_v10 = vld [vmem:[%s3866_s30 + $0x1e90] sm:$0xff] }
 0x251   : > { %2797 = vmatpush.msra.mxu1 %v1221_v11  ;;  %2837 = vmatpush.msra.mxu3 %v1253_v12  ;;  %v307_v11 = vld [vmem:[%s3858_s29 + $0x80] sm:$0xff]  ;;  %v1302_v12 = vld [vmem:[%s3866_s30 + $0x1f08] sm:$0xff] }
 0x252   : > { %2798 = vmatmul.f32.vlgmr.msra.gmra.mxu1 %v1553_v13  ;;  %2838 = vmatmul.f32.vlgmr.msra.gmra.mxu3 %v1555_v14  ;;  %v1319_v13 = vld [vmem:[%s3866_s30 + $0x1f90] sm:$0xff]  ;;  %1560 = vst [vmem:[#allocation1] ss:$4 sm:$0xff] %v307_v11  ;;  %v1269_v14 = vld [vmem:[%s3866_s30 + $0x1e00] sm:$0xff]  ;;  %v1388_v11 = vld [vmem:[%s3866_s30 + $0x21b8] sm:$0xff] }
 0x253   : > { %2843 = vmatpush.msrb.mxu0 %v1283_v15  ;;  %2862 = vmatpush.msrb.mxu1 %v1300_v16  ;;  %v1286_v15 = vld [vmem:[%s3866_s30 + $0x1e88] sm:$0xff]  ;;  %v1720_v16 = vadd.f32 %v1719_v8, %v1700_v5  ;;  %v1389_v5 = vld [vmem:[%s3866_s30 + $0x21c0] sm:$0xff]  ;;  %v1356_v8 = vld [vmem:[%s3866_s30 + $0x20b8] sm:$0xff] }
 0x254   : > { %2883 = vmatpush.msrb.mxu2 %v1315_v17  ;;  %2902 = vmatpush.msrb.mxu3 %v1332_v18  ;;  %v1301_v17 = vld [vmem:[%s3866_s30 + $0x1f00] sm:$0xff]  ;;  %v1318_v18 = vld [vmem:[%s3866_s30 + $0x1f88] sm:$0xff] }
 0x255   : > { %2844 = vmatpush.msrb.mxu0 %v1282_v19  ;;  %2863 = vmatpush.msrb.mxu1 %v1299_v20  ;;  %v1739_v19 = vpop.f32.mrf.mxu0  ;;  %v1556_v20 = vld.sshfl [vmem:[#allocation1 + $0x20] sm:$0xff pattern:$0x73625140] }
 0x256   : > { %2884 = vmatpush.msrb.mxu2 %v1314_v21  ;;  %2903 = vmatpush.msrb.mxu3 %v1331_v22  ;;  %v1558_v21 = vld.sshfl [vmem:[#allocation1 + $0x30] sm:$0xff pattern:$0x73625140]  ;;  %v1348_v22 = vld [vmem:[%s3866_s30 + $0x2078] sm:$0xff] }
 0x257   : > { %2845 = vmatpush.msrb.mxu0 %v1281_v23  ;;  %2864 = vmatpush.msrb.mxu1 %v1298_v24  ;;  %v1380_v23 = vld [vmem:[%s3866_s30 + $0x2178] sm:$0xff]  ;;  %v1285_v24 = vld [vmem:[%s3866_s30 + $0x1e80] sm:$0xff] }
 0x258   : > { %2885 = vmatpush.msrb.mxu2 %v1313_v25  ;;  %2904 = vmatpush.msrb.mxu3 %v1330_v29  ;;  %v1317_v25 = vld [vmem:[%s3866_s30 + $0x1f80] sm:$0xff]  ;;  %v1740_v29 = vadd.f32 %v1739_v19, %v1720_v16  ;;  %v1387_v16 = vld [vmem:[%s3866_s30 + $0x21b0] sm:$0xff]  ;;  %v1354_v19 = vld [vmem:[%s3866_s30 + $0x20a8] sm:$0xff] }
 0x259   : > { %2846 = vmatpush.msrb.mxu0 %v1280_v26  ;;  %2865 = vmatpush.msrb.mxu1 %v1297_v27  ;;  %v1557_v26 = vld.sshfl [vmem:[#allocation1 + $0x28] sm:$0xff pattern:$0x73625140]  ;;  %v1559_v27 = vld.sshfl [vmem:[#allocation1 + $0x38] sm:$0xff pattern:$0x73625140] }
 0x25a   : > { %2886 = vmatpush.msrb.mxu2 %v1312_v30  ;;  %2905 = vmatpush.msrb.mxu3 %v1329_v32  ;;  %v1759_v30 = vpop.f32.mrf.mxu1  ;;  %v1347_v32 = vld [vmem:[%s3866_s30 + $0x2070] sm:$0xff] }
 0x25b   : > { %2847 = vmatpush.msrb.mxu0 %v1279_v28  ;;  %2866 = vmatpush.msrb.mxu1 %v1296_v34  ;;  %v1364_v28 = vld [vmem:[%s3866_s30 + $0x20f8] sm:$0xff]  ;;  %v1379_v34 = vld [vmem:[%s3866_s30 + $0x2170] sm:$0xff] }
 0x25c   : > { %2887 = vmatpush.msrb.mxu2 %v1311_v35  ;;  %2906 = vmatpush.msrb.mxu3 %v1328_v36  ;;  %v1396_v35 = vld [vmem:[%s3866_s30 + $0x21f8] sm:$0xff]  ;;  %v1346_v36 = vld [vmem:[%s3866_s30 + $0x2068] sm:$0xff] }
 0x25d   : > { %2848 = vmatpush.msrb.mxu0 %v1278_v33  ;;  %2867 = vmatpush.msrb.mxu1 %v1295_v31  ;;  %v1363_v33 = vld [vmem:[%s3866_s30 + $0x20f0] sm:$0xff]  ;;  %v1760_v31 = vadd.f32 %v1759_v30, %v1740_v29  ;;  %v1368_v29 = vld [vmem:[%s3866_s30 + $0x2118] sm:$0xff] }
 0x25e   : > { %2888 = vmatpush.msrb.mxu2 %v1310_v37  ;;  %2907 = vmatpush.msrb.mxu3 %v1327_v38  ;;  %v1378_v37 = vld [vmem:[%s3866_s30 + $0x2168] sm:$0xff]  ;;  %v1395_v38 = vld [vmem:[%s3866_s30 + $0x21f0] sm:$0xff]  ;;  %v1352_v30 = vld [vmem:[%s3866_s30 + $0x2098] sm:$0xff] }
 0x25f   : > { %2849 = vmatpush.msrb.mxu0 %v1277_v39  ;;  %2868 = vmatpush.msrb.mxu1 %v1294_v40  ;;  %v1779_v39 = vpop.f32.mrf.mxu2  ;;  %v1345_v40 = vld [vmem:[%s3866_s30 + $0x2060] sm:$0xff] }
 0x260   : > { %2889 = vmatpush.msrb.mxu2 %v1309_v41  ;;  %2908 = vmatpush.msrb.mxu3 %v1326_v42  ;;  %v1362_v41 = vld [vmem:[%s3866_s30 + $0x20e8] sm:$0xff]  ;;  %v1377_v42 = vld [vmem:[%s3866_s30 + $0x2160] sm:$0xff] }
 0x261   : > { %2850 = vmatpush.msrb.mxu0 %v1276_v43  ;;  %2869 = vmatpush.msrb.mxu1 %v1293_v44  ;;  %v1394_v43 = vld [vmem:[%s3866_s30 + $0x21e8] sm:$0xff]  ;;  %v1344_v44 = vld [vmem:[%s3866_s30 + $0x2058] sm:$0xff] }
 0x262   : > { %2890 = vmatpush.msrb.mxu2 %v1308_v45  ;;  %2909 = vmatpush.msrb.mxu3 %v1325_v46  ;;  %v1361_v45 = vld [vmem:[%s3866_s30 + $0x20e0] sm:$0xff]  ;;  %v1780_v46 = vadd.f32 %v1779_v39, %v1760_v31  ;;  %v308_v31 = vld [vmem:[%s3858_s29 + $0x88] sm:$0xff] }
 0x263   : > { %2851 = vmatpush.msrb.mxu0 %v1275_v47  ;;  %2870 = vmatpush.msrb.mxu1 %v1292_v48  ;;  %v1376_v47 = vld [vmem:[%s3866_s30 + $0x2158] sm:$0xff]  ;;  %v1393_v48 = vld [vmem:[%s3866_s30 + $0x21e0] sm:$0xff]  ;;  %1561 = vst [vmem:[#allocation1 + $0x20] ss:$4 sm:$0xff] %v308_v31 }
 0x264   : > { %2891 = vmatpush.msrb.mxu2 %v1307_v49  ;;  %2910 = vmatpush.msrb.mxu3 %v1324_v50  ;;  %v1799_v49 = vpop.f32.mrf.mxu3  ;;  %v1343_v50 = vld [vmem:[%s3866_s30 + $0x2050] sm:$0xff]  ;;  %v1420_v31 = vld [vmem:[%s3866_s30 + $0x22b8] sm:$0xff] }
 0x265   : > { %2852 = vmatpush.msrb.mxu0 %v1274_v52  ;;  %2871 = vmatpush.msrb.mxu1 %v1291_v53  ;;  %v1375_v52 = vld [vmem:[%s3866_s30 + $0x2150] sm:$0xff]  ;;  %v1392_v53 = vld [vmem:[%s3866_s30 + $0x21d8] sm:$0xff] }
 0x266   : > { %2892 = vmatpush.msrb.mxu2 %v1306_v54  ;;  %2911 = vmatpush.msrb.mxu3 %v1323_v55  ;;  %v1819_v54 = vpop.f32.mrf.mxu0  ;;  %v1342_v55 = vld [vmem:[%s3866_s30 + $0x2048] sm:$0xff] }
 0x267   : > { %2853 = vmatpush.msrb.mxu0 %v1273_v57  ;;  %2872 = vmatpush.msrb.mxu1 %v1290_v58  ;;  %v1800_v57 = vadd.f32 %v1799_v49, %v1780_v46  ;;  %v1374_v58 = vld [vmem:[%s3866_s30 + $0x2148] sm:$0xff]  ;;  %v1444_v49 = vld [vmem:[%s3866_s30 + $0x2378] sm:$0xff] }
 0x268   : > { %2893 = vmatpush.msrb.mxu2 %v1305_v60  ;;  %2912 = vmatpush.msrb.mxu3 %v1322_v61  ;;  %v1341_v60 = vld [vmem:[%s3866_s30 + $0x2040] sm:$0xff]  ;;  %v1358_v61 = vld [vmem:[%s3866_s30 + $0x20c8] sm:$0xff] }
 0x269   : > { %2854 = vmatpush.msrb.mxu0 %v1272_v63  ;;  %2873 = vmatpush.msrb.mxu1 %v1289_v0  ;;  %v1820_v62 = vadd.f32 %v1819_v54, %v1800_v57  ;;  %v1373_v63 = vld [vmem:[%s3866_s30 + $0x2140] sm:$0xff]  ;;  %v1390_v0 = vld [vmem:[%s3866_s30 + $0x21c8] sm:$0xff]  ;;  %v1428_v57 = vld [vmem:[%s3866_s30 + $0x22f8] sm:$0xff] }
 0x26a   : > { %2894 = vmatpush.msrb.mxu2 %v1304_v1  ;;  %2913 = vmatpush.msrb.mxu3 %v1321_v2  ;;  %v1839_v1 = vpop.f32.mrf.mxu1  ;;  %v1340_v2 = vld [vmem:[%s3866_s30 + $0x2038] sm:$0xff]  ;;  %v1564_v46 = vld.sshfl [vmem:[#allocation1 + $0x10] sm:$0xff pattern:$0x73625140] }
 0x26b   : > { %2855 = vmatpush.msrb.mxu0 %v1271_v3  ;;  %2874 = vmatpush.msrb.mxu1 %v1288_v4  ;;  %v1357_v3 = vld [vmem:[%s3866_s30 + $0x20c0] sm:$0xff]  ;;  %v1372_v4 = vld [vmem:[%s3866_s30 + $0x2138] sm:$0xff]  ;;  %v1565_v54 = vld.sshfl [vmem:[#allocation1 + $0x18] sm:$0xff pattern:$0x73625140] }
 0x26c   : > { %2895 = vmatpush.msrb.mxu2 %v1303_v6  ;;  %2914 = vmatpush.msrb.mxu3 %v1320_v7  ;;  %v1859_v6 = vpop.f32.mrf.mxu2  ;;  %v1339_v7 = vld [vmem:[%s3866_s30 + $0x2030] sm:$0xff] }
 0x26d   : > { %2856 = vmatpush.msrb.mxu0 %v1270_v9  ;;  %2875 = vmatpush.msrb.mxu1 %v1287_v10  ;;  %v1840_v9 = vadd.f32 %v1839_v1, %v1820_v62  ;;  %v1371_v10 = vld [vmem:[%s3866_s30 + $0x2130] sm:$0xff] }
 0x26e   : > { %2896 = vmatpush.msrb.mxu2 %v1302_v12  ;;  %2915 = vmatpush.msrb.mxu3 %v1319_v13  ;;  %v1338_v12 = vld [vmem:[%s3866_s30 + $0x2028] sm:$0xff]  ;;  %v1355_v13 = vld [vmem:[%s3866_s30 + $0x20b0] sm:$0xff] }
 0x26f   : > { %2857 = vmatpush.msrb.mxu0 %v1269_v14  ;;  %2876 = vmatpush.msrb.mxu1 %v1286_v15  ;;  %v1860_v14 = vadd.f32 %v1859_v6, %v1840_v9  ;;  %v1370_v15 = vld [vmem:[%s3866_s30 + $0x2128] sm:$0xff]  ;;  %v1427_v62 = vld [vmem:[%s3866_s30 + $0x22f0] sm:$0xff]  ;;  %v1425_v9 = vld [vmem:[%s3866_s30 + $0x22e0] sm:$0xff] }
 0x270   : > { %2897 = vmatpush.msrb.mxu2 %v1301_v17  ;;  %2916 = vmatpush.msrb.mxu3 %v1318_v18  ;;  %v1879_v17 = vpop.f32.mrf.mxu3  ;;  %v1337_v18 = vld [vmem:[%s3866_s30 + $0x2020] sm:$0xff]  ;;  %v1459_v1 = vld [vmem:[%s3866_s30 + $0x23f0] sm:$0xff]  ;;  %v1458_v6 = vld [vmem:[%s3866_s30 + $0x23e8] sm:$0xff] }
 0x271   : > { %2858 = vmatmul.f32.vlgmr.msrb.gmra.mxu0 %v1556_v20  ;;  %2898 = vmatmul.f32.vlgmr.msrb.gmra.mxu2 %v1558_v21  ;;  %v1369_v20 = vld [vmem:[%s3866_s30 + $0x2120] sm:$0xff]  ;;  %v1386_v21 = vld [vmem:[%s3866_s30 + $0x21a8] sm:$0xff] }
 0x272   : > { %2922 = vmatpush.msra.mxu0 %v1348_v22  ;;  %2962 = vmatpush.msra.mxu2 %v1380_v23  ;;  %v1899_v22 = vpop.f32.mrf.mxu0  ;;  %v1336_v23 = vld [vmem:[%s3866_s30 + $0x2018] sm:$0xff] }
 0x273   : > { %2877 = vmatpush.msrb.mxu1 %v1285_v24  ;;  %2917 = vmatpush.msrb.mxu3 %v1317_v25  ;;  %v1353_v24 = vld [vmem:[%s3866_s30 + $0x20a0] sm:$0xff]  ;;  %v1880_v25 = vadd.f32 %v1879_v17, %v1860_v14  ;;  %v1424_v14 = vld [vmem:[%s3866_s30 + $0x22d8] sm:$0xff] }
 0x274   : > { %2878 = vmatmul.f32.vlgmr.msrb.gmra.mxu1 %v1557_v26  ;;  %2918 = vmatmul.f32.vlgmr.msrb.gmra.mxu3 %v1559_v27  ;;  %v1385_v26 = vld [vmem:[%s3866_s30 + $0x21a0] sm:$0xff]  ;;  %v1335_v27 = vld [vmem:[%s3866_s30 + $0x2010] sm:$0xff]  ;;  %v1939_v39 = vpop.f32.mrf.mxu2  ;;  %v1456_v17 = vld [vmem:[%s3866_s30 + $0x23d8] sm:$0xff] }
 0x275   : > { %2923 = vmatpush.msra.mxu0 %v1347_v32  ;;  %2942 = vmatpush.msra.mxu1 %v1364_v28  ;;  %v1900_v32 = vadd.f32 %v1899_v22, %v1880_v25  ;;  %v1367_v28 = vld [vmem:[%s3866_s30 + $0x2110] sm:$0xff]  ;;  %v1422_v25 = vld [vmem:[%s3866_s30 + $0x22c8] sm:$0xff] }
 0x276   : > { %2963 = vmatpush.msra.mxu2 %v1379_v34  ;;  %2982 = vmatpush.msra.mxu3 %v1396_v35  ;;  %v1384_v34 = vld [vmem:[%s3866_s30 + $0x2198] sm:$0xff]  ;;  %v1919_v35 = vpop.f32.mrf.mxu1  ;;  %v1455_v22 = vld [vmem:[%s3866_s30 + $0x23d0] sm:$0xff] }
 0x277   : > { %2924 = vmatpush.msra.mxu0 %v1346_v36  ;;  %2943 = vmatpush.msra.mxu1 %v1363_v33  ;;  %v1334_v36 = vld [vmem:[%s3866_s30 + $0x2008] sm:$0xff]  ;;  %v1351_v33 = vld [vmem:[%s3866_s30 + $0x2090] sm:$0xff] }
 0x278   : > { %2964 = vmatpush.msra.mxu2 %v1378_v37  ;;  %2983 = vmatpush.msra.mxu3 %v1395_v38  ;;  %v1366_v37 = vld [vmem:[%s3866_s30 + $0x2108] sm:$0xff]  ;;  %v1383_v38 = vld [vmem:[%s3866_s30 + $0x2190] sm:$0xff] }
 0x279   : > { %2925 = vmatpush.msra.mxu0 %v1345_v40  ;;  %2944 = vmatpush.msra.mxu1 %v1362_v41  ;;  %v1333_v40 = vld [vmem:[%s3866_s30 + $0x2000] sm:$0xff]  ;;  %v1350_v41 = vld [vmem:[%s3866_s30 + $0x2088] sm:$0xff] }
 0x27a   : > { %2965 = vmatpush.msra.mxu2 %v1377_v42  ;;  %2984 = vmatpush.msra.mxu3 %v1394_v43  ;;  %v1920_v42 = vadd.f32 %v1919_v35, %v1900_v32  ;;  %v1365_v43 = vld [vmem:[%s3866_s30 + $0x2100] sm:$0xff] }
 0x27b   : > { %2926 = vmatpush.msra.mxu0 %v1344_v44  ;;  %2945 = vmatpush.msra.mxu1 %v1361_v45  ;;  %v1382_v44 = vld [vmem:[%s3866_s30 + $0x2188] sm:$0xff]  ;;  %v1562_v45 = vld.sshfl [vmem:[#allocation1] sm:$0xff pattern:$0x73625140]  ;;  %v1421_v32 = vld [vmem:[%s3866_s30 + $0x22c0] sm:$0xff] }
 0x27c   : > { %2966 = vmatpush.msra.mxu2 %v1376_v47  ;;  %2985 = vmatpush.msra.mxu3 %v1393_v48  ;;  %v1940_v47 = vadd.f32 %v1939_v39, %v1920_v42  ;;  %v1412_v48 = vld [vmem:[%s3866_s30 + $0x2278] sm:$0xff]  ;;  %v1453_v35 = vld [vmem:[%s3866_s30 + $0x23c0] sm:$0xff] }
 0x27d   : > { %2927 = vmatpush.msra.mxu0 %v1343_v50  ;;  %2946 = vmatpush.msra.mxu1 %v1360_v51  ;;  %v1959_v50 = vpop.f32.mrf.mxu3  ;;  %v1349_v51 = vld [vmem:[%s3866_s30 + $0x2080] sm:$0xff] }
 0x27e   : > { %2967 = vmatpush.msra.mxu2 %v1375_v52  ;;  %2986 = vmatpush.msra.mxu3 %v1392_v53  ;;  %v1381_v52 = vld [vmem:[%s3866_s30 + $0x2180] sm:$0xff] }
 0x27f   : > { %2928 = vmatpush.msra.mxu0 %v1342_v55  ;;  %2947 = vmatpush.msra.mxu1 %v1359_v56  ;;  %v1563_v53 = vld.sshfl [vmem:[#allocation1 + $0x8] sm:$0xff pattern:$0x73625140]  ;;  %v1979_v55 = vpop.f32.mrf.mxu0  ;;  %v1411_v56 = vld [vmem:[%s3866_s30 + $0x2270] sm:$0xff] }
 0x280   : > { %2968 = vmatpush.msra.mxu2 %v1374_v58  ;;  %2987 = vmatpush.msra.mxu3 %v1391_v59  ;;  %v1960_v58 = vadd.f32 %v1959_v50, %v1940_v47  ;;  %v1443_v59 = vld [vmem:[%s3866_s30 + $0x2370] sm:$0xff] }
 0x281   : > { %2929 = vmatpush.msra.mxu0 %v1341_v60  ;;  %2948 = vmatpush.msra.mxu1 %v1358_v61  ;;  %v1460_v60 = vld [vmem:[%s3866_s30 + $0x23f8] sm:$0xff]  ;;  %v1410_v61 = vld [vmem:[%s3866_s30 + $0x2268] sm:$0xff] }
 0x282   : > { %2969 = vmatpush.msra.mxu2 %v1373_v63  ;;  %2988 = vmatpush.msra.mxu3 %v1390_v0  ;;  %v1980_v63 = vadd.f32 %v1979_v55, %v1960_v58  ;;  %v1442_v0 = vld [vmem:[%s3866_s30 + $0x2368] sm:$0xff] }
 0x283   : > { %2930 = vmatpush.msra.mxu0 %v1340_v2  ;;  %2949 = vmatpush.msra.mxu1 %v1357_v3  ;;  %v1999_v2 = vpop.f32.mrf.mxu1  ;;  %v1409_v3 = vld [vmem:[%s3866_s30 + $0x2260] sm:$0xff] }
 0x284   : > { %2970 = vmatpush.msra.mxu2 %v1372_v4  ;;  %2989 = vmatpush.msra.mxu3 %v1389_v5  ;;  %v1426_v4 = vld [vmem:[%s3866_s30 + $0x22e8] sm:$0xff]  ;;  %v1441_v5 = vld [vmem:[%s3866_s30 + $0x2360] sm:$0xff] }
 0x285   : > { %2931 = vmatpush.msra.mxu0 %v1339_v7  ;;  %2950 = vmatpush.msra.mxu1 %v1356_v8  ;;  %v2019_v7 = vpop.f32.mrf.mxu2  ;;  %v1408_v8 = vld [vmem:[%s3866_s30 + $0x2258] sm:$0xff] }
 0x286   : > { %2971 = vmatpush.msra.mxu2 %v1371_v10  ;;  %2990 = vmatpush.msra.mxu3 %v1388_v11  ;;  %v2000_v10 = vadd.f32 %v1999_v2, %v1980_v63  ;;  %v1440_v11 = vld [vmem:[%s3866_s30 + $0x2358] sm:$0xff] }
 0x287   : > { %2932 = vmatpush.msra.mxu0 %v1338_v12  ;;  %2951 = vmatpush.msra.mxu1 %v1355_v13  ;;  %v1457_v12 = vld [vmem:[%s3866_s30 + $0x23e0] sm:$0xff]  ;;  %v1407_v13 = vld [vmem:[%s3866_s30 + $0x2250] sm:$0xff] }
 0x288   : > { %2972 = vmatpush.msra.mxu2 %v1370_v15  ;;  %2991 = vmatpush.msra.mxu3 %v1387_v16  ;;  %v2020_v15 = vadd.f32 %v2019_v7, %v2000_v10  ;;  %v1439_v16 = vld [vmem:[%s3866_s30 + $0x2350] sm:$0xff] }
 0x289   : > { %2933 = vmatpush.msra.mxu0 %v1337_v18  ;;  %2952 = vmatpush.msra.mxu1 %v1354_v19  ;;  %v2039_v18 = vpop.f32.mrf.mxu3  ;;  %v1406_v19 = vld [vmem:[%s3866_s30 + $0x2248] sm:$0xff] }
 0x28a   : > { %2973 = vmatpush.msra.mxu2 %v1369_v20  ;;  %2992 = vmatpush.msra.mxu3 %v1386_v21  ;;  %v1423_v20 = vld [vmem:[%s3866_s30 + $0x22d0] sm:$0xff]  ;;  %v1438_v21 = vld [vmem:[%s3866_s30 + $0x2348] sm:$0xff] }
 0x28b   : > { %2934 = vmatpush.msra.mxu0 %v1336_v23  ;;  %2953 = vmatpush.msra.mxu1 %v1353_v24  ;;  %v2059_v23 = vpop.f32.mrf.mxu0  ;;  %v1405_v24 = vld [vmem:[%s3866_s30 + $0x2240] sm:$0xff] }
 0x28c   : > { %2974 = vmatpush.msra.mxu2 %v1368_v29  ;;  %2993 = vmatpush.msra.mxu3 %v1385_v26  ;;  %v2040_v29 = vadd.f32 %v2039_v18, %v2020_v15  ;;  %v1437_v26 = vld [vmem:[%s3866_s30 + $0x2340] sm:$0xff] }
 0x28d   : > { %2935 = vmatpush.msra.mxu0 %v1335_v27  ;;  %2954 = vmatpush.msra.mxu1 %v1352_v30  ;;  %v1454_v27 = vld [vmem:[%s3866_s30 + $0x23c8] sm:$0xff]  ;;  %v1404_v30 = vld [vmem:[%s3866_s30 + $0x2238] sm:$0xff]  ;;  %v2099_v39 = vpop.f32.mrf.mxu2 }
 0x28e   : > { %2975 = vmatpush.msra.mxu2 %v1367_v28  ;;  %2994 = vmatpush.msra.mxu3 %v1384_v34  ;;  %v2060_v28 = vadd.f32 %v2059_v23, %v2040_v29  ;;  %v1436_v34 = vld [vmem:[%s3866_s30 + $0x2338] sm:$0xff] }
 0x28f   : > { %2936 = vmatpush.msra.mxu0 %v1334_v36  ;;  %2955 = vmatpush.msra.mxu1 %v1351_v33  ;;  %v2079_v36 = vpop.f32.mrf.mxu1  ;;  %v1403_v33 = vld [vmem:[%s3866_s30 + $0x2230] sm:$0xff] }
 0x290   : > { %2976 = vmatpush.msra.mxu2 %v1366_v37  ;;  %2995 = vmatpush.msra.mxu3 %v1383_v38  ;;  %v1435_v37 = vld [vmem:[%s3866_s30 + $0x2330] sm:$0xff]  ;;  %v1452_v38 = vld [vmem:[%s3866_s30 + $0x23b8] sm:$0xff]  ;;  %v2080_v42 = vadd.f32 %v2079_v36, %v2060_v28 }
 0x291   : > { %2937 = vmatpush.msra.mxu0 %v1333_v40  ;;  %2956 = vmatpush.msra.mxu1 %v1350_v41  ;;  %v1402_v40 = vld [vmem:[%s3866_s30 + $0x2228] sm:$0xff]  ;;  %v1419_v41 = vld [vmem:[%s3866_s30 + $0x22b0] sm:$0xff]  ;;  %v2119_v50 = vpop.f32.mrf.mxu3 }
 0x292   : > { %2977 = vmatpush.msra.mxu2 %v1365_v43  ;;  %2996 = vmatpush.msra.mxu3 %v1382_v44  ;;  %v1434_v43 = vld [vmem:[%s3866_s30 + $0x2328] sm:$0xff]  ;;  %v1451_v44 = vld [vmem:[%s3866_s30 + $0x23b0] sm:$0xff]  ;;  %v2100_v47 = vadd.f32 %v2099_v39, %v2080_v42 }
 0x293   : > { %2938 = vmatmul.f32.vlgmr.msra.gmra.mxu0 %v1562_v45  ;;  %2978 = vmatmul.f32.vlgmr.msra.gmra.mxu2 %v1564_v46  ;;  %v1401_v45 = vld [vmem:[%s3866_s30 + $0x2220] sm:$0xff]  ;;  %v1418_v46 = vld [vmem:[%s3866_s30 + $0x22a8] sm:$0xff]  ;;  %v2139_v55 = vpop.f32.mrf.mxu0 }
 0x294   : > { %3002 = vmatpush.msrb.mxu0 %v1412_v48  ;;  %3042 = vmatpush.msrb.mxu2 %v1444_v49  ;;  %v1433_v48 = vld [vmem:[%s3866_s30 + $0x2320] sm:$0xff]  ;;  %v1450_v49 = vld [vmem:[%s3866_s30 + $0x23a8] sm:$0xff]  ;;  %v2120_v58 = vadd.f32 %v2119_v50, %v2100_v47 }
 0x295   : > { %2957 = vmatpush.msra.mxu1 %v1349_v51  ;;  %2997 = vmatpush.msra.mxu3 %v1381_v52  ;;  %v1400_v51 = vld [vmem:[%s3866_s30 + $0x2218] sm:$0xff]  ;;  %v1417_v52 = vld [vmem:[%s3866_s30 + $0x22a0] sm:$0xff]  ;;  %v2179_v7 = vpop.f32.mrf.mxu2 }
 0x296   : > { %2958 = vmatmul.f32.vlgmr.msra.gmra.mxu1 %v1563_v53  ;;  %2998 = vmatmul.f32.vlgmr.msra.gmra.mxu3 %v1565_v54  ;;  %v1432_v53 = vld [vmem:[%s3866_s30 + $0x2318] sm:$0xff]  ;;  %v1449_v54 = vld [vmem:[%s3866_s30 + $0x23a0] sm:$0xff]  ;;  %v2140_v63 = vadd.f32 %v2139_v55, %v2120_v58 }
 0x297   : > { %3003 = vmatpush.msrb.mxu0 %v1411_v56  ;;  %3022 = vmatpush.msrb.mxu1 %v1428_v57  ;;  %v1399_v56 = vld [vmem:[%s3866_s30 + $0x2210] sm:$0xff]  ;;  %v1416_v57 = vld [vmem:[%s3866_s30 + $0x2298] sm:$0xff]  ;;  %v2159_v2 = vpop.f32.mrf.mxu1 }
 0x298   : > { %3043 = vmatpush.msrb.mxu2 %v1443_v59  ;;  %3062 = vmatpush.msrb.mxu3 %v1460_v60  ;;  %v1431_v59 = vld [vmem:[%s3866_s30 + $0x2310] sm:$0xff]  ;;  %v1448_v60 = vld [vmem:[%s3866_s30 + $0x2398] sm:$0xff]  ;;  %v2160_v10 = vadd.f32 %v2159_v2, %v2140_v63 }
 0x299   : > { %3004 = vmatpush.msrb.mxu0 %v1410_v61  ;;  %3023 = vmatpush.msrb.mxu1 %v1427_v62  ;;  %v1398_v61 = vld [vmem:[%s3866_s30 + $0x2208] sm:$0xff]  ;;  %v1415_v62 = vld [vmem:[%s3866_s30 + $0x2290] sm:$0xff] }
 0x29a   : > { %3044 = vmatpush.msrb.mxu2 %v1442_v0  ;;  %3063 = vmatpush.msrb.mxu3 %v1459_v1  ;;  %v1430_v0 = vld [vmem:[%s3866_s30 + $0x2308] sm:$0xff]  ;;  %v1447_v1 = vld [vmem:[%s3866_s30 + $0x2390] sm:$0xff]  ;;  %v2180_v15 = vadd.f32 %v2179_v7, %v2160_v10 }
 0x29b   : > { %3005 = vmatpush.msrb.mxu0 %v1409_v3  ;;  %3024 = vmatpush.msrb.mxu1 %v1426_v4  ;;  %v1397_v3 = vld [vmem:[%s3866_s30 + $0x2200] sm:$0xff]  ;;  %v1414_v4 = vld [vmem:[%s3866_s30 + $0x2288] sm:$0xff] }
 0x29c   : > { %3045 = vmatpush.msrb.mxu2 %v1441_v5  ;;  %3064 = vmatpush.msrb.mxu3 %v1458_v6  ;;  %v1429_v5 = vld [vmem:[%s3866_s30 + $0x2300] sm:$0xff]  ;;  %v1446_v6 = vld [vmem:[%s3866_s30 + $0x2388] sm:$0xff] }
 0x29d   : > { %3006 = vmatpush.msrb.mxu0 %v1408_v8  ;;  %3025 = vmatpush.msrb.mxu1 %v1425_v9  ;;  %v1566_v8 = vld.sshfl [vmem:[#allocation1 + $0x20] sm:$0xff pattern:$0x73625140]  ;;  %v1568_v9 = vld.sshfl [vmem:[#allocation1 + $0x30] sm:$0xff pattern:$0x73625140] }
 0x29e   : > { %3046 = vmatpush.msrb.mxu2 %v1440_v11  ;;  %3065 = vmatpush.msrb.mxu3 %v1457_v12  ;;  %v1413_v11 = vld [vmem:[%s3866_s30 + $0x2280] sm:$0xff] }
 0x29f   : > { %3007 = vmatpush.msrb.mxu0 %v1407_v13  ;;  %3026 = vmatpush.msrb.mxu1 %v1424_v14  ;;  %v1445_v12 = vld [vmem:[%s3866_s30 + $0x2380] sm:$0xff]  ;;  %v1569_v14 = vld.sshfl [vmem:[#allocation1 + $0x38] sm:$0xff pattern:$0x73625140] }
 0x2a0   : > { %3047 = vmatpush.msrb.mxu2 %v1439_v16  ;;  %3066 = vmatpush.msrb.mxu3 %v1456_v17  ;;  %v1567_v13 = vld.sshfl [vmem:[#allocation1 + $0x28] sm:$0xff pattern:$0x73625140]  ;;  %v2199_v16 = vpop.f32.mrf.mxu3  ;;  %v2219_v17 = vpop.f32.mrf.mxu0 }
 0x2a1   : > { %3008 = vmatpush.msrb.mxu0 %v1406_v19  ;;  %3027 = vmatpush.msrb.mxu1 %v1423_v20  ;;  %v2200_v18 = vadd.f32 %v2199_v16, %v2180_v15  ;;  %v2239_v20 = vpop.f32.mrf.mxu1 }
 0x2a2   : > { %3048 = vmatpush.msrb.mxu2 %v1438_v21  ;;  %3067 = vmatpush.msrb.mxu3 %v1455_v22  ;;  %v2259_v21 = vpop.f32.mrf.mxu2 }
 0x2a3   : > { %3009 = vmatpush.msrb.mxu0 %v1405_v24  ;;  %3028 = vmatpush.msrb.mxu1 %v1422_v25  ;;  %v2220_v19 = vadd.f32 %v2219_v17, %v2200_v18 }
 0x2a4   : > { %3049 = vmatpush.msrb.mxu2 %v1437_v26  ;;  %3068 = vmatpush.msrb.mxu3 %v1454_v27 }
 0x2a5   : > { %3010 = vmatpush.msrb.mxu0 %v1404_v30  ;;  %3029 = vmatpush.msrb.mxu1 %v1421_v32  ;;  %v2240_v22 = vadd.f32 %v2239_v20, %v2220_v19 }
 0x2a6   : > { %3050 = vmatpush.msrb.mxu2 %v1436_v34  ;;  %3069 = vmatpush.msrb.mxu3 %v1453_v35 }
 0x2a7   : > { %3011 = vmatpush.msrb.mxu0 %v1403_v33  ;;  %3030 = vmatpush.msrb.mxu1 %v1420_v31  ;;  %v2260_v23 = vadd.f32 %v2259_v21, %v2240_v22 }
 0x2a8   : > { %3051 = vmatpush.msrb.mxu2 %v1435_v37  ;;  %3070 = vmatpush.msrb.mxu3 %v1452_v38  ;;  %v2279_v24 = vpop.f32.mrf.mxu3  ;;  %v2299_v25 = vpop.f32.mrf.mxu0 }
 0x2a9   : > { %3012 = vmatpush.msrb.mxu0 %v1402_v40  ;;  %3031 = vmatpush.msrb.mxu1 %v1419_v41  ;;  %v2280_v29 = vadd.f32 %v2279_v24, %v2260_v23  ;;  %v2319_v27 = vpop.f32.mrf.mxu1 }
 0x2aa   : > { %3052 = vmatpush.msrb.mxu2 %v1434_v43  ;;  %3071 = vmatpush.msrb.mxu3 %v1451_v44  ;;  %v2339_v30 = vpop.f32.mrf.mxu2 }
 0x2ab   : > { %3013 = vmatpush.msrb.mxu0 %v1401_v45  ;;  %3032 = vmatpush.msrb.mxu1 %v1418_v46  ;;  %v2300_v26 = vadd.f32 %v2299_v25, %v2280_v29 }
 0x2ac   : > { %3053 = vmatpush.msrb.mxu2 %v1433_v48  ;;  %3072 = vmatpush.msrb.mxu3 %v1450_v49 }
 0x2ad   : > { %3014 = vmatpush.msrb.mxu0 %v1400_v51  ;;  %3033 = vmatpush.msrb.mxu1 %v1417_v52  ;;  %v2320_v32 = vadd.f32 %v2319_v27, %v2300_v26 }
 0x2ae   : > { %3054 = vmatpush.msrb.mxu2 %v1432_v53  ;;  %3073 = vmatpush.msrb.mxu3 %v1449_v54 }
 0x2af   : > { %3015 = vmatpush.msrb.mxu0 %v1399_v56  ;;  %3034 = vmatpush.msrb.mxu1 %v1416_v57  ;;  %v2340_v28 = vadd.f32 %v2339_v30, %v2320_v32 }
 0x2b0   : > { %3055 = vmatpush.msrb.mxu2 %v1431_v59  ;;  %3074 = vmatpush.msrb.mxu3 %v1448_v60  ;;  %v2359_v34 = vpop.f32.mrf.mxu3  ;;  %v2379_v35 = vpop.f32.mrf.mxu0 }
 0x2b1   : > { %3016 = vmatpush.msrb.mxu0 %v1398_v61  ;;  %3035 = vmatpush.msrb.mxu1 %v1415_v62  ;;  %v2360_v36 = vadd.f32 %v2359_v34, %v2340_v28  ;;  %v2399_v31 = vpop.f32.mrf.mxu1 }
 0x2b2   : > { %3056 = vmatpush.msrb.mxu2 %v1430_v0  ;;  %3075 = vmatpush.msrb.mxu3 %v1447_v1  ;;  %v2419_v37 = vpop.f32.mrf.mxu2 }
 0x2b3   : > { %3017 = vmatpush.msrb.mxu0 %v1397_v3  ;;  %3036 = vmatpush.msrb.mxu1 %v1414_v4  ;;  %v2380_v33 = vadd.f32 %v2379_v35, %v2360_v36 }
 0x2b4   : > { %3057 = vmatpush.msrb.mxu2 %v1429_v5  ;;  %3076 = vmatpush.msrb.mxu3 %v1446_v6 }
 0x2b5   : > { %3018 = vmatmul.f32.vlgmr.msrb.gmra.mxu0 %v1566_v8  ;;  %3058 = vmatmul.f32.vlgmr.msrb.gmra.mxu2 %v1568_v9  ;;  %v2400_v38 = vadd.f32 %v2399_v31, %v2380_v33 }
 0x2b6   : > { %3037 = vmatpush.msrb.mxu1 %v1413_v11  ;;  %3077 = vmatpush.msrb.mxu3 %v1445_v12 }
 0x2b7   : > { %3038 = vmatmul.f32.vlgmr.msrb.gmra.mxu1 %v1567_v13  ;;  %3078 = vmatmul.f32.vlgmr.msrb.gmra.mxu3 %v1569_v14  ;;  %v2420_v39 = vadd.f32 %v2419_v37, %v2400_v38 }
 0x2b8   : > { %v2439_v40 = vpop.f32.mrf.mxu3  ;;  %v2459_v41 = vpop.f32.mrf.mxu0 }
 0x2b9   : > { %v2440_v42 = vadd.f32 %v2439_v40, %v2420_v39  ;;  %v2479_v44 = vpop.f32.mrf.mxu1  ;;  %v290_v40 = vld [vmem:[#allocation2] sm:$0x3] }
 0x2ba   : > { %v2499_v45 = vpop.f32.mrf.mxu2 }
 0x2bb   : > { %v2460_v43 = vadd.f32 %v2459_v41, %v2440_v42 }
 0x2bd   : > { %v2480_v46 = vadd.f32 %v2479_v44, %v2460_v43 }
 0x2bf   : > { %v2500_v47 = vadd.f32 %v2499_v45, %v2480_v46 }
 0x2c0   : > { %v2519_v48 = vpop.f32.mrf.mxu3  ;;  %v2539_v49 = vpop.f32.mrf.mxu0 }
 0x2c1   : > { %v2520_v50 = vadd.f32 %v2519_v48, %v2500_v47  ;;  %v2559_v52 = vpop.f32.mrf.mxu1 }
 0x2c2   : > { %v2579_v53 = vpop.f32.mrf.mxu2 }
 0x2c3   : > { %v2540_v51 = vadd.f32 %v2539_v49, %v2520_v50 }
 0x2c5   : > { %v2560_v54 = vadd.f32 %v2559_v52, %v2540_v51 }
 0x2c7   : > { %v2580_v55 = vadd.f32 %v2579_v53, %v2560_v54 }
 0x2c8   : > { %v2599_v56 = vpop.f32.mrf.mxu3  ;;  %v2619_v57 = vpop.f32.mrf.mxu0 }
 0x2c9   : > { %v2600_v58 = vadd.f32 %v2599_v56, %v2580_v55  ;;  %v2639_v60 = vpop.f32.mrf.mxu1 }
 0x2ca   : > { %v2659_v61 = vpop.f32.mrf.mxu2 }
 0x2cb   : > { %v2620_v59 = vadd.f32 %v2619_v57, %v2600_v58 }
 0x2cd   : > { %v2640_v62 = vadd.f32 %v2639_v60, %v2620_v59 }
 0x2cf   : > { %v2660_v63 = vadd.f32 %v2659_v61, %v2640_v62 }
 0x2d0   : > { %v2679_v0 = vpop.f32.mrf.mxu3  ;;  %v2699_v1 = vpop.f32.mrf.mxu0 }
 0x2d1   : > { %v2680_v2 = vadd.f32 %v2679_v0, %v2660_v63  ;;  %v2719_v4 = vpop.f32.mrf.mxu1 }
 0x2d2   : > { %v2739_v5 = vpop.f32.mrf.mxu2 }
 0x2d3   : > { %v2700_v3 = vadd.f32 %v2699_v1, %v2680_v2 }
 0x2d5   : > { %v2720_v6 = vadd.f32 %v2719_v4, %v2700_v3 }
 0x2d7   : > { %v2740_v7 = vadd.f32 %v2739_v5, %v2720_v6 }
 0x2d8   : > { %v2759_v8 = vpop.f32.mrf.mxu3  ;;  %v2779_v9 = vpop.f32.mrf.mxu0 }
 0x2d9   : > { %v2760_v10 = vadd.f32 %v2759_v8, %v2740_v7  ;;  %v2799_v12 = vpop.f32.mrf.mxu1 }
 0x2da   : > { %v2819_v13 = vpop.f32.mrf.mxu2 }
 0x2db   : > { %v2780_v11 = vadd.f32 %v2779_v9, %v2760_v10 }
 0x2dd   : > { %v2800_v14 = vadd.f32 %v2799_v12, %v2780_v11 }
 0x2df   : > { %v2820_v15 = vadd.f32 %v2819_v13, %v2800_v14 }
 0x2e0   : > { %v2839_v16 = vpop.f32.mrf.mxu3 }
 0x2e1   : > { %v2840_v18 = vadd.f32 %v2839_v16, %v2820_v15 }
 0x2ee   : > { %v2859_v17 = vpop.f32.mrf.mxu0 }
 0x2ef   : > { %v2860_v19 = vadd.f32 %v2859_v17, %v2840_v18 }
 0x2f1   : > { %v2879_v20 = vpop.f32.mrf.mxu1 }
 0x2f2   : > { %v2880_v22 = vadd.f32 %v2879_v20, %v2860_v19 }
 0x2f4   : > { %v2899_v21 = vpop.f32.mrf.mxu2 }
 0x2f5   : > { %v2900_v23 = vadd.f32 %v2899_v21, %v2880_v22 }
 0x2f7   : > { %v2919_v24 = vpop.f32.mrf.mxu3 }
 0x2f8   : > { %v2920_v29 = vadd.f32 %v2919_v24, %v2900_v23 }
 0x310   : > { %v2939_v25 = vpop.f32.mrf.mxu0 }
 0x311   : > { %v2940_v26 = vadd.f32 %v2939_v25, %v2920_v29 }
 0x313   : > { %v2959_v27 = vpop.f32.mrf.mxu1 }
 0x314   : > { %v2960_v32 = vadd.f32 %v2959_v27, %v2940_v26 }
 0x316   : > { %v2979_v30 = vpop.f32.mrf.mxu2 }
 0x317   : > { %v2980_v28 = vadd.f32 %v2979_v30, %v2960_v32 }
 0x319   : > { %v2999_v34 = vpop.f32.mrf.mxu3 }
 0x31a   : > { %v3000_v35 = vadd.f32 %v2999_v34, %v2980_v28 }
 0x332   : > { %v3019_v36 = vpop.f32.mrf.mxu0 }
 0x333   : > { %v3020_v33 = vadd.f32 %v3019_v36, %v3000_v35 }
 0x334   : > { %v3039_v31 = vpop.f32.mrf.mxu1 }
 0x335   : > { %v3040_v37 = vadd.f32 %v3039_v31, %v3020_v33 }
 0x338   : > { %v3059_v38 = vpop.f32.mrf.mxu2 }
 0x339   : > { %v3060_v39 = vadd.f32 %v3059_v38, %v3040_v37 }
 0x33a   : > { %v3079_v41 = vpop.f32.mrf.mxu3 }
 0x33b   : > { %v3080_v42 = vadd.f32 %v3079_v41, %v3060_v39  ;;  %3087 = sbr.rel (%p3238_p8) target bundleno = 840 (0x348), region = 52 }
 0x33d   : > { %v3082_v43 = vadd.f32 %v3080_v42, %v290_v40 }
 0x33f   : > { %3083 = vst [vmem:[#allocation2] sm:$0x3] %v3082_v43 }
 0x346   : > { %v3088_v44 = vld [vmem:[#allocation2] sm:$0x3] }
 0x347   : > { %3089 = vst [vmem:[%s3881_s7] sm:$0x3] %v3088_v44 }
 0x348 PF: > { %s5196_s11 = sld [smem:[#allocation15_spill]]  ;;  %s3103_s29 = sshll.u32 %s3881_s7, 4  ;;  %s3104_s29 = int_to_ptr.vmem [resolvable:$true] %s3103_s29 }
 0x349   : > { %s5197_s10 = sld [smem:[#allocation21_spill]]  ;;  %s3091_s27 = scalar_lea.sflag [#allocation5], %s3873_s15 }
 0x34e   : > { %s3240_s1 = sshll.u32 %s5196_s11, 1 }
 0x34f   : > { %s3101_s20 = scalar_lea.hbm %s5197_s10, %s3240_s1  ;;  %s3499_s18 = scalar_lea.hbm %s5197_s10, 4 }
 0x350   : > { %s3105_s28 = sshll.u32 %s3101_s20, 4  ;;  %s3106_s28 = int_to_ptr.hbm [resolvable:$true] %s3105_s28 }
 0x351   : > { %s3493_s21 = sshra.s32 %s3106_s28, 4  ;;  %s3494_s21 = int_to_ptr.hbm [resolvable:$true] %s3493_s21 }
 0x352   : > { %s3495_s3 = scalar_lea.hbm %s3494_s21, 2  ;;  %p3500_p10 = scmp.lt.s32.totalorder %s3494_s21, %s5197_s10 }
 0x353   : > { %p3496_p5 = scmp.ne.s32.totalorder %s3494_s21, %s3495_s3  ;;  %p3501_p11 = scmp.lt.s32.totalorder %s3499_s18, %s3495_s3 }
 0x355   : > { %p3497_p6 = pnand %p3496_p5, %p3842_p2  ;;  %p3502_p13 = por %p3501_p11, %p3500_p10 }
 0x357   : > { %p3498_p9 = pneg %p3497_p6 }
 0x359   : > { %p3503_p1 = pnand %p3502_p13, %p3498_p9 }
 0x35b   : > { %3506 = shalt.err (!%p3503_p1)
}
 0x35c   : > { %3255 = dma.vmem_to_hbm [thread:$0]  (%p3842_p2), %s3104_s29, 32, %s3106_s28, %s3091_s27  }
 0x35d PF: > { %p3272_p3 = scmp.ge.s32.totalorder %s3633_s25, 2  ;;  %s3117_s15 = sand.u32 1, %s3581_s12  }
 0x35e   : > { %s3118_s7 = scalar_lea.sflag [#allocation5], %s3117_s15 }
 0x35f   : > { %p3268_p7 = pnand %p3272_p3, %p3846_p0 }
 0x361   : > { %p3269_p12 = pneg %p3268_p7 }
 0x363   : > { %3576 = dma.done.wait (%p3269_p12), %s3118_s7, 32  }
 0x364   : > { %3578 = vsyncadd (%p3269_p12), %s3118_s7, 4294967264  ;;  %s22_s25 = sadd.s32 1, %s3633_s25   ;;  %s5199_s22 = sld [smem:[#allocation14_spill]] }
 0x365   : > { %p5122_p4 = scmp.ge.s32.totalorder %s22_s25, 10   ;;  %s5200_s20 = sld [smem:[#allocation19_spill]] }
 0x366   : > { %s5201_s21 = sld [smem:[#allocation16_spill]]  ;;  %s5204_s12 = smov %s3585_s13 }
 0x367   : > { %s5202_s23 = sld [smem:[#allocation17_spill]]  ;;  %s5205_s13 = smov %s3589_s14 }
 0x368   : > { %s5203_s4 = sld [smem:[#allocation18_spill]]  ;;  %s5206_s14 = smov %s3822_s26 }
 0x369   : > { %s5207_s15 = smov %s3597_s16  ;;  %s5208_s16 = smov %s3601_s17 }
 0x36a   : > { %s5209_s17 = smov %s3810_s9  ;;  %s5210_s18 = smov %s3609_s19 }
 0x36b   : > { %s5211_s19 = smov %s5199_s22  ;;  %s5212_s22 = smov %s3629_s24 }
 0x36c   :  { %21 = sbr.rel (!%p5122_p4) target bundleno = 15 (0xf), region = 110 }
 0x36e   : > { %s5213_s24 = smov %s5203_s4 }
 0x371   :  { %3124 = vsyncpa [#allocation4], 1 }
 0x372   :  { %3126 = vsyncpa [#allocation4 + $0x1], 1 }
 0x373   :  { %3127 = vsyncpa [#allocation7], 1 }
 0x374   :  { %3129 = vsyncpa [#allocation7 + $0x1], 1 }
 0x375   :  { %3130 = vsyncpa [#allocation5], 1 }
 0x376   :  { %3132 = vsyncpa [#allocation5 + $0x1], 1 }

</bundles_post_ra>
